<compile_context>
chip_gen: v7x
topology: tpu7x:2x2x1
jax: 0.10.0
libtpu: 0.0.40
codegen_flags: <defaults>
</compile_context>

<pallas_src>
import math
import functools

import jax
import jax.numpy as jnp
from jax.experimental import pallas as pl
from jax.experimental.pallas import tpu as pltpu

# Tile preferences (adaptive).
TM_PREF = 512   # rows per output tile (amortizes ~0.35us/grid-step overhead)
TN_PREF = 256   # lane-dense output tiles; do not grow further (v5e: 1 vst slot)
TK_PREF = 768   # divides 27*256=6912 exactly -> no K pad on the big GEMMs


def _round_up(x, m):
    return (x + m - 1) // m * m


def _pick_tile(dim, pref, align):
    """Pick a tile size for `dim`, preferring choices that avoid HBM pad-copies.

    1. full extent (dim <= pref)                 -> no pad, always layout-legal
    2. largest `align`-multiple divisor <= pref  -> no pad
    3. pref rounded down to `align`              -> caller pads (rare fallback)
    """
    if dim <= pref:
        return dim
    t = (pref // align) * align
    while t >= align:
        if dim % t == 0:
            return t
        t -= align
    return (pref // align) * align


# ----------------------------------------------------------------------------
# Generic tiled matmul + bias (+ optional fused ReLU) Pallas kernel.
# bf16 operands -> MXU -> f32 accumulator scratch -> bias/ReLU epilogue.
# ----------------------------------------------------------------------------
def _matmul_bias_kernel(a_ref, w_ref, b_ref, o_ref, acc_ref, *, relu):
    @pl.when(pl.program_id(2) == 0)
    def _():
        acc_ref[...] = jnp.zeros_like(acc_ref)

    acc_ref[...] += jnp.dot(a_ref[...], w_ref[...],
                            preferred_element_type=jnp.float32)

    @pl.when(pl.program_id(2) == pl.num_programs(2) - 1)
    def _():
        r = acc_ref[...] + b_ref[...]
        if relu:
            r = jnp.maximum(r, 0.0)
        o_ref[...] = r.astype(o_ref.dtype)


def pallas_matmul_bias(a, w, b, *, relu=False, out_dtype=jnp.bfloat16):
    M, K = a.shape
    K2, N = w.shape
    assert K == K2
    TM = _pick_tile(M, TM_PREF, 8)
    TN = _pick_tile(N, TN_PREF, 128)
    TK = _pick_tile(K, TK_PREF, 128)
    Mp, Kp, Np = _round_up(M, TM), _round_up(K, TK), _round_up(N, TN)

    a_p = a.astype(jnp.bfloat16)
    if (Mp, Kp) != (M, K):
        a_p = jnp.pad(a_p, ((0, Mp - M), (0, Kp - K)))
    w_p = w.astype(jnp.bfloat16)
    if (Kp, Np) != (K, N):
        w_p = jnp.pad(w_p, ((0, Kp - K), (0, Np - N)))
    b_p = b.astype(jnp.float32).reshape(1, -1)
    if Np != N:
        b_p = jnp.pad(b_p, ((0, 0), (0, Np - N)))

    out = pl.pallas_call(
        functools.partial(_matmul_bias_kernel, relu=relu),
        out_shape=jax.ShapeDtypeStruct((Mp, Np), out_dtype),
        grid_spec=pltpu.PrefetchScalarGridSpec(
            num_scalar_prefetch=0,
            grid=(Mp // TM, Np // TN, Kp // TK),
            in_specs=[
                pl.BlockSpec((TM, TK), lambda i, j, k: (i, k)),
                pl.BlockSpec((TK, TN), lambda i, j, k: (k, j)),
                pl.BlockSpec((1, TN), lambda i, j, k: (0, j)),
            ],
            out_specs=pl.BlockSpec((TM, TN), lambda i, j, k: (i, j)),
            scratch_shapes=[pltpu.VMEM((TM, TN), jnp.float32)],
        ),
        compiler_params=pltpu.CompilerParams(
            dimension_semantics=("parallel", "parallel", "arbitrary")),
    )(a_p, w_p, b_p)
    if (Mp, Np) != (M, N):
        out = out[:M, :N]
    return out


# ----------------------------------------------------------------------------
# Fused ASPP concat + 1x1x1 projection + ReLU.
#   * never materializes the (M, 5*Cmid) concat,
#   * the 4 computed-branch dots accumulate into a VMEM f32 scratch ref,
#   * the global-pool branch enters as a per-batch bias (no (M, Cmid)
#     broadcast tensor in HBM).
# ----------------------------------------------------------------------------
def _aspp_proj_kernel(b0_ref, b1_ref, b2_ref, b3_ref, w_ref, pb_ref,
                      o_ref, acc_ref):
    acc_ref[...] = pb_ref[...] + jnp.dot(b0_ref[...], w_ref[0],
                                         preferred_element_type=jnp.float32)
    acc_ref[...] += jnp.dot(b1_ref[...], w_ref[1],
                            preferred_element_type=jnp.float32)
    acc_ref[...] += jnp.dot(b2_ref[...], w_ref[2],
                            preferred_element_type=jnp.float32)
    acc_ref[...] += jnp.dot(b3_ref[...], w_ref[3],
                            preferred_element_type=jnp.float32)
    o_ref[...] = jnp.maximum(acc_ref[...], 0.0).astype(o_ref.dtype)


def pallas_aspp_concat_proj(branches, w4, pool_bias, *, out_dtype=jnp.bfloat16):
    # branches: list of 4 arrays (N, DHW, Cmid) bf16
    # w4:        (4, Cmid, Cout)  projection weight slices for the 4 branches
    # pool_bias: (N, Cout) f32 = pooled-branch contribution + projection bias
    N, DHW, Cmid = branches[0].shape
    Cout = w4.shape[-1]
    TM = _pick_tile(DHW, TM_PREF, 8)
    TN = _pick_tile(Cout, TN_PREF, 128)
    DHWp, Coutp = _round_up(DHW, TM), _round_up(Cout, TN)

    def pad_rows(x):
        return x if DHWp == DHW else jnp.pad(x, ((0, 0), (0, DHWp - DHW), (0, 0)))

    br = [pad_rows(x.astype(jnp.bfloat16)) for x in branches]
    w_p = w4.astype(jnp.bfloat16)
    if Coutp != Cout:
        w_p = jnp.pad(w_p, ((0, 0), (0, 0), (0, Coutp - Cout)))
    pb = pool_bias.astype(jnp.float32).reshape(N, 1, Cout)
    if Coutp != Cout:
        pb = jnp.pad(pb, ((0, 0), (0, 0), (0, Coutp - Cout)))

    out = pl.pallas_call(
        _aspp_proj_kernel,
        out_shape=jax.ShapeDtypeStruct((N, DHWp, Coutp), out_dtype),
        grid_spec=pltpu.PrefetchScalarGridSpec(
            num_scalar_prefetch=0,
            grid=(N, DHWp // TM, Coutp // TN),
            in_specs=[pl.BlockSpec((None, TM, Cmid), lambda n, i, j: (n, i, 0))] * 4
            + [
                pl.BlockSpec((4, Cmid, TN), lambda n, i, j: (0, 0, j)),
                pl.BlockSpec((None, 1, TN), lambda n, i, j: (n, 0, j)),
            ],
            out_specs=pl.BlockSpec((None, TM, TN), lambda n, i, j: (n, i, j)),
            scratch_shapes=[pltpu.VMEM((TM, TN), jnp.float32)],
        ),
        compiler_params=pltpu.CompilerParams(
            dimension_semantics=("parallel", "parallel", "parallel")),
    )(*br, w_p, pb)
    if (DHWp, Coutp) != (DHW, Cout):
        out = out[:, :DHW, :Cout]
    return out


# ----------------------------------------------------------------------------
# Dilated 3x3x3 conv (stride 1, PyTorch padding=dilation) — no HBM im2col.
# XLA's TPU conv emitter tiles this internally; bf16 operands, f32 accumulate.
# TODO(synk): a Pallas version needs overlapping (halo) input windows, which
# BlockSpec cannot express without pl.Element/manual DMA.
# ----------------------------------------------------------------------------
def conv3d_3x3x3(x_cl, w, b, *, dilation=1, relu=False, out_dtype=jnp.bfloat16):
    # x_cl: (N, D, H, W, Cin); w: (Cout, Cin, 3, 3, 3); b: (Cout,)
    w_t = jnp.transpose(w, (2, 3, 4, 1, 0)).astype(jnp.bfloat16)   # DHWIO
    y = jax.lax.conv_general_dilated(
        x_cl.astype(jnp.bfloat16), w_t,
        window_strides=(1, 1, 1),
        padding=[(dilation, dilation)] * 3,
        rhs_dilation=(dilation, dilation, dilation),
        dimension_numbers=("NDHWC", "DHWIO", "NDHWC"),
        preferred_element_type=jnp.float32)
    y = y + b.astype(jnp.float32)
    if relu:
        y = jnp.maximum(y, 0.0)
    return y.astype(out_dtype)


# ----------------------------------------------------------------------------
# Modulated trilinear sampling (zero padding outside bounds).
# sigmoid(alpha) and the out-of-bounds mask are folded into the per-corner
# weight, so the (M, 27, C) sampled tensor gets exactly one weighted-sum pass
# and is emitted once in bf16 with k-major columns (column = k*Cin + c).
# TODO(synk): the data-dependent gather stays in XLA; in-kernel fusion needs a
# VMEM-resident slab gather which Mosaic cannot express portably today.
# ----------------------------------------------------------------------------
def deform_sample_modulated(x_cl, defo):
    # x_cl: (N,D,H,W,C); defo: (N,D,H,W,108) f32 raw deformation-conv output
    N, D, H, W, C = x_cl.shape
    offsets = defo[..., :81].reshape(N, D, H, W, 27, 3)   # (dd, dh, dw) per point
    alpha = jax.nn.sigmoid(defo[..., 81:])                 # (N,D,H,W,27)

    kd, kh, kw = jnp.meshgrid(jnp.arange(3), jnp.arange(3), jnp.arange(3),
                              indexing="ij")
    koff = (jnp.stack([kd, kh, kw], axis=-1).reshape(27, 3).astype(jnp.float32)
            - 1.0)                                         # k = kd*9 + kh*3 + kw
    base = jnp.stack(jnp.meshgrid(jnp.arange(D), jnp.arange(H), jnp.arange(W),
                                  indexing="ij"), axis=-1).astype(jnp.float32)
    pos = (base[None, :, :, :, None, :] + koff[None, None, None, None, :, :]
           + offsets)                                      # (N,D,H,W,27,3)
    p0f = jnp.floor(pos)
    t = pos - p0f
    p0 = p0f.astype(jnp.int32)
    x_flat = x_cl.astype(jnp.bfloat16).reshape(N, D * H * W, C)

    acc = None
    for cz in (0, 1):
        for cy in (0, 1):
            for cx in (0, 1):
                iz = p0[..., 0] + cz
                iy = p0[..., 1] + cy
                ix = p0[..., 2] + cx
                wgt = ((t[..., 0] if cz else 1.0 - t[..., 0])
                       * (t[..., 1] if cy else 1.0 - t[..., 1])
                       * (t[..., 2] if cx else 1.0 - t[..., 2]))
                valid = ((iz >= 0) & (iz < D) & (iy >= 0) & (iy < H)
                         & (ix >= 0) & (ix < W))
                # fold zero-padding mask AND sigmoid modulation into the weight
                wgt = jnp.where(valid, wgt, 0.0) * alpha   # (N,D,H,W,27) f32
                lin = ((jnp.clip(iz, 0, D - 1) * H + jnp.clip(iy, 0, H - 1))
                       * W + jnp.clip(ix, 0, W - 1))       # (N,D,H,W,27)
                g = jax.vmap(
                    lambda xf, idx: jnp.take(xf, idx.reshape(-1), axis=0)
                )(x_flat, lin).reshape(N, D, H, W, 27, C).astype(jnp.float32)
                term = wgt[..., None] * g
                acc = term if acc is None else acc + term
    return acc.astype(jnp.bfloat16).reshape(-1, 27 * C)    # column = k*C + c


# ----------------------------------------------------------------------------
# Deterministic parameter init (Kaiming-uniform-like, fixed PRNG keys).
# ----------------------------------------------------------------------------
def _init_conv(key, cout, cin, k):
    fan_in = cin * k ** 3
    s = 1.0 / math.sqrt(fan_in)
    kw_, kb_ = jax.random.split(key)
    w = jax.random.uniform(kw_, (cout, cin, k, k, k), jnp.float32, -s, s)
    b = jax.random.uniform(kb_, (cout,), jnp.float32, -s, s)
    return w, b


def init_params(key, inplanes, planes, mid=256, out_ch=256):
    keys = jax.random.split(key, 8)
    p = {}
    p["aspp_b0"] = _init_conv(keys[0], mid, inplanes, 1)
    p["aspp_b1"] = _init_conv(keys[1], mid, inplanes, 3)
    p["aspp_b2"] = _init_conv(keys[2], mid, inplanes, 3)
    p["aspp_b3"] = _init_conv(keys[3], mid, inplanes, 3)
    p["aspp_pool"] = _init_conv(keys[4], mid, inplanes, 1)
    p["aspp_proj"] = _init_conv(keys[5], out_ch, 5 * mid, 1)
    dw, _ = _init_conv(keys[6], 108, out_ch, 3)
    # deformable-conv convention: small offsets / neutral modulation at init
    p["deformation"] = (dw * 0.01, jnp.zeros((108,), jnp.float32))
    p["c3d"] = _init_conv(keys[7], planes, inplanes, 3)
    return p


# ----------------------------------------------------------------------------
# Forward pass (mirrors ASPPModulatedDeformableC3D.forward).
# ----------------------------------------------------------------------------
def aspp_modulated_deformable_c3d(x_ncdhw, params):
    x = jnp.transpose(x_ncdhw, (0, 2, 3, 4, 1))            # NCDHW -> NDHWC
    N, D, H, W, Cin = x.shape
    DHW = D * H * W
    M = N * DHW
    x_bf = x.astype(jnp.bfloat16)

    w0, bb0 = params["aspp_b0"]
    Cmid = w0.shape[0]

    # --- ASPPModule(inplanes, 256, 256) branches ---
    # 1x1x1 branch: a pure GEMM -> Pallas
    b0 = pallas_matmul_bias(x_bf.reshape(M, Cin),
                            w0.reshape(Cmid, Cin).T, bb0,
                            relu=True).reshape(N, DHW, Cmid)
    # dilated 3x3x3 branches: XLA conv, no HBM im2col
    b1 = conv3d_3x3x3(x_bf, *params["aspp_b1"], dilation=2,
                      relu=True).reshape(N, DHW, Cmid)
    b2 = conv3d_3x3x3(x_bf, *params["aspp_b2"], dilation=4,
                      relu=True).reshape(N, DHW, Cmid)
    b3 = conv3d_3x3x3(x_bf, *params["aspp_b3"], dilation=6,
                      relu=True).reshape(N, DHW, Cmid)

    # global-pool branch: tiny (N rows) -> plain XLA dot; its projection
    # contribution becomes a per-batch bias of the fused projection kernel.
    wp, bp = params["aspp_pool"]
    wproj, bproj = params["aspp_proj"]
    Cout = wproj.shape[0]
    pooled = jnp.mean(x.astype(jnp.float32), axis=(1, 2, 3))            # (N,Cin)
    pooled = jax.nn.relu(pooled @ wp.reshape(Cmid, Cin).T + bp)         # (N,Cmid)
    wproj2 = jnp.transpose(wproj.reshape(Cout, 5, Cmid), (1, 2, 0))     # (5,Cmid,Cout)
    pool_bias = pooled @ wproj2[4] + bproj                              # (N,Cout)

    # fused concat + 1x1x1 projection + ReLU (no 1280-channel concat in HBM)
    pyramid = pallas_aspp_concat_proj([b0, b1, b2, b3], wproj2[:4],
                                      pool_bias)            # (N,DHW,Cout) bf16
    pyramid = pyramid.reshape(N, D, H, W, Cout)

    # --- self.deformation: Conv3d(256, 108, 3, padding=1), f32 output ---
    wd, bd = params["deformation"]
    defo = conv3d_3x3x3(pyramid, wd, bd, dilation=1, relu=False,
                        out_dtype=jnp.float32)              # (N,D,H,W,108)

    # --- self.c3d: modulated DeformConv3d(inplanes, planes, 3, padding=1) ---
    v = deform_sample_modulated(x, defo)                    # (M, 27*Cin) bf16
    wc, bc = params["c3d"]
    planes = wc.shape[0]
    w2 = jnp.transpose(wc, (2, 3, 4, 1, 0)).reshape(27 * Cin, planes)   # k-major
    out = pallas_matmul_bias(v, w2, bc, relu=False, out_dtype=jnp.float32)
    out = out.reshape(N, D, H, W, planes)
    return jnp.transpose(out, (0, 4, 1, 2, 3))              # NDHWC -> NCDHW


if __name__ == "__main__":
    key = jax.random.PRNGKey(0)
    kx, kp = jax.random.split(key)
    inplanes, planes = 4, 8
    x = jax.random.normal(kx, (2, inplanes, 6, 8, 8), jnp.float32)
    params = init_params(kp, inplanes, planes)

    fwd = jax.jit(aspp_modulated_deformable_c3d)
    out = fwd(x, params)
    out = jax.block_until_ready(out)
    assert out.shape == (2, planes, 6, 8, 8), out.shape
    assert bool(jnp.all(jnp.isfinite(out)))
    print("KERNEL_OK")
</pallas_src>

<mosaic_0001>
module attributes {stable_mosaic.version = 11 : i64} {
  func.func @_matmul_bias_kernel(%arg0: i32, %arg1: i32, %arg2: i32, %arg3: memref<384x4xbf16, #tpu.memory_space<vmem>>, %arg4: memref<4x256xbf16, #tpu.memory_space<vmem>>, %arg5: memref<1x256xf32, #tpu.memory_space<vmem>>, %arg6: memref<384x256xbf16, #tpu.memory_space<vmem>>, %arg7: memref<384x256xf32, #tpu.memory_space<vmem>>) attributes {dimension_semantics = [#tpu.dimension_semantics<parallel>, #tpu.dimension_semantics<parallel>, #tpu.dimension_semantics<arbitrary>], iteration_bounds = array<i64: 2, 1, 1>, scalar_prefetch = 0 : i64, scratch_operands = 1 : i64, tpu.core_type = #tpu.core_type<tc>, window_params = [{transform_indices = @transform_0, window_bounds = array<i64: 384, 4>}, {transform_indices = @transform_1, window_bounds = array<i64: 4, 256>}, {transform_indices = @transform_2, window_bounds = array<i64: 1, 256>}, {transform_indices = @transform_3, window_bounds = array<i64: 384, 256>}]} {
    %c0_i32 = arith.constant 0 : i32
    %0 = arith.cmpi eq, %arg2, %c0_i32 : i32
    %1 = arith.extui %0 : i1 to i32
    %c0_i32_0 = arith.constant 0 : i32
    %2 = arith.cmpi ne, %1, %c0_i32_0 : i32
    scf.if %2 {
      %cst_10 = arith.constant 0.000000e+00 : f32
      %12 = vector.broadcast %cst_10 : f32 to vector<384x256xf32>
      %c0_11 = arith.constant 0 : index
      %c0_12 = arith.constant 0 : index
      %13 = vector.load %arg7[%c0_11, %c0_12] : memref<384x256xf32, #tpu.memory_space<vmem>>, vector<384x256xf32>
      tpu.vector_store %arg7[%c0_11, %c0_12], %12 {strides = array<i32>} : memref<384x256xf32, #tpu.memory_space<vmem>>, vector<384x256xf32>,
    } else {
    }
    %c0 = arith.constant 0 : index
    %c0_1 = arith.constant 0 : index
    %3 = vector.load %arg7[%c0, %c0_1] : memref<384x256xf32, #tpu.memory_space<vmem>>, vector<384x256xf32>
    %c0_2 = arith.constant 0 : index
    %c0_3 = arith.constant 0 : index
    %4 = vector.load %arg3[%c0_2, %c0_3] : memref<384x4xbf16, #tpu.memory_space<vmem>>, vector<384x4xbf16>
    %c0_4 = arith.constant 0 : index
    %c0_5 = arith.constant 0 : index
    %5 = vector.load %arg4[%c0_4, %c0_5] : memref<4x256xbf16, #tpu.memory_space<vmem>>, vector<4x256xbf16>
    %cst = arith.constant dense<0.000000e+00> : vector<384x256xf32>
    %6 = tpu.matmul %4, %5, %cst {dimension_numbers = #tpu.dot_dimension_numbers<[1], [0], [0], [1], [0, 0, 1, 1], [], []>} : vector<384x4xbf16>, vector<4x256xbf16>, vector<384x256xf32> -> vector<384x256xf32>
    %7 = arith.addf %3, %6 : vector<384x256xf32>
    %c0_6 = arith.constant 0 : index
    %c0_7 = arith.constant 0 : index
    %8 = vector.load %arg7[%c0_6, %c0_7] : memref<384x256xf32, #tpu.memory_space<vmem>>, vector<384x256xf32>
    tpu.vector_store %arg7[%c0_6, %c0_7], %7 {strides = array<i32>} : memref<384x256xf32, #tpu.memory_space<vmem>>, vector<384x256xf32>,
    %c0_i32_8 = arith.constant 0 : i32
    %9 = arith.cmpi eq, %arg2, %c0_i32_8 : i32
    %10 = arith.extui %9 : i1 to i32
    %c0_i32_9 = arith.constant 0 : i32
    %11 = arith.cmpi ne, %10, %c0_i32_9 : i32
    scf.if %11 {
      %c0_10 = arith.constant 0 : index
      %c0_11 = arith.constant 0 : index
      %12 = vector.load %arg7[%c0_10, %c0_11] : memref<384x256xf32, #tpu.memory_space<vmem>>, vector<384x256xf32>
      %c0_12 = arith.constant 0 : index
      %c0_13 = arith.constant 0 : index
      %13 = vector.load %arg5[%c0_12, %c0_13] : memref<1x256xf32, #tpu.memory_space<vmem>>, vector<1x256xf32>
      %14 = vector.broadcast %13 : vector<1x256xf32> to vector<384x256xf32>
      %15 = arith.addf %12, %14 : vector<384x256xf32>
      %cst_14 = arith.constant 0.000000e+00 : f32
      %16 = vector.broadcast %cst_14 : f32 to vector<384x256xf32>
      %17 = arith.maximumf %15, %16 : vector<384x256xf32>
      %18 = arith.truncf %17 : vector<384x256xf32> to vector<384x256xbf16>
      %c0_15 = arith.constant 0 : index
      %c0_16 = arith.constant 0 : index
      %19 = vector.load %arg6[%c0_15, %c0_16] : memref<384x256xbf16, #tpu.memory_space<vmem>>, vector<384x256xbf16>
      tpu.vector_store %arg6[%c0_15, %c0_16], %18 {strides = array<i32>} : memref<384x256xbf16, #tpu.memory_space<vmem>>, vector<384x256xbf16>,
    } else {
    }
    return
  }
  func.func @transform_0(%arg0: i32, %arg1: i32, %arg2: i32) -> (i32, i32) {
    %c0_i32 = arith.constant 0 : i32
    return %arg0, %arg2 : i32, i32
  }
  func.func @transform_1(%arg0: i32, %arg1: i32, %arg2: i32) -> (i32, i32) {
    %c0_i32 = arith.constant 0 : i32
    return %arg2, %arg1 : i32, i32
  }
  func.func @transform_2(%arg0: i32, %arg1: i32, %arg2: i32) -> (i32, i32) {
    %c0_i32 = arith.constant 0 : i32
    %c0_i32_0 = arith.constant 0 : i32
    return %c0_i32, %arg1 : i32, i32
  }
  func.func @transform_3(%arg0: i32, %arg1: i32, %arg2: i32) -> (i32, i32) {
    %c0_i32 = arith.constant 0 : i32
    return %arg0, %arg1 : i32, i32
  }
}

module attributes {stable_mosaic.version = 11 : i64} {
  func.func @_aspp_proj_kernel(%arg0: i32, %arg1: i32, %arg2: i32, %arg3: memref<1x384x256xbf16, #tpu.memory_space<vmem>>, %arg4: memref<1x384x256xbf16, #tpu.memory_space<vmem>>, %arg5: memref<1x384x256xbf16, #tpu.memory_space<vmem>>, %arg6: memref<1x384x256xbf16, #tpu.memory_space<vmem>>, %arg7: memref<4x256x256xbf16, #tpu.memory_space<vmem>>, %arg8: memref<1x1x256xf32, #tpu.memory_space<vmem>>, %arg9: memref<1x384x256xbf16, #tpu.memory_space<vmem>>, %arg10: memref<384x256xf32, #tpu.memory_space<vmem>>) attributes {dimension_semantics = [#tpu.dimension_semantics<parallel>, #tpu.dimension_semantics<parallel>, #tpu.dimension_semantics<parallel>], iteration_bounds = array<i64: 2, 1, 1>, scalar_prefetch = 0 : i64, scratch_operands = 1 : i64, tpu.core_type = #tpu.core_type<tc>, window_params = [{transform_indices = @transform_0, window_bounds = array<i64: 1, 384, 256>}, {transform_indices = @transform_1, window_bounds = array<i64: 1, 384, 256>}, {transform_indices = @transform_2, window_bounds = array<i64: 1, 384, 256>}, {transform_indices = @transform_3, window_bounds = array<i64: 1, 384, 256>}, {transform_indices = @transform_4, window_bounds = array<i64: 4, 256, 256>}, {transform_indices = @transform_5, window_bounds = array<i64: 1, 1, 256>}, {transform_indices = @transform_6, window_bounds = array<i64: 1, 384, 256>}]} {
    %c0 = arith.constant 0 : index
    %c0_0 = arith.constant 0 : index
    %c0_1 = arith.constant 0 : index
    %0 = vector.load %arg8[%c0, %c0_0, %c0_1] : memref<1x1x256xf32, #tpu.memory_space<vmem>>, vector<1x1x256xf32>
    %1 = vector.shape_cast %0 : vector<1x1x256xf32> to vector<1x256xf32>
    %c0_2 = arith.constant 0 : index
    %c0_3 = arith.constant 0 : index
    %c0_4 = arith.constant 0 : index
    %2 = vector.load %arg3[%c0_2, %c0_3, %c0_4] : memref<1x384x256xbf16, #tpu.memory_space<vmem>>, vector<1x384x256xbf16>
    %3 = vector.shape_cast %2 : vector<1x384x256xbf16> to vector<384x256xbf16>
    %c0_5 = arith.constant 0 : index
    %c0_6 = arith.constant 0 : index
    %c0_7 = arith.constant 0 : index
    %4 = vector.load %arg7[%c0_5, %c0_6, %c0_7] : memref<4x256x256xbf16, #tpu.memory_space<vmem>>, vector<1x256x256xbf16>
    %5 = vector.shape_cast %4 : vector<1x256x256xbf16> to vector<256x256xbf16>
    %cst = arith.constant dense<0.000000e+00> : vector<384x256xf32>
    %6 = tpu.matmul %3, %5, %cst {dimension_numbers = #tpu.dot_dimension_numbers<[1], [0], [0], [1], [0, 0, 1, 1], [], []>} : vector<384x256xbf16>, vector<256x256xbf16>, vector<384x256xf32> -> vector<384x256xf32>
    %7 = vector.broadcast %1 : vector<1x256xf32> to vector<384x256xf32>
    %8 = arith.addf %7, %6 : vector<384x256xf32>
    %c0_8 = arith.constant 0 : index
    %c0_9 = arith.constant 0 : index
    %9 = vector.load %arg10[%c0_8, %c0_9] : memref<384x256xf32, #tpu.memory_space<vmem>>, vector<384x256xf32>
    tpu.vector_store %arg10[%c0_8, %c0_9], %8 {strides = array<i32>} : memref<384x256xf32, #tpu.memory_space<vmem>>, vector<384x256xf32>,
    %c0_10 = arith.constant 0 : index
    %c0_11 = arith.constant 0 : index
    %10 = vector.load %arg10[%c0_10, %c0_11] : memref<384x256xf32, #tpu.memory_space<vmem>>, vector<384x256xf32>
    %c0_12 = arith.constant 0 : index
    %c0_13 = arith.constant 0 : index
    %c0_14 = arith.constant 0 : index
    %11 = vector.load %arg4[%c0_12, %c0_13, %c0_14] : memref<1x384x256xbf16, #tpu.memory_space<vmem>>, vector<1x384x256xbf16>
    %12 = vector.shape_cast %11 : vector<1x384x256xbf16> to vector<384x256xbf16>
    %c1 = arith.constant 1 : index
    %c0_15 = arith.constant 0 : index
    %c0_16 = arith.constant 0 : index
    %13 = vector.load %arg7[%c1, %c0_15, %c0_16] : memref<4x256x256xbf16, #tpu.memory_space<vmem>>, vector<1x256x256xbf16>
    %14 = vector.shape_cast %13 : vector<1x256x256xbf16> to vector<256x256xbf16>
    %cst_17 = arith.constant dense<0.000000e+00> : vector<384x256xf32>
    %15 = tpu.matmul %12, %14, %cst_17 {dimension_numbers = #tpu.dot_dimension_numbers<[1], [0], [0], [1], [0, 0, 1, 1], [], []>} : vector<384x256xbf16>, vector<256x256xbf16>, vector<384x256xf32> -> vector<384x256xf32>
    %16 = arith.addf %10, %15 : vector<384x256xf32>
    %c0_18 = arith.constant 0 : index
    %c0_19 = arith.constant 0 : index
    %17 = vector.load %arg10[%c0_18, %c0_19] : memref<384x256xf32, #tpu.memory_space<vmem>>, vector<384x256xf32>
    tpu.vector_store %arg10[%c0_18, %c0_19], %16 {strides = array<i32>} : memref<384x256xf32, #tpu.memory_space<vmem>>, vector<384x256xf32>,
    %c0_20 = arith.constant 0 : index
    %c0_21 = arith.constant 0 : index
    %18 = vector.load %arg10[%c0_20, %c0_21] : memref<384x256xf32, #tpu.memory_space<vmem>>, vector<384x256xf32>
    %c0_22 = arith.constant 0 : index
    %c0_23 = arith.constant 0 : index
    %c0_24 = arith.constant 0 : index
    %19 = vector.load %arg5[%c0_22, %c0_23, %c0_24] : memref<1x384x256xbf16, #tpu.memory_space<vmem>>, vector<1x384x256xbf16>
    %20 = vector.shape_cast %19 : vector<1x384x256xbf16> to vector<384x256xbf16>
    %c2 = arith.constant 2 : index
    %c0_25 = arith.constant 0 : index
    %c0_26 = arith.constant 0 : index
    %21 = vector.load %arg7[%c2, %c0_25, %c0_26] : memref<4x256x256xbf16, #tpu.memory_space<vmem>>, vector<1x256x256xbf16>
    %22 = vector.shape_cast %21 : vector<1x256x256xbf16> to vector<256x256xbf16>
    %cst_27 = arith.constant dense<0.000000e+00> : vector<384x256xf32>
    %23 = tpu.matmul %20, %22, %cst_27 {dimension_numbers = #tpu.dot_dimension_numbers<[1], [0], [0], [1], [0, 0, 1, 1], [], []>} : vector<384x256xbf16>, vector<256x256xbf16>, vector<384x256xf32> -> vector<384x256xf32>
    %24 = arith.addf %18, %23 : vector<384x256xf32>
    %c0_28 = arith.constant 0 : index
    %c0_29 = arith.constant 0 : index
    %25 = vector.load %arg10[%c0_28, %c0_29] : memref<384x256xf32, #tpu.memory_space<vmem>>, vector<384x256xf32>
    tpu.vector_store %arg10[%c0_28, %c0_29], %24 {strides = array<i32>} : memref<384x256xf32, #tpu.memory_space<vmem>>, vector<384x256xf32>,
    %c0_30 = arith.constant 0 : index
    %c0_31 = arith.constant 0 : index
    %26 = vector.load %arg10[%c0_30, %c0_31] : memref<384x256xf32, #tpu.memory_space<vmem>>, vector<384x256xf32>
    %c0_32 = arith.constant 0 : index
    %c0_33 = arith.constant 0 : index
    %c0_34 = arith.constant 0 : index
    %27 = vector.load %arg6[%c0_32, %c0_33, %c0_34] : memref<1x384x256xbf16, #tpu.memory_space<vmem>>, vector<1x384x256xbf16>
    %28 = vector.shape_cast %27 : vector<1x384x256xbf16> to vector<384x256xbf16>
    %c3 = arith.constant 3 : index
    %c0_35 = arith.constant 0 : index
    %c0_36 = arith.constant 0 : index
    %29 = vector.load %arg7[%c3, %c0_35, %c0_36] : memref<4x256x256xbf16, #tpu.memory_space<vmem>>, vector<1x256x256xbf16>
    %30 = vector.shape_cast %29 : vector<1x256x256xbf16> to vector<256x256xbf16>
    %cst_37 = arith.constant dense<0.000000e+00> : vector<384x256xf32>
    %31 = tpu.matmul %28, %30, %cst_37 {dimension_numbers = #tpu.dot_dimension_numbers<[1], [0], [0], [1], [0, 0, 1, 1], [], []>} : vector<384x256xbf16>, vector<256x256xbf16>, vector<384x256xf32> -> vector<384x256xf32>
    %32 = arith.addf %26, %31 : vector<384x256xf32>
    %c0_38 = arith.constant 0 : index
    %c0_39 = arith.constant 0 : index
    %33 = vector.load %arg10[%c0_38, %c0_39] : memref<384x256xf32, #tpu.memory_space<vmem>>, vector<384x256xf32>
    tpu.vector_store %arg10[%c0_38, %c0_39], %32 {strides = array<i32>} : memref<384x256xf32, #tpu.memory_space<vmem>>, vector<384x256xf32>,
    %c0_40 = arith.constant 0 : index
    %c0_41 = arith.constant 0 : index
    %34 = vector.load %arg10[%c0_40, %c0_41] : memref<384x256xf32, #tpu.memory_space<vmem>>, vector<384x256xf32>
    %cst_42 = arith.constant 0.000000e+00 : f32
    %35 = vector.broadcast %cst_42 : f32 to vector<384x256xf32>
    %36 = arith.maximumf %34, %35 : vector<384x256xf32>
    %37 = arith.truncf %36 : vector<384x256xf32> to vector<384x256xbf16>
    %c0_43 = arith.constant 0 : index
    %c0_44 = arith.constant 0 : index
    %c0_45 = arith.constant 0 : index
    %38 = vector.load %arg9[%c0_43, %c0_44, %c0_45] : memref<1x384x256xbf16, #tpu.memory_space<vmem>>, vector<1x384x256xbf16>
    %39 = vector.shape_cast %38 : vector<1x384x256xbf16> to vector<384x256xbf16>
    %40 = vector.shape_cast %37 : vector<384x256xbf16> to vector<1x384x256xbf16>
    tpu.vector_store %arg9[%c0_43, %c0_44, %c0_45], %40 {strides = array<i32>} : memref<1x384x256xbf16, #tpu.memory_space<vmem>>, vector<1x384x256xbf16>,
    return
  }
  func.func @transform_0(%arg0: i32, %arg1: i32, %arg2: i32) -> (i32, i32, i32) {
    %c0_i32 = arith.constant 0 : i32
    %c0_i32_0 = arith.constant 0 : i32
    return %arg0, %arg1, %c0_i32 : i32, i32, i32
  }
  func.func @transform_1(%arg0: i32, %arg1: i32, %arg2: i32) -> (i32, i32, i32) {
    %c0_i32 = arith.constant 0 : i32
    %c0_i32_0 = arith.constant 0 : i32
    return %arg0, %arg1, %c0_i32 : i32, i32, i32
  }
  func.func @transform_2(%arg0: i32, %arg1: i32, %arg2: i32) -> (i32, i32, i32) {
    %c0_i32 = arith.constant 0 : i32
    %c0_i32_0 = arith.constant 0 : i32
    return %arg0, %arg1, %c0_i32 : i32, i32, i32
  }
  func.func @transform_3(%arg0: i32, %arg1: i32, %arg2: i32) -> (i32, i32, i32) {
    %c0_i32 = arith.constant 0 : i32
    %c0_i32_0 = arith.constant 0 : i32
    return %arg0, %arg1, %c0_i32 : i32, i32, i32
  }
  func.func @transform_4(%arg0: i32, %arg1: i32, %arg2: i32) -> (i32, i32, i32) {
    %c0_i32 = arith.constant 0 : i32
    %c0_i32_0 = arith.constant 0 : i32
    %c0_i32_1 = arith.constant 0 : i32
    return %c0_i32, %c0_i32_0, %arg2 : i32, i32, i32
  }
  func.func @transform_5(%arg0: i32, %arg1: i32, %arg2: i32) -> (i32, i32, i32) {
    %c0_i32 = arith.constant 0 : i32
    %c0_i32_0 = arith.constant 0 : i32
    return %arg0, %c0_i32, %arg2 : i32, i32, i32
  }
  func.func @transform_6(%arg0: i32, %arg1: i32, %arg2: i32) -> (i32, i32, i32) {
    %c0_i32 = arith.constant 0 : i32
    return %arg0, %arg1, %arg2 : i32, i32, i32
  }
}

module attributes {stable_mosaic.version = 11 : i64} {
  func.func @_matmul_bias_kernel(%arg0: i32, %arg1: i32, %arg2: i32, %arg3: memref<384x108xbf16, #tpu.memory_space<vmem>>, %arg4: memref<108x8xbf16, #tpu.memory_space<vmem>>, %arg5: memref<1x8xf32, #tpu.memory_space<vmem>>, %arg6: memref<384x8xf32, #tpu.memory_space<vmem>>, %arg7: memref<384x8xf32, #tpu.memory_space<vmem>>) attributes {dimension_semantics = [#tpu.dimension_semantics<parallel>, #tpu.dimension_semantics<parallel>, #tpu.dimension_semantics<arbitrary>], iteration_bounds = array<i64: 2, 1, 1>, scalar_prefetch = 0 : i64, scratch_operands = 1 : i64, tpu.core_type = #tpu.core_type<tc>, window_params = [{transform_indices = @transform_0, window_bounds = array<i64: 384, 108>}, {transform_indices = @transform_1, window_bounds = array<i64: 108, 8>}, {transform_indices = @transform_2, window_bounds = array<i64: 1, 8>}, {transform_indices = @transform_3, window_bounds = array<i64: 384, 8>}]} {
    %c0_i32 = arith.constant 0 : i32
    %0 = arith.cmpi eq, %arg2, %c0_i32 : i32
    %1 = arith.extui %0 : i1 to i32
    %c0_i32_0 = arith.constant 0 : i32
    %2 = arith.cmpi ne, %1, %c0_i32_0 : i32
    scf.if %2 {
      %cst_10 = arith.constant 0.000000e+00 : f32
      %12 = vector.broadcast %cst_10 : f32 to vector<384x8xf32>
      %c0_11 = arith.constant 0 : index
      %c0_12 = arith.constant 0 : index
      %13 = vector.load %arg7[%c0_11, %c0_12] : memref<384x8xf32, #tpu.memory_space<vmem>>, vector<384x8xf32>
      tpu.vector_store %arg7[%c0_11, %c0_12], %12 {strides = array<i32>} : memref<384x8xf32, #tpu.memory_space<vmem>>, vector<384x8xf32>,
    } else {
    }
    %c0 = arith.constant 0 : index
    %c0_1 = arith.constant 0 : index
    %3 = vector.load %arg7[%c0, %c0_1] : memref<384x8xf32, #tpu.memory_space<vmem>>, vector<384x8xf32>
    %c0_2 = arith.constant 0 : index
    %c0_3 = arith.constant 0 : index
    %4 = vector.load %arg3[%c0_2, %c0_3] : memref<384x108xbf16, #tpu.memory_space<vmem>>, vector<384x108xbf16>
    %c0_4 = arith.constant 0 : index
    %c0_5 = arith.constant 0 : index
    %5 = vector.load %arg4[%c0_4, %c0_5] : memref<108x8xbf16, #tpu.memory_space<vmem>>, vector<108x8xbf16>
    %cst = arith.constant dense<0.000000e+00> : vector<384x8xf32>
    %6 = tpu.matmul %4, %5, %cst {dimension_numbers = #tpu.dot_dimension_numbers<[1], [0], [0], [1], [0, 0, 1, 1], [], []>} : vector<384x108xbf16>, vector<108x8xbf16>, vector<384x8xf32> -> vector<384x8xf32>
    %7 = arith.addf %3, %6 : vector<384x8xf32>
    %c0_6 = arith.constant 0 : index
    %c0_7 = arith.constant 0 : index
    %8 = vector.load %arg7[%c0_6, %c0_7] : memref<384x8xf32, #tpu.memory_space<vmem>>, vector<384x8xf32>
    tpu.vector_store %arg7[%c0_6, %c0_7], %7 {strides = array<i32>} : memref<384x8xf32, #tpu.memory_space<vmem>>, vector<384x8xf32>,
    %c0_i32_8 = arith.constant 0 : i32
    %9 = arith.cmpi eq, %arg2, %c0_i32_8 : i32
    %10 = arith.extui %9 : i1 to i32
    %c0_i32_9 = arith.constant 0 : i32
    %11 = arith.cmpi ne, %10, %c0_i32_9 : i32
    scf.if %11 {
      %c0_10 = arith.constant 0 : index
      %c0_11 = arith.constant 0 : index
      %12 = vector.load %arg7[%c0_10, %c0_11] : memref<384x8xf32, #tpu.memory_space<vmem>>, vector<384x8xf32>
      %c0_12 = arith.constant 0 : index
      %c0_13 = arith.constant 0 : index
      %13 = vector.load %arg5[%c0_12, %c0_13] : memref<1x8xf32, #tpu.memory_space<vmem>>, vector<1x8xf32>
      %14 = vector.broadcast %13 : vector<1x8xf32> to vector<384x8xf32>
      %15 = arith.addf %12, %14 : vector<384x8xf32>
      %c0_14 = arith.constant 0 : index
      %c0_15 = arith.constant 0 : index
      %16 = vector.load %arg6[%c0_14, %c0_15] : memref<384x8xf32, #tpu.memory_space<vmem>>, vector<384x8xf32>
      tpu.vector_store %arg6[%c0_14, %c0_15], %15 {strides = array<i32>} : memref<384x8xf32, #tpu.memory_space<vmem>>, vector<384x8xf32>,
    } else {
    }
    return
  }
  func.func @transform_0(%arg0: i32, %arg1: i32, %arg2: i32) -> (i32, i32) {
    %c0_i32 = arith.constant 0 : i32
    return %arg0, %arg2 : i32, i32
  }
  func.func @transform_1(%arg0: i32, %arg1: i32, %arg2: i32) -> (i32, i32) {
    %c0_i32 = arith.constant 0 : i32
    return %arg2, %arg1 : i32, i32
  }
  func.func @transform_2(%arg0: i32, %arg1: i32, %arg2: i32) -> (i32, i32) {
    %c0_i32 = arith.constant 0 : i32
    %c0_i32_0 = arith.constant 0 : i32
    return %c0_i32, %arg1 : i32, i32
  }
  func.func @transform_3(%arg0: i32, %arg1: i32, %arg2: i32) -> (i32, i32) {
    %c0_i32 = arith.constant 0 : i32
    return %arg0, %arg1 : i32, i32
  }
}

</mosaic_0001>

<bundles_post_ra>
// kernel: aspp_modulated_deformable_c3d.3
= control target key start
LH: loop header
LB: loop body
LE: loop exit
PB: predicated region body
PF: predicated region fallthrough
CT: control target
= control target key end

     0   :  { %s2209_s12 = smov 0   ;;  %s2211_s13 = smov 0   ;;  %s2476_s0 = inlined_call_operand.vmem [shape: bf16[768,4], index: 0, kind: input, shape index: {}]   ;;  %s2477_s1 = inlined_call_operand.vmem [shape: bf16[4,256], index: 1, kind: input, shape index: {}]   ;;  %s2478_s2 = inlined_call_operand.vmem [shape: f32[1,256], index: 2, kind: input, shape index: {}]   ;;  %s2479_s3 = inlined_call_operand.vmem [shape: bf16[768,256], index: 3, kind: output, shape index: {}]  }
   0x1   :  { %s2213_s14 = smov 0  }
   0x2 LB: > { %s32_s15 = sadd.s32 1, %s2182_s13  ;;  %p1960_p0 = scmp.ge.s32.totalorder %s2186_s14, 1  ;;  %s2186_s14 = sphi %s2213_s14, %s13_s14   ;;  %s2182_s13 = sphi %s2211_s13, %s2481_s13   ;;  %s2178_s12 = sphi %s2209_s12, %s2480_s12  }
   0x3   : > { %p34_p1 = scmp.ge.s32.totalorder %s32_s15, 2  ;;  %p191_p2 = scmp.lt.s32.totalorder %s2186_s14, 3 }
   0x5   : > { %s2483_s15 = smov (%p34_p1, %s32_s15), 0  ;;  %p192_p3 = pnand %p1960_p0, %p191_p2 }
   0x6   : > { %v1988_v0 = vld.sshfl [vmem:[%s2477_s1] sm:$0x33 pattern:$0x76325410] (!%p192_p3)  ;;  %vm720_vm0 = vcmask (!%p192_p3), 1041408   ;;  %v2188_v3 = vmov (!%p192_p3), 0   ;;  %v1293_v28 = vlaneseq (!%p192_p3) }
   0x7   : > { %195 = sbr.rel (%p192_p3) target bundleno = 329 (0x149), region = 32  ;;  %v646_v1 = vcombine.high (!%p192_p3), %v1988_v0, %v1988_v0  ;;  %v722_v2 = vsel (!%p192_p3), %vm720_vm0, %v1988_v0, 0  ;;  %759 = vmatprep.mubr.bf16.mxu0 (!%p192_p3), %v2188_v3  ;;  %879 = vmatprep.mubr.bf16.mxu1 (!%p192_p3), %v2188_v3  ;;  %vm647_vm1 = vcmask (!%p192_p3), 31744   ;;  %v1291_v31 = vld [vmem:[%s2478_s2] sm:$0x3] (!%p192_p3) }
   0x8   : > { %s236_s18 = smul.u32 (!%p192_p3), 48, %s2178_s12  ;;  %v1294_v29 = vshrl.u32 (!%p192_p3), %v1293_v28, 7 }
   0x9   : > { %1989 = vmatprep.subr.msk.bf16.mxu0 (!%p192_p3), %vm720_vm0, %v646_v1  ;;  %2113 = vmatprep.subr.msk.bf16.mxu1 (!%p192_p3), %vm720_vm0, %v646_v1 }
   0xa   : > { %p237_p4 = scmp.lt.s32.totalorder (!%p192_p3), %s236_s18, 95  ;;  %728 = vmatpush1.bf16.msra.mxu0 (!%p192_p3), %v722_v2  ;;  %2114 = vmatpush1.bf16.msra.mxu1 (!%p192_p3), %v722_v2  ;;  %v1295_v30 = vsub.s32 (!%p192_p3), 0, %v1294_v29  ;;  %v1299_v32 = vsub.s32 (!%p192_p3), 1, %v1294_v29 }
   0xc   : > { %v2313_v33 = vrot.slane (!%p192_p3), %v1291_v31, %v1295_v30  ;;  %v2315_v34 = vrot.slane (!%p192_p3), %v1291_v31, %v1299_v32 }
   0xe   : > { %s2485_s18 = smov (!%p237_p4, %s236_s18), 95 }
   0xf   : > { %s1961_s19 = sshll.u32 %s2485_s18, 2  ;;  %s2064_s25 = sshll.u32 %s2485_s18, 3 }
  0x10   : > { %s2238_s22 = scalar_lea.vmem %s2476_s0, %s1961_s19  ;;  %s2328_s28 = scalar_lea.vmem %s2479_s3, %s2064_s25 }
  0x11   : > { %v2140_v4 = vld [vmem:[%s2238_s22] sm:$0xff]   ;;  %v2142_v6 = vld [vmem:[%s2238_s22 + $0x8] sm:$0xff]   ;;  %v2144_v8 = vld [vmem:[%s2238_s22 + $0x10] sm:$0xff]  }
  0x12   : > { %v2141_v5 = vld [vmem:[%s2238_s22 + $0x60] sm:$0xff]   ;;  %1990 = vmatmul.mubr.msk.bf16.vlgmr.msra.gmra.mrb[0].mxu0 %vm647_vm1, %v2140_v4  ;;  %v2143_v7 = vld [vmem:[%s2238_s22 + $0x68] sm:$0xff]   ;;  %v2145_v9 = vld [vmem:[%s2238_s22 + $0x70] sm:$0xff]  }
  0x13   : > { %2002 = vmatmul.mubr.msk.bf16.vlgmr.msra.gmra.mrb[0].mxu1 %vm647_vm1, %v2141_v5  ;;  %769 = vmatprep.mubr.bf16.mxu0 %v2188_v3  ;;  %v2146_v10 = vld [vmem:[%s2238_s22 + $0x18] sm:$0xff]   ;;  %v2148_v12 = vld [vmem:[%s2238_s22 + $0x20] sm:$0xff]   ;;  %v2150_v14 = vld [vmem:[%s2238_s22 + $0x28] sm:$0xff]  }
  0x14   : > { %889 = vmatprep.mubr.bf16.mxu1 %v2188_v3  ;;  %v2147_v11 = vld [vmem:[%s2238_s22 + $0x78] sm:$0xff]   ;;  %v2149_v13 = vld [vmem:[%s2238_s22 + $0x80] sm:$0xff]   ;;  %v2151_v15 = vld [vmem:[%s2238_s22 + $0x88] sm:$0xff]  }
  0x15   : > { %v2152_v16 = vld [vmem:[%s2238_s22 + $0x30] sm:$0xff]   ;;  %v2154_v18 = vld [vmem:[%s2238_s22 + $0x38] sm:$0xff]   ;;  %v2156_v20 = vld [vmem:[%s2238_s22 + $0x40] sm:$0xff]  }
  0x16   : > { %v2153_v17 = vld [vmem:[%s2238_s22 + $0x90] sm:$0xff]   ;;  %v2155_v19 = vld [vmem:[%s2238_s22 + $0x98] sm:$0xff]   ;;  %v2157_v21 = vld [vmem:[%s2238_s22 + $0xa0] sm:$0xff]  }
  0x17   : > { %v2158_v22 = vld [vmem:[%s2238_s22 + $0x48] sm:$0xff]   ;;  %v2160_v24 = vld [vmem:[%s2238_s22 + $0x50] sm:$0xff]   ;;  %v2162_v26 = vld [vmem:[%s2238_s22 + $0x58] sm:$0xff]  }
  0x18   : > { %v2159_v23 = vld [vmem:[%s2238_s22 + $0xa8] sm:$0xff]   ;;  %v2161_v25 = vld [vmem:[%s2238_s22 + $0xb0] sm:$0xff]   ;;  %v2163_v27 = vld [vmem:[%s2238_s22 + $0xb8] sm:$0xff]  }
  0x1a   : > { %1991 = vmatmul.mubr.msk.bf16.gmra.mrb[4].mxu0 %vm647_vm1, %v2142_v6 }
  0x1b   : > { %2003 = vmatmul.mubr.msk.bf16.gmra.mrb[4].mxu1 %vm647_vm1, %v2143_v7  ;;  %779 = vmatprep.mubr.bf16.mxu0 %v2188_v3 }
  0x1c   : > { %899 = vmatprep.mubr.bf16.mxu1 %v2188_v3 }
  0x22   : > { %1992 = vmatmul.mubr.msk.bf16.gmra.mrb[8].mxu0 %vm647_vm1, %v2144_v8 }
  0x23   : > { %2004 = vmatmul.mubr.msk.bf16.gmra.mrb[8].mxu1 %vm647_vm1, %v2145_v9  ;;  %789 = vmatprep.mubr.bf16.mxu0 %v2188_v3 }
  0x24   : > { %909 = vmatprep.mubr.bf16.mxu1 %v2188_v3 }
  0x2a   : > { %1993 = vmatmul.mubr.msk.bf16.gmra.mrb[12].mxu0 %vm647_vm1, %v2146_v10 }
  0x2b   : > { %2005 = vmatmul.mubr.msk.bf16.gmra.mrb[12].mxu1 %vm647_vm1, %v2147_v11  ;;  %799 = vmatprep.mubr.bf16.mxu0 %v2188_v3 }
  0x2c   : > { %919 = vmatprep.mubr.bf16.mxu1 %v2188_v3 }
  0x32   : > { %1994 = vmatmul.mubr.msk.bf16.gmra.mrb[16].mxu0 %vm647_vm1, %v2148_v12 }
  0x33   : > { %2006 = vmatmul.mubr.msk.bf16.gmra.mrb[16].mxu1 %vm647_vm1, %v2149_v13  ;;  %809 = vmatprep.mubr.bf16.mxu0 %v2188_v3 }
  0x34   : > { %929 = vmatprep.mubr.bf16.mxu1 %v2188_v3 }
  0x3a   : > { %1995 = vmatmul.mubr.msk.bf16.gmra.mrb[20].mxu0 %vm647_vm1, %v2150_v14 }
  0x3b   : > { %2007 = vmatmul.mubr.msk.bf16.gmra.mrb[20].mxu1 %vm647_vm1, %v2151_v15  ;;  %819 = vmatprep.mubr.bf16.mxu0 %v2188_v3 }
  0x3c   : > { %939 = vmatprep.mubr.bf16.mxu1 %v2188_v3 }
  0x42   : > { %1996 = vmatmul.mubr.msk.bf16.gmra.mrb[24].mxu0 %vm647_vm1, %v2152_v16 }
  0x43   : > { %2008 = vmatmul.mubr.msk.bf16.gmra.mrb[24].mxu1 %vm647_vm1, %v2153_v17  ;;  %829 = vmatprep.mubr.bf16.mxu0 %v2188_v3 }
  0x44   : > { %949 = vmatprep.mubr.bf16.mxu1 %v2188_v3 }
  0x4a   : > { %1997 = vmatmul.mubr.msk.bf16.gmra.mrb[28].mxu0 %vm647_vm1, %v2154_v18 }
  0x4b   : > { %2009 = vmatmul.mubr.msk.bf16.gmra.mrb[28].mxu1 %vm647_vm1, %v2155_v19  ;;  %839 = vmatprep.mubr.bf16.mxu0 %v2188_v3 }
  0x4c   : > { %959 = vmatprep.mubr.bf16.mxu1 %v2188_v3 }
  0x52   : > { %1998 = vmatmul.mubr.msk.bf16.gmra.mrb[32].mxu0 %vm647_vm1, %v2156_v20 }
  0x53   : > { %2010 = vmatmul.mubr.msk.bf16.gmra.mrb[32].mxu1 %vm647_vm1, %v2157_v21  ;;  %849 = vmatprep.mubr.bf16.mxu0 %v2188_v3 }
  0x54   : > { %969 = vmatprep.mubr.bf16.mxu1 %v2188_v3 }
  0x5a   : > { %1999 = vmatmul.mubr.msk.bf16.gmra.mrb[36].mxu0 %vm647_vm1, %v2158_v22 }
  0x5b   : > { %2011 = vmatmul.mubr.msk.bf16.gmra.mrb[36].mxu1 %vm647_vm1, %v2159_v23  ;;  %859 = vmatprep.mubr.bf16.mxu0 %v2188_v3 }
  0x5c   : > { %979 = vmatprep.mubr.bf16.mxu1 %v2188_v3 }
  0x62   : > { %2000 = vmatmul.mubr.msk.bf16.gmra.mrb[40].mxu0 %vm647_vm1, %v2160_v24 }
  0x63   : > { %2012 = vmatmul.mubr.msk.bf16.gmra.mrb[40].mxu1 %vm647_vm1, %v2161_v25  ;;  %869 = vmatprep.mubr.bf16.mxu0 %v2188_v3 }
  0x64   : > { %989 = vmatprep.mubr.bf16.mxu1 %v2188_v3 }
  0x6a   : > { %2001 = vmatmul.mubr.msk.bf16.gmra.mrb[44].mxu0 %vm647_vm1, %v2162_v26 }
  0x6b   : > { %2013 = vmatmul.mubr.msk.bf16.gmra.mrb[44].mxu1 %vm647_vm1, %v2163_v27 }
  0xe5   : > { %v761_v35 = vpop.f32.mrb[0].mxu0 }
  0xe6   : > { %v1303_v36 = vadd.f32 %v2313_v33, %v761_v35  ;;  %v881_v37 = vpop.f32.mrb[0].mxu1  ;;  %v763_v38 = vpop.f32.mrb[1].mxu0 }
  0xe7   : > { %v1351_v39 = vadd.f32 %v2313_v33, %v881_v37  ;;  %v1304_v40 = vadd.f32 %v2315_v34, %v763_v38  ;;  %v883_v41 = vpop.f32.mrb[1].mxu1  ;;  %v765_v42 = vpop.f32.mrb[2].mxu0 }
  0xe8   : > { %v1399_v43 = vmax.f32 %v1303_v36, 0.0  ;;  %v1352_v44 = vadd.f32 %v2315_v34, %v883_v41  ;;  %v1305_v45 = vadd.f32 %v2313_v33, %v765_v42  ;;  %v885_v46 = vpop.f32.mrb[2].mxu1  ;;  %v767_v47 = vpop.f32.mrb[3].mxu0 }
  0xe9   : > { %v1447_v48 = vmax.f32 %v1351_v39, 0.0  ;;  %v1400_v49 = vmax.f32 %v1304_v40, 0.0  ;;  %v1353_v50 = vadd.f32 %v2313_v33, %v885_v46  ;;  %v1306_v51 = vadd.f32 %v2315_v34, %v767_v47  ;;  %v887_v52 = vpop.f32.mrb[3].mxu1 }
  0xea   : > { %v1448_v53 = vmax.f32 %v1352_v44, 0.0  ;;  %v1401_v54 = vmax.f32 %v1305_v45, 0.0  ;;  %v1354_v55 = vadd.f32 %v2315_v34, %v887_v52 }
  0xeb   : > { %v2065_v56 = vpack.c.bf16 %v1400_v49, %v1399_v43  ;;  %v1449_v57 = vmax.f32 %v1353_v50, 0.0  ;;  %v1402_v58 = vmax.f32 %v1306_v51, 0.0 }
  0xec   : > { %v2089_v59 = vpack.c.bf16 %v1448_v53, %v1447_v48  ;;  %v1450_v60 = vmax.f32 %v1354_v55, 0.0 }
  0xed   : > { %1783 = vst [vmem:[%s2328_s28] sm:$0xff] %v2065_v56  ;;  %v2066_v61 = vpack.c.bf16 %v1402_v58, %v1401_v54  ;;  %v771_v62 = vpop.f32.mrb[4].mxu0 }
  0xee   : > { %1807 = vst [vmem:[%s2328_s28 + $0xc0] sm:$0xff] %v2089_v59  ;;  %v2090_v63 = vpack.c.bf16 %v1450_v60, %v1449_v57  ;;  %v1307_v0 = vadd.f32 %v2313_v33, %v771_v62  ;;  %v891_v1 = vpop.f32.mrb[4].mxu1  ;;  %v773_v2 = vpop.f32.mrb[5].mxu0 }
  0xef   : > { %1784 = vst [vmem:[%s2328_s28 + $0x8] sm:$0xff] %v2066_v61  ;;  %v1355_v3 = vadd.f32 %v2313_v33, %v891_v1  ;;  %v1308_v4 = vadd.f32 %v2315_v34, %v773_v2  ;;  %v893_v5 = vpop.f32.mrb[5].mxu1  ;;  %v775_v6 = vpop.f32.mrb[6].mxu0 }
  0xf0   : > { %1808 = vst [vmem:[%s2328_s28 + $0xc8] sm:$0xff] %v2090_v63  ;;  %v1403_v7 = vmax.f32 %v1307_v0, 0.0  ;;  %v1356_v8 = vadd.f32 %v2315_v34, %v893_v5  ;;  %v1309_v9 = vadd.f32 %v2313_v33, %v775_v6  ;;  %v895_v10 = vpop.f32.mrb[6].mxu1  ;;  %v777_v11 = vpop.f32.mrb[7].mxu0 }
  0xf1   : > { %v1451_v12 = vmax.f32 %v1355_v3, 0.0  ;;  %v1404_v13 = vmax.f32 %v1308_v4, 0.0  ;;  %v1357_v14 = vadd.f32 %v2313_v33, %v895_v10  ;;  %v1310_v15 = vadd.f32 %v2315_v34, %v777_v11  ;;  %v897_v16 = vpop.f32.mrb[7].mxu1 }
  0xf2   : > { %v1452_v17 = vmax.f32 %v1356_v8, 0.0  ;;  %v1405_v18 = vmax.f32 %v1309_v9, 0.0  ;;  %v1358_v19 = vadd.f32 %v2315_v34, %v897_v16 }
  0xf3   : > { %v2067_v20 = vpack.c.bf16 %v1404_v13, %v1403_v7  ;;  %v1453_v21 = vmax.f32 %v1357_v14, 0.0  ;;  %v1406_v22 = vmax.f32 %v1310_v15, 0.0 }
  0xf4   : > { %v2091_v23 = vpack.c.bf16 %v1452_v17, %v1451_v12  ;;  %v1454_v24 = vmax.f32 %v1358_v19, 0.0 }
  0xf5   : > { %1785 = vst [vmem:[%s2328_s28 + $0x10] sm:$0xff] %v2067_v20  ;;  %v2068_v25 = vpack.c.bf16 %v1406_v22, %v1405_v18  ;;  %v781_v26 = vpop.f32.mrb[8].mxu0 }
  0xf6   : > { %1809 = vst [vmem:[%s2328_s28 + $0xd0] sm:$0xff] %v2091_v23  ;;  %v2092_v27 = vpack.c.bf16 %v1454_v24, %v1453_v21  ;;  %v1311_v28 = vadd.f32 %v2313_v33, %v781_v26  ;;  %v901_v29 = vpop.f32.mrb[8].mxu1  ;;  %v783_v30 = vpop.f32.mrb[9].mxu0 }
  0xf7   : > { %1786 = vst [vmem:[%s2328_s28 + $0x18] sm:$0xff] %v2068_v25  ;;  %v1359_v31 = vadd.f32 %v2313_v33, %v901_v29  ;;  %v1312_v32 = vadd.f32 %v2315_v34, %v783_v30  ;;  %v903_v35 = vpop.f32.mrb[9].mxu1  ;;  %v785_v36 = vpop.f32.mrb[10].mxu0 }
  0xf8   : > { %1810 = vst [vmem:[%s2328_s28 + $0xd8] sm:$0xff] %v2092_v27  ;;  %v1407_v37 = vmax.f32 %v1311_v28, 0.0  ;;  %v1360_v38 = vadd.f32 %v2315_v34, %v903_v35  ;;  %v1313_v39 = vadd.f32 %v2313_v33, %v785_v36  ;;  %v905_v40 = vpop.f32.mrb[10].mxu1  ;;  %v787_v41 = vpop.f32.mrb[11].mxu0 }
  0xf9   : > { %v1455_v42 = vmax.f32 %v1359_v31, 0.0  ;;  %v1408_v43 = vmax.f32 %v1312_v32, 0.0  ;;  %v1361_v44 = vadd.f32 %v2313_v33, %v905_v40  ;;  %v1314_v45 = vadd.f32 %v2315_v34, %v787_v41  ;;  %v907_v46 = vpop.f32.mrb[11].mxu1 }
  0xfa   : > { %v1456_v47 = vmax.f32 %v1360_v38, 0.0  ;;  %v1409_v48 = vmax.f32 %v1313_v39, 0.0  ;;  %v1362_v49 = vadd.f32 %v2315_v34, %v907_v46 }
  0xfb   : > { %v2069_v50 = vpack.c.bf16 %v1408_v43, %v1407_v37  ;;  %v1457_v51 = vmax.f32 %v1361_v44, 0.0  ;;  %v1410_v52 = vmax.f32 %v1314_v45, 0.0 }
  0xfc   : > { %v2093_v53 = vpack.c.bf16 %v1456_v47, %v1455_v42  ;;  %v1458_v54 = vmax.f32 %v1362_v49, 0.0 }
  0xfd   : > { %1787 = vst [vmem:[%s2328_s28 + $0x20] sm:$0xff] %v2069_v50  ;;  %v2070_v55 = vpack.c.bf16 %v1410_v52, %v1409_v48  ;;  %v791_v56 = vpop.f32.mrb[12].mxu0 }
  0xfe   : > { %1811 = vst [vmem:[%s2328_s28 + $0xe0] sm:$0xff] %v2093_v53  ;;  %v2094_v57 = vpack.c.bf16 %v1458_v54, %v1457_v51  ;;  %v1315_v58 = vadd.f32 %v2313_v33, %v791_v56  ;;  %v911_v59 = vpop.f32.mrb[12].mxu1  ;;  %v793_v60 = vpop.f32.mrb[13].mxu0 }
  0xff   : > { %1788 = vst [vmem:[%s2328_s28 + $0x28] sm:$0xff] %v2070_v55  ;;  %v1363_v61 = vadd.f32 %v2313_v33, %v911_v59  ;;  %v1316_v62 = vadd.f32 %v2315_v34, %v793_v60  ;;  %v913_v63 = vpop.f32.mrb[13].mxu1  ;;  %v795_v0 = vpop.f32.mrb[14].mxu0 }
 0x100   : > { %1812 = vst [vmem:[%s2328_s28 + $0xe8] sm:$0xff] %v2094_v57  ;;  %v1411_v1 = vmax.f32 %v1315_v58, 0.0  ;;  %v1364_v2 = vadd.f32 %v2315_v34, %v913_v63  ;;  %v1317_v3 = vadd.f32 %v2313_v33, %v795_v0  ;;  %v915_v4 = vpop.f32.mrb[14].mxu1  ;;  %v797_v5 = vpop.f32.mrb[15].mxu0 }
 0x101   : > { %v1459_v6 = vmax.f32 %v1363_v61, 0.0  ;;  %v1412_v7 = vmax.f32 %v1316_v62, 0.0  ;;  %v1365_v8 = vadd.f32 %v2313_v33, %v915_v4  ;;  %v1318_v9 = vadd.f32 %v2315_v34, %v797_v5  ;;  %v917_v10 = vpop.f32.mrb[15].mxu1 }
 0x102   : > { %v1460_v11 = vmax.f32 %v1364_v2, 0.0  ;;  %v1413_v12 = vmax.f32 %v1317_v3, 0.0  ;;  %v1366_v13 = vadd.f32 %v2315_v34, %v917_v10 }
 0x103   : > { %v2071_v14 = vpack.c.bf16 %v1412_v7, %v1411_v1  ;;  %v1461_v15 = vmax.f32 %v1365_v8, 0.0  ;;  %v1414_v16 = vmax.f32 %v1318_v9, 0.0 }
 0x104   : > { %v2095_v17 = vpack.c.bf16 %v1460_v11, %v1459_v6  ;;  %v1462_v18 = vmax.f32 %v1366_v13, 0.0 }
 0x105   : > { %1789 = vst [vmem:[%s2328_s28 + $0x30] sm:$0xff] %v2071_v14  ;;  %v2072_v19 = vpack.c.bf16 %v1414_v16, %v1413_v12  ;;  %v801_v20 = vpop.f32.mrb[16].mxu0 }
 0x106   : > { %1813 = vst [vmem:[%s2328_s28 + $0xf0] sm:$0xff] %v2095_v17  ;;  %v2096_v21 = vpack.c.bf16 %v1462_v18, %v1461_v15  ;;  %v1319_v22 = vadd.f32 %v2313_v33, %v801_v20  ;;  %v921_v23 = vpop.f32.mrb[16].mxu1  ;;  %v803_v24 = vpop.f32.mrb[17].mxu0 }
 0x107   : > { %1790 = vst [vmem:[%s2328_s28 + $0x38] sm:$0xff] %v2072_v19  ;;  %v1367_v25 = vadd.f32 %v2313_v33, %v921_v23  ;;  %v1320_v26 = vadd.f32 %v2315_v34, %v803_v24  ;;  %v923_v27 = vpop.f32.mrb[17].mxu1  ;;  %v805_v28 = vpop.f32.mrb[18].mxu0 }
 0x108   : > { %1814 = vst [vmem:[%s2328_s28 + $0xf8] sm:$0xff] %v2096_v21  ;;  %v1415_v29 = vmax.f32 %v1319_v22, 0.0  ;;  %v1368_v30 = vadd.f32 %v2315_v34, %v923_v27  ;;  %v1321_v31 = vadd.f32 %v2313_v33, %v805_v28  ;;  %v925_v32 = vpop.f32.mrb[18].mxu1  ;;  %v807_v35 = vpop.f32.mrb[19].mxu0 }
 0x109   : > { %v1463_v36 = vmax.f32 %v1367_v25, 0.0  ;;  %v1416_v37 = vmax.f32 %v1320_v26, 0.0  ;;  %v1369_v38 = vadd.f32 %v2313_v33, %v925_v32  ;;  %v1322_v39 = vadd.f32 %v2315_v34, %v807_v35  ;;  %v927_v40 = vpop.f32.mrb[19].mxu1 }
 0x10a   : > { %v1464_v41 = vmax.f32 %v1368_v30, 0.0  ;;  %v1417_v42 = vmax.f32 %v1321_v31, 0.0  ;;  %v1370_v43 = vadd.f32 %v2315_v34, %v927_v40 }
 0x10b   : > { %v2073_v44 = vpack.c.bf16 %v1416_v37, %v1415_v29  ;;  %v1465_v45 = vmax.f32 %v1369_v38, 0.0  ;;  %v1418_v46 = vmax.f32 %v1322_v39, 0.0 }
 0x10c   : > { %v2097_v47 = vpack.c.bf16 %v1464_v41, %v1463_v36  ;;  %v1466_v48 = vmax.f32 %v1370_v43, 0.0 }
 0x10d   : > { %1791 = vst [vmem:[%s2328_s28 + $0x40] sm:$0xff] %v2073_v44  ;;  %v2074_v49 = vpack.c.bf16 %v1418_v46, %v1417_v42  ;;  %v811_v50 = vpop.f32.mrb[20].mxu0 }
 0x10e   : > { %1815 = vst [vmem:[%s2328_s28 + $0x100] sm:$0xff] %v2097_v47  ;;  %v2098_v51 = vpack.c.bf16 %v1466_v48, %v1465_v45  ;;  %v1323_v52 = vadd.f32 %v2313_v33, %v811_v50  ;;  %v931_v53 = vpop.f32.mrb[20].mxu1  ;;  %v813_v54 = vpop.f32.mrb[21].mxu0 }
 0x10f   : > { %1792 = vst [vmem:[%s2328_s28 + $0x48] sm:$0xff] %v2074_v49  ;;  %v1371_v55 = vadd.f32 %v2313_v33, %v931_v53  ;;  %v1324_v56 = vadd.f32 %v2315_v34, %v813_v54  ;;  %v933_v57 = vpop.f32.mrb[21].mxu1  ;;  %v815_v58 = vpop.f32.mrb[22].mxu0 }
 0x110   : > { %1816 = vst [vmem:[%s2328_s28 + $0x108] sm:$0xff] %v2098_v51  ;;  %v1419_v59 = vmax.f32 %v1323_v52, 0.0  ;;  %v1372_v60 = vadd.f32 %v2315_v34, %v933_v57  ;;  %v1325_v61 = vadd.f32 %v2313_v33, %v815_v58  ;;  %v935_v62 = vpop.f32.mrb[22].mxu1  ;;  %v817_v63 = vpop.f32.mrb[23].mxu0 }
 0x111   : > { %v1467_v0 = vmax.f32 %v1371_v55, 0.0  ;;  %v1420_v1 = vmax.f32 %v1324_v56, 0.0  ;;  %v1373_v2 = vadd.f32 %v2313_v33, %v935_v62  ;;  %v1326_v3 = vadd.f32 %v2315_v34, %v817_v63  ;;  %v937_v4 = vpop.f32.mrb[23].mxu1 }
 0x112   : > { %v1468_v5 = vmax.f32 %v1372_v60, 0.0  ;;  %v1421_v6 = vmax.f32 %v1325_v61, 0.0  ;;  %v1374_v7 = vadd.f32 %v2315_v34, %v937_v4 }
 0x113   : > { %v2075_v8 = vpack.c.bf16 %v1420_v1, %v1419_v59  ;;  %v1469_v9 = vmax.f32 %v1373_v2, 0.0  ;;  %v1422_v10 = vmax.f32 %v1326_v3, 0.0 }
 0x114   : > { %v2099_v11 = vpack.c.bf16 %v1468_v5, %v1467_v0  ;;  %v1470_v12 = vmax.f32 %v1374_v7, 0.0 }
 0x115   : > { %1793 = vst [vmem:[%s2328_s28 + $0x50] sm:$0xff] %v2075_v8  ;;  %v2076_v13 = vpack.c.bf16 %v1422_v10, %v1421_v6  ;;  %v821_v14 = vpop.f32.mrb[24].mxu0 }
 0x116   : > { %1817 = vst [vmem:[%s2328_s28 + $0x110] sm:$0xff] %v2099_v11  ;;  %v2100_v15 = vpack.c.bf16 %v1470_v12, %v1469_v9  ;;  %v1327_v16 = vadd.f32 %v2313_v33, %v821_v14  ;;  %v941_v17 = vpop.f32.mrb[24].mxu1  ;;  %v823_v18 = vpop.f32.mrb[25].mxu0 }
 0x117   : > { %1794 = vst [vmem:[%s2328_s28 + $0x58] sm:$0xff] %v2076_v13  ;;  %v1375_v19 = vadd.f32 %v2313_v33, %v941_v17  ;;  %v1328_v20 = vadd.f32 %v2315_v34, %v823_v18  ;;  %v943_v21 = vpop.f32.mrb[25].mxu1  ;;  %v825_v22 = vpop.f32.mrb[26].mxu0 }
 0x118   : > { %1818 = vst [vmem:[%s2328_s28 + $0x118] sm:$0xff] %v2100_v15  ;;  %v1423_v23 = vmax.f32 %v1327_v16, 0.0  ;;  %v1376_v24 = vadd.f32 %v2315_v34, %v943_v21  ;;  %v1329_v25 = vadd.f32 %v2313_v33, %v825_v22  ;;  %v945_v26 = vpop.f32.mrb[26].mxu1  ;;  %v827_v27 = vpop.f32.mrb[27].mxu0 }
 0x119   : > { %v1471_v28 = vmax.f32 %v1375_v19, 0.0  ;;  %v1424_v29 = vmax.f32 %v1328_v20, 0.0  ;;  %v1377_v30 = vadd.f32 %v2313_v33, %v945_v26  ;;  %v1330_v31 = vadd.f32 %v2315_v34, %v827_v27  ;;  %v947_v32 = vpop.f32.mrb[27].mxu1 }
 0x11a   : > { %v1472_v35 = vmax.f32 %v1376_v24, 0.0  ;;  %v1425_v36 = vmax.f32 %v1329_v25, 0.0  ;;  %v1378_v37 = vadd.f32 %v2315_v34, %v947_v32 }
 0x11b   : > { %v2077_v38 = vpack.c.bf16 %v1424_v29, %v1423_v23  ;;  %v1473_v39 = vmax.f32 %v1377_v30, 0.0  ;;  %v1426_v40 = vmax.f32 %v1330_v31, 0.0 }
 0x11c   : > { %v2101_v41 = vpack.c.bf16 %v1472_v35, %v1471_v28  ;;  %v1474_v42 = vmax.f32 %v1378_v37, 0.0 }
 0x11d   : > { %1795 = vst [vmem:[%s2328_s28 + $0x60] sm:$0xff] %v2077_v38  ;;  %v2078_v43 = vpack.c.bf16 %v1426_v40, %v1425_v36  ;;  %v831_v44 = vpop.f32.mrb[28].mxu0 }
 0x11e   : > { %1819 = vst [vmem:[%s2328_s28 + $0x120] sm:$0xff] %v2101_v41  ;;  %v2102_v45 = vpack.c.bf16 %v1474_v42, %v1473_v39  ;;  %v1331_v46 = vadd.f32 %v2313_v33, %v831_v44  ;;  %v951_v47 = vpop.f32.mrb[28].mxu1  ;;  %v833_v48 = vpop.f32.mrb[29].mxu0 }
 0x11f   : > { %1796 = vst [vmem:[%s2328_s28 + $0x68] sm:$0xff] %v2078_v43  ;;  %v1379_v49 = vadd.f32 %v2313_v33, %v951_v47  ;;  %v1332_v50 = vadd.f32 %v2315_v34, %v833_v48  ;;  %v953_v51 = vpop.f32.mrb[29].mxu1  ;;  %v835_v52 = vpop.f32.mrb[30].mxu0 }
 0x120   : > { %1820 = vst [vmem:[%s2328_s28 + $0x128] sm:$0xff] %v2102_v45  ;;  %v1427_v53 = vmax.f32 %v1331_v46, 0.0  ;;  %v1380_v54 = vadd.f32 %v2315_v34, %v953_v51  ;;  %v1333_v55 = vadd.f32 %v2313_v33, %v835_v52  ;;  %v955_v56 = vpop.f32.mrb[30].mxu1  ;;  %v837_v57 = vpop.f32.mrb[31].mxu0 }
 0x121   : > { %v1475_v58 = vmax.f32 %v1379_v49, 0.0  ;;  %v1428_v59 = vmax.f32 %v1332_v50, 0.0  ;;  %v1381_v60 = vadd.f32 %v2313_v33, %v955_v56  ;;  %v1334_v61 = vadd.f32 %v2315_v34, %v837_v57  ;;  %v957_v62 = vpop.f32.mrb[31].mxu1 }
 0x122   : > { %v1476_v63 = vmax.f32 %v1380_v54, 0.0  ;;  %v1429_v0 = vmax.f32 %v1333_v55, 0.0  ;;  %v1382_v1 = vadd.f32 %v2315_v34, %v957_v62 }
 0x123   : > { %v2079_v2 = vpack.c.bf16 %v1428_v59, %v1427_v53  ;;  %v1477_v3 = vmax.f32 %v1381_v60, 0.0  ;;  %v1430_v4 = vmax.f32 %v1334_v61, 0.0 }
 0x124   : > { %v2103_v5 = vpack.c.bf16 %v1476_v63, %v1475_v58  ;;  %v1478_v6 = vmax.f32 %v1382_v1, 0.0 }
 0x125   : > { %1797 = vst [vmem:[%s2328_s28 + $0x70] sm:$0xff] %v2079_v2  ;;  %v2080_v7 = vpack.c.bf16 %v1430_v4, %v1429_v0  ;;  %v841_v8 = vpop.f32.mrb[32].mxu0 }
 0x126   : > { %1821 = vst [vmem:[%s2328_s28 + $0x130] sm:$0xff] %v2103_v5  ;;  %v2104_v9 = vpack.c.bf16 %v1478_v6, %v1477_v3  ;;  %v1335_v10 = vadd.f32 %v2313_v33, %v841_v8  ;;  %v961_v11 = vpop.f32.mrb[32].mxu1  ;;  %v843_v12 = vpop.f32.mrb[33].mxu0 }
 0x127   : > { %1798 = vst [vmem:[%s2328_s28 + $0x78] sm:$0xff] %v2080_v7  ;;  %v1383_v13 = vadd.f32 %v2313_v33, %v961_v11  ;;  %v1336_v14 = vadd.f32 %v2315_v34, %v843_v12  ;;  %v963_v15 = vpop.f32.mrb[33].mxu1  ;;  %v845_v16 = vpop.f32.mrb[34].mxu0 }
 0x128   : > { %1822 = vst [vmem:[%s2328_s28 + $0x138] sm:$0xff] %v2104_v9  ;;  %v1431_v17 = vmax.f32 %v1335_v10, 0.0  ;;  %v1384_v18 = vadd.f32 %v2315_v34, %v963_v15  ;;  %v1337_v19 = vadd.f32 %v2313_v33, %v845_v16  ;;  %v965_v20 = vpop.f32.mrb[34].mxu1  ;;  %v847_v21 = vpop.f32.mrb[35].mxu0 }
 0x129   : > { %v1479_v22 = vmax.f32 %v1383_v13, 0.0  ;;  %v1432_v23 = vmax.f32 %v1336_v14, 0.0  ;;  %v1385_v24 = vadd.f32 %v2313_v33, %v965_v20  ;;  %v1338_v25 = vadd.f32 %v2315_v34, %v847_v21  ;;  %v967_v26 = vpop.f32.mrb[35].mxu1 }
 0x12a   : > { %v1480_v27 = vmax.f32 %v1384_v18, 0.0  ;;  %v1433_v28 = vmax.f32 %v1337_v19, 0.0  ;;  %v1386_v29 = vadd.f32 %v2315_v34, %v967_v26 }
 0x12b   : > { %v2081_v30 = vpack.c.bf16 %v1432_v23, %v1431_v17  ;;  %v1481_v31 = vmax.f32 %v1385_v24, 0.0  ;;  %v1434_v32 = vmax.f32 %v1338_v25, 0.0 }
 0x12c   : > { %v2105_v35 = vpack.c.bf16 %v1480_v27, %v1479_v22  ;;  %v1482_v36 = vmax.f32 %v1386_v29, 0.0 }
 0x12d   : > { %1799 = vst [vmem:[%s2328_s28 + $0x80] sm:$0xff] %v2081_v30  ;;  %v2082_v37 = vpack.c.bf16 %v1434_v32, %v1433_v28  ;;  %v851_v38 = vpop.f32.mrb[36].mxu0 }
 0x12e   : > { %1823 = vst [vmem:[%s2328_s28 + $0x140] sm:$0xff] %v2105_v35  ;;  %v2106_v39 = vpack.c.bf16 %v1482_v36, %v1481_v31  ;;  %v1339_v40 = vadd.f32 %v2313_v33, %v851_v38  ;;  %v971_v41 = vpop.f32.mrb[36].mxu1  ;;  %v853_v42 = vpop.f32.mrb[37].mxu0 }
 0x12f   : > { %1800 = vst [vmem:[%s2328_s28 + $0x88] sm:$0xff] %v2082_v37  ;;  %v1387_v43 = vadd.f32 %v2313_v33, %v971_v41  ;;  %v1340_v44 = vadd.f32 %v2315_v34, %v853_v42  ;;  %v973_v45 = vpop.f32.mrb[37].mxu1  ;;  %v855_v46 = vpop.f32.mrb[38].mxu0 }
 0x130   : > { %1824 = vst [vmem:[%s2328_s28 + $0x148] sm:$0xff] %v2106_v39  ;;  %v1435_v47 = vmax.f32 %v1339_v40, 0.0  ;;  %v1388_v48 = vadd.f32 %v2315_v34, %v973_v45  ;;  %v1341_v49 = vadd.f32 %v2313_v33, %v855_v46  ;;  %v975_v50 = vpop.f32.mrb[38].mxu1  ;;  %v857_v51 = vpop.f32.mrb[39].mxu0 }
 0x131   : > { %v1483_v52 = vmax.f32 %v1387_v43, 0.0  ;;  %v1436_v53 = vmax.f32 %v1340_v44, 0.0  ;;  %v1389_v54 = vadd.f32 %v2313_v33, %v975_v50  ;;  %v1342_v55 = vadd.f32 %v2315_v34, %v857_v51  ;;  %v977_v56 = vpop.f32.mrb[39].mxu1 }
 0x132   : > { %v1484_v57 = vmax.f32 %v1388_v48, 0.0  ;;  %v1437_v58 = vmax.f32 %v1341_v49, 0.0  ;;  %v1390_v59 = vadd.f32 %v2315_v34, %v977_v56 }
 0x133   : > { %v2083_v60 = vpack.c.bf16 %v1436_v53, %v1435_v47  ;;  %v1485_v61 = vmax.f32 %v1389_v54, 0.0  ;;  %v1438_v62 = vmax.f32 %v1342_v55, 0.0 }
 0x134   : > { %v2107_v63 = vpack.c.bf16 %v1484_v57, %v1483_v52  ;;  %v1486_v0 = vmax.f32 %v1390_v59, 0.0 }
 0x135   : > { %1801 = vst [vmem:[%s2328_s28 + $0x90] sm:$0xff] %v2083_v60  ;;  %v2084_v1 = vpack.c.bf16 %v1438_v62, %v1437_v58  ;;  %v861_v2 = vpop.f32.mrb[40].mxu0 }
 0x136   : > { %1825 = vst [vmem:[%s2328_s28 + $0x150] sm:$0xff] %v2107_v63  ;;  %v2108_v3 = vpack.c.bf16 %v1486_v0, %v1485_v61  ;;  %v1343_v4 = vadd.f32 %v2313_v33, %v861_v2  ;;  %v981_v5 = vpop.f32.mrb[40].mxu1  ;;  %v863_v6 = vpop.f32.mrb[41].mxu0 }
 0x137   : > { %1802 = vst [vmem:[%s2328_s28 + $0x98] sm:$0xff] %v2084_v1  ;;  %v1391_v7 = vadd.f32 %v2313_v33, %v981_v5  ;;  %v1344_v8 = vadd.f32 %v2315_v34, %v863_v6  ;;  %v983_v9 = vpop.f32.mrb[41].mxu1  ;;  %v865_v10 = vpop.f32.mrb[42].mxu0 }
 0x138   : > { %1826 = vst [vmem:[%s2328_s28 + $0x158] sm:$0xff] %v2108_v3  ;;  %v1439_v11 = vmax.f32 %v1343_v4, 0.0  ;;  %v1392_v12 = vadd.f32 %v2315_v34, %v983_v9  ;;  %v1345_v13 = vadd.f32 %v2313_v33, %v865_v10  ;;  %v985_v14 = vpop.f32.mrb[42].mxu1  ;;  %v867_v15 = vpop.f32.mrb[43].mxu0 }
 0x139   : > { %v1487_v16 = vmax.f32 %v1391_v7, 0.0  ;;  %v1440_v17 = vmax.f32 %v1344_v8, 0.0  ;;  %v1393_v18 = vadd.f32 %v2313_v33, %v985_v14  ;;  %v1346_v19 = vadd.f32 %v2315_v34, %v867_v15  ;;  %v987_v20 = vpop.f32.mrb[43].mxu1 }
 0x13a   : > { %v1488_v21 = vmax.f32 %v1392_v12, 0.0  ;;  %v1441_v22 = vmax.f32 %v1345_v13, 0.0  ;;  %v1394_v23 = vadd.f32 %v2315_v34, %v987_v20 }
 0x13b   : > { %v2085_v24 = vpack.c.bf16 %v1440_v17, %v1439_v11  ;;  %v1489_v25 = vmax.f32 %v1393_v18, 0.0  ;;  %v1442_v26 = vmax.f32 %v1346_v19, 0.0 }
 0x13c   : > { %v2109_v27 = vpack.c.bf16 %v1488_v21, %v1487_v16  ;;  %v1490_v28 = vmax.f32 %v1394_v23, 0.0 }
 0x13d   : > { %1803 = vst [vmem:[%s2328_s28 + $0xa0] sm:$0xff] %v2085_v24  ;;  %v2086_v29 = vpack.c.bf16 %v1442_v26, %v1441_v22  ;;  %v871_v30 = vpop.f32.mrb[44].mxu0 }
 0x13e   : > { %1827 = vst [vmem:[%s2328_s28 + $0x160] sm:$0xff] %v2109_v27  ;;  %v2110_v31 = vpack.c.bf16 %v1490_v28, %v1489_v25  ;;  %v1347_v32 = vadd.f32 %v2313_v33, %v871_v30  ;;  %v991_v35 = vpop.f32.mrb[44].mxu1  ;;  %v873_v36 = vpop.f32.mrb[45].mxu0 }
 0x13f   : > { %1804 = vst [vmem:[%s2328_s28 + $0xa8] sm:$0xff] %v2086_v29  ;;  %v1395_v37 = vadd.f32 %v2313_v33, %v991_v35  ;;  %v1348_v38 = vadd.f32 %v2315_v34, %v873_v36  ;;  %v993_v39 = vpop.f32.mrb[45].mxu1  ;;  %v875_v40 = vpop.f32.mrb[46].mxu0 }
 0x140   : > { %1828 = vst [vmem:[%s2328_s28 + $0x168] sm:$0xff] %v2110_v31  ;;  %v1443_v41 = vmax.f32 %v1347_v32, 0.0  ;;  %v1396_v42 = vadd.f32 %v2315_v34, %v993_v39  ;;  %v1349_v43 = vadd.f32 %v2313_v33, %v875_v40  ;;  %v995_v44 = vpop.f32.mrb[46].mxu1  ;;  %v877_v45 = vpop.f32.mrb[47].mxu0 }
 0x141   : > { %v1491_v46 = vmax.f32 %v1395_v37, 0.0  ;;  %v1444_v47 = vmax.f32 %v1348_v38, 0.0  ;;  %v1397_v48 = vadd.f32 %v2313_v33, %v995_v44  ;;  %v1350_v49 = vadd.f32 %v2315_v34, %v877_v45  ;;  %v997_v50 = vpop.f32.mrb[47].mxu1 }
 0x142   : > { %v1492_v51 = vmax.f32 %v1396_v42, 0.0  ;;  %v1445_v52 = vmax.f32 %v1349_v43, 0.0  ;;  %v1398_v53 = vadd.f32 %v2315_v34, %v997_v50 }
 0x143   : > { %v2087_v54 = vpack.c.bf16 %v1444_v47, %v1443_v41  ;;  %v1493_v55 = vmax.f32 %v1397_v48, 0.0  ;;  %v1446_v56 = vmax.f32 %v1350_v49, 0.0 }
 0x144   : > { %v2111_v57 = vpack.c.bf16 %v1492_v51, %v1491_v46  ;;  %v1494_v58 = vmax.f32 %v1398_v53, 0.0 }
 0x145   : > { %1805 = vst [vmem:[%s2328_s28 + $0xb0] sm:$0xff] %v2087_v54  ;;  %v2088_v59 = vpack.c.bf16 %v1446_v56, %v1445_v52 }
 0x146   : > { %1829 = vst [vmem:[%s2328_s28 + $0x170] sm:$0xff] %v2111_v57  ;;  %v2112_v60 = vpack.c.bf16 %v1494_v58, %v1493_v55 }
 0x147   : > { %1806 = vst [vmem:[%s2328_s28 + $0xb8] sm:$0xff] %v2088_v59 }
 0x148   : > { %1830 = vst [vmem:[%s2328_s28 + $0x178] sm:$0xff] %v2112_v60 }
 0x149 PF: > { %s13_s14 = sadd.s32 1, %s2186_s14   ;;  %s2480_s12 = smov %s2182_s13 }
 0x14a   : > { %p10_p5 = scmp.ge.s32.totalorder %s13_s14, 4   ;;  %s2481_s13 = smov %s2483_s15 }
 0x14c   :  { %12 = sbr.rel (!%p10_p5) target bundleno = 2 (0x2), region = 76 }

// kernel: aspp_modulated_deformable_c3d.4
= control target key start
LH: loop header
LB: loop body
LE: loop exit
PB: predicated region body
PF: predicated region fallthrough
CT: control target
= control target key end

     0   :  { %s6776_s21 = smov 0   ;;  %s6778_s22 = smov 0   ;;  %s7570_s0 = inlined_call_operand.vmem [shape: bf16[2,384,256], index: 0, kind: input, shape index: {}]   ;;  %s7571_s1 = inlined_call_operand.vmem [shape: bf16[2,384,256], index: 1, kind: input, shape index: {}]   ;;  %s7572_s2 = inlined_call_operand.vmem [shape: bf16[2,384,256], index: 2, kind: input, shape index: {}]   ;;  %s7573_s3 = inlined_call_operand.vmem [shape: bf16[2,384,256], index: 3, kind: input, shape index: {}]   ;;  %s7574_s4 = inlined_call_operand.vmem [shape: bf16[4,256,256], index: 4, kind: input, shape index: {}]   ;;  %s7575_s5 = inlined_call_operand.vmem [shape: f32[2,1,256], index: 5, kind: input, shape index: {}]   ;;  %s7576_s6 = inlined_call_operand.vmem [shape: bf16[2,384,256], index: 6, kind: output, shape index: {}]  }
   0x1   :  { %s6780_s23 = smov 0  }
   0x2 LB: > { %s35_s24 = sadd.s32 1, %s6735_s22  ;;  %p5307_p0 = scmp.ge.s32.totalorder %s6739_s23, 1  ;;  %s6739_s23 = sphi %s6780_s23, %s16_s23   ;;  %s6735_s22 = sphi %s6778_s22, %s7578_s22   ;;  %s6731_s21 = sphi %s6776_s21, %s7577_s21  }
   0x3   : > { %p37_p1 = scmp.ge.s32.totalorder %s35_s24, 2  ;;  %p324_p2 = scmp.lt.s32.totalorder %s6739_s23, 3 }
   0x5   : > { %s7580_s24 = smov (%p37_p1, %s35_s24), 0  ;;  %p325_p3 = pnand %p5307_p0, %p324_p2 }
   0x6   : > { %v6237_v0 = vld [vmem:[%s7574_s4 + $0x4] ss:$8 sps:$4 sm:$0xff] (!%p325_p3)   ;;  %v6241_v2 = vld [vmem:[%s7574_s4] ss:$8 sps:$4 sm:$0xff] (!%p325_p3)   ;;  %v6243_v4 = vld [vmem:[%s7574_s4 + $0x14] ss:$8 sps:$4 sm:$0xff] (!%p325_p3)  }
   0x7   : > { %328 = sbr.rel (%p325_p3) target bundleno = 671 (0x29f), region = 44  ;;  %v6239_v1 = vld [vmem:[%s7574_s4 + $0x204] ss:$8 sps:$4 sm:$0xff] (!%p325_p3)   ;;  %967 = vmatprep.subr.bf16.mxu1 (!%p325_p3), %v6237_v0  ;;  %v6242_v3 = vld [vmem:[%s7574_s4 + $0x200] ss:$8 sps:$4 sm:$0xff] (!%p325_p3)   ;;  %p412_p4 = scmp.lt.s32.totalorder (!%p325_p3), %s6731_s21, 1 }
   0x8   : > { %3062 = vmatprep.subr.bf16.mxu0 (!%p325_p3), %v6239_v1  ;;  %968 = vmatpush1.bf16.msra.mxu1 (!%p325_p3), %v6241_v2  ;;  %v6245_v5 = vld [vmem:[%s7574_s4 + $0x214] ss:$8 sps:$4 sm:$0xff] (!%p325_p3)   ;;  %v6247_v6 = vld [vmem:[%s7574_s4 + $0x10] ss:$8 sps:$4 sm:$0xff] (!%p325_p3)   ;;  %v6249_v8 = vld [vmem:[%s7574_s4 + $0x24] ss:$8 sps:$4 sm:$0xff] (!%p325_p3)  }
   0x9   : > { %3063 = vmatpush1.bf16.msra.mxu0 (!%p325_p3), %v6242_v3  ;;  %969 = vmatprep.subr.bf16.mxu1 (!%p325_p3), %v6243_v4  ;;  %v6248_v7 = vld [vmem:[%s7574_s4 + $0x210] ss:$8 sps:$4 sm:$0xff] (!%p325_p3)   ;;  %v6251_v9 = vld [vmem:[%s7574_s4 + $0x224] ss:$8 sps:$4 sm:$0xff] (!%p325_p3)   ;;  %v6253_v10 = vld [vmem:[%s7574_s4 + $0x20] ss:$8 sps:$4 sm:$0xff] (!%p325_p3)  }
   0xa   : > { %3064 = vmatprep.subr.bf16.mxu0 (!%p325_p3), %v6245_v5  ;;  %v6254_v11 = vld [vmem:[%s7574_s4 + $0x220] ss:$8 sps:$4 sm:$0xff] (!%p325_p3)   ;;  %v6255_v12 = vld [vmem:[%s7574_s4 + $0x34] ss:$8 sps:$4 sm:$0xff] (!%p325_p3)   ;;  %v6259_v14 = vld [vmem:[%s7574_s4 + $0x30] ss:$8 sps:$4 sm:$0xff] (!%p325_p3)  }
   0xb   : > { %v6257_v13 = vld [vmem:[%s7574_s4 + $0x234] ss:$8 sps:$4 sm:$0xff] (!%p325_p3)   ;;  %v6260_v15 = vld [vmem:[%s7574_s4 + $0x230] ss:$8 sps:$4 sm:$0xff] (!%p325_p3)   ;;  %v6261_v16 = vld [vmem:[%s7574_s4 + $0x44] ss:$8 sps:$4 sm:$0xff] (!%p325_p3)  }
   0xc   : > { %970 = vmatpush1.bf16.msra.mxu1 (!%p325_p3), %v6247_v6  ;;  %v6263_v17 = vld [vmem:[%s7574_s4 + $0x244] ss:$8 sps:$4 sm:$0xff] (!%p325_p3)   ;;  %v6265_v18 = vld [vmem:[%s7574_s4 + $0x40] ss:$8 sps:$4 sm:$0xff] (!%p325_p3)   ;;  %v6267_v20 = vld [vmem:[%s7574_s4 + $0x54] ss:$8 sps:$4 sm:$0xff] (!%p325_p3)  }
   0xd   : > { %3065 = vmatpush1.bf16.msra.mxu0 (!%p325_p3), %v6248_v7  ;;  %971 = vmatprep.subr.bf16.mxu1 (!%p325_p3), %v6249_v8  ;;  %v6266_v19 = vld [vmem:[%s7574_s4 + $0x240] ss:$8 sps:$4 sm:$0xff] (!%p325_p3)   ;;  %v6269_v21 = vld [vmem:[%s7574_s4 + $0x254] ss:$8 sps:$4 sm:$0xff] (!%p325_p3)   ;;  %v6271_v22 = vld [vmem:[%s7574_s4 + $0x50] ss:$8 sps:$4 sm:$0xff] (!%p325_p3)  }
   0xe   : > { %3066 = vmatprep.subr.bf16.mxu0 %v6251_v9  ;;  %v6272_v23 = vld [vmem:[%s7574_s4 + $0x250] ss:$8 sps:$4 sm:$0xff]   ;;  %v6273_v24 = vld [vmem:[%s7574_s4 + $0x64] ss:$8 sps:$4 sm:$0xff]   ;;  %v6277_v26 = vld [vmem:[%s7574_s4 + $0x60] ss:$8 sps:$4 sm:$0xff]  }
   0xf   : > { %v6275_v25 = vld [vmem:[%s7574_s4 + $0x264] ss:$8 sps:$4 sm:$0xff]   ;;  %v6278_v27 = vld [vmem:[%s7574_s4 + $0x260] ss:$8 sps:$4 sm:$0xff]   ;;  %v6279_v28 = vld [vmem:[%s7574_s4 + $0x74] ss:$8 sps:$4 sm:$0xff]  }
  0x10   : > { %972 = vmatpush1.bf16.msra.mxu1 %v6253_v10  ;;  %v6281_v29 = vld [vmem:[%s7574_s4 + $0x274] ss:$8 sps:$4 sm:$0xff]   ;;  %v6283_v30 = vld [vmem:[%s7574_s4 + $0x70] ss:$8 sps:$4 sm:$0xff]   ;;  %v6285_v32 = vld [vmem:[%s7574_s4 + $0x84] ss:$8 sps:$4 sm:$0xff]  }
  0x11   : > { %3067 = vmatpush1.bf16.msra.mxu0 %v6254_v11  ;;  %973 = vmatprep.subr.bf16.mxu1 %v6255_v12  ;;  %v6284_v31 = vld [vmem:[%s7574_s4 + $0x270] ss:$8 sps:$4 sm:$0xff]   ;;  %v6287_v33 = vld [vmem:[%s7574_s4 + $0x284] ss:$8 sps:$4 sm:$0xff]   ;;  %v6289_v34 = vld [vmem:[%s7574_s4 + $0x80] ss:$8 sps:$4 sm:$0xff]  }
  0x12   : > { %3068 = vmatprep.subr.bf16.mxu0 %v6257_v13  ;;  %v6290_v35 = vld [vmem:[%s7574_s4 + $0x280] ss:$8 sps:$4 sm:$0xff]   ;;  %v6291_v36 = vld [vmem:[%s7574_s4 + $0x94] ss:$8 sps:$4 sm:$0xff]   ;;  %s7582_s21 = smov (!%p412_p4, %s6731_s21), 1 }
  0x13   : > { %v6293_v37 = vld [vmem:[%s7574_s4 + $0x294] ss:$8 sps:$4 sm:$0xff]   ;;  %v6295_v38 = vld [vmem:[%s7574_s4 + $0x90] ss:$8 sps:$4 sm:$0xff]   ;;  %v6297_v40 = vld [vmem:[%s7574_s4 + $0xa4] ss:$8 sps:$4 sm:$0xff]  }
  0x14   : > { %974 = vmatpush1.bf16.msra.mxu1 %v6259_v14  ;;  %v6296_v39 = vld [vmem:[%s7574_s4 + $0x290] ss:$8 sps:$4 sm:$0xff]   ;;  %s6924_s27 = smul.u32 384, %s7582_s21  ;;  %v6299_v41 = vld [vmem:[%s7574_s4 + $0x2a4] ss:$8 sps:$4 sm:$0xff]  }
  0x15   : > { %3069 = vmatpush1.bf16.msra.mxu0 %v6260_v15  ;;  %975 = vmatprep.subr.bf16.mxu1 %v6261_v16  ;;  %v6301_v42 = vld [vmem:[%s7574_s4 + $0xa0] ss:$8 sps:$4 sm:$0xff]   ;;  %v6303_v44 = vld [vmem:[%s7574_s4 + $0xb4] ss:$8 sps:$4 sm:$0xff]   ;;  %v6307_v46 = vld [vmem:[%s7574_s4 + $0xb0] ss:$8 sps:$4 sm:$0xff]  }
  0x16   : > { %3070 = vmatprep.subr.bf16.mxu0 %v6263_v17  ;;  %v6302_v43 = vld [vmem:[%s7574_s4 + $0x2a0] ss:$8 sps:$4 sm:$0xff]   ;;  %s6942_s14 = scalar_lea.vmem %s7570_s0, %s6924_s27  ;;  %v6305_v45 = vld [vmem:[%s7574_s4 + $0x2b4] ss:$8 sps:$4 sm:$0xff]   ;;  %v6308_v47 = vld [vmem:[%s7574_s4 + $0x2b0] ss:$8 sps:$4 sm:$0xff]   ;;  %s6957_s28 = scalar_lea.vmem %s7572_s2, %s6924_s27 }
  0x17   : > { %v6309_v48 = vld [vmem:[%s7574_s4 + $0xc4] ss:$8 sps:$4 sm:$0xff]   ;;  %v6313_v52 = vld [vmem:[%s7574_s4 + $0xc0] ss:$8 sps:$4 sm:$0xff]   ;;  %v6315_v54 = vld [vmem:[%s7574_s4 + $0xd4] ss:$8 sps:$4 sm:$0xff]   ;;  %s7249_s15 = scalar_lea.vmem %s7571_s1, %s6924_s27  ;;  %s7255_s18 = scalar_lea.vmem %s7573_s3, %s6924_s27 }
  0x18   : > { %976 = vmatpush1.bf16.msra.mxu1 %v6265_v18  ;;  %v6335_v49 = vld [vmem:[%s6942_s14 + $0x4] ss:$8 sps:$4 sm:$0xff]   ;;  %v6314_v53 = vld [vmem:[%s7574_s4 + $0x2c0] ss:$8 sps:$4 sm:$0xff]   ;;  %v6317_v55 = vld [vmem:[%s7574_s4 + $0x2d4] ss:$8 sps:$4 sm:$0xff]   ;;  %s7419_s26 = scalar_lea.vmem %s7576_s6, %s6924_s27 }
  0x19   : > { %3071 = vmatpush1.bf16.msra.mxu0 %v6266_v19  ;;  %977 = vmatprep.subr.bf16.mxu1 %v6267_v20  ;;  %v6311_v50 = vld [vmem:[%s7574_s4 + $0x2c4] ss:$8 sps:$4 sm:$0xff]   ;;  %v6319_v56 = vld [vmem:[%s7574_s4 + $0xd0] ss:$8 sps:$4 sm:$0xff]   ;;  %v6325_v60 = vld [vmem:[%s7574_s4 + $0xe0] ss:$8 sps:$4 sm:$0xff]  }
  0x1a   : > { %3072 = vmatprep.subr.bf16.mxu0 %v6269_v21  ;;  %v6338_v51 = vld [vmem:[%s6957_s28 + $0x4] ss:$8 sps:$4 sm:$0xff]   ;;  %999 = vmatprep.mubr.bf16.mxu1 %v6335_v49  ;;  %v6320_v57 = vld [vmem:[%s7574_s4 + $0x2d0] ss:$8 sps:$4 sm:$0xff]   ;;  %v6326_v61 = vld [vmem:[%s7574_s4 + $0x2e0] ss:$8 sps:$4 sm:$0xff]  }
  0x1b   : > { %3094 = vmatprep.mubr.bf16.mxu0 %v6338_v51  ;;  %v6321_v58 = vld [vmem:[%s7574_s4 + $0xe4] ss:$8 sps:$4 sm:$0xff]   ;;  %v6327_v62 = vld [vmem:[%s7574_s4 + $0xf4] ss:$8 sps:$4 sm:$0xff]   ;;  %v6331_v0 = vld [vmem:[%s7574_s4 + $0xf0] ss:$8 sps:$4 sm:$0xff]  }
  0x1c   : > { %978 = vmatpush1.bf16.msra.mxu1 %v6271_v22  ;;  %v6323_v59 = vld [vmem:[%s7574_s4 + $0x2e4] ss:$8 sps:$4 sm:$0xff]   ;;  %v6329_v63 = vld [vmem:[%s7574_s4 + $0x2f4] ss:$8 sps:$4 sm:$0xff]   ;;  %v6332_v1 = vld [vmem:[%s7574_s4 + $0x2f0] ss:$8 sps:$4 sm:$0xff]  }
  0x1d   : > { %3073 = vmatpush1.bf16.msra.mxu0 %v6272_v23  ;;  %979 = vmatprep.subr.bf16.mxu1 %v6273_v24  ;;  %v6341_v2 = vld [vmem:[%s7574_s4 + $0x104] ss:$8 sps:$4 sm:$0xff]   ;;  %v6333_v4 = vld [vmem:[%s6942_s14] ss:$8 sps:$4 sm:$0xff]   ;;  %v6345_v8 = vld [vmem:[%s6942_s14 + $0x14] ss:$8 sps:$4 sm:$0xff]  }
  0x1e   : > { %3074 = vmatprep.subr.bf16.mxu0 %v6275_v25  ;;  %v6344_v3 = vld [vmem:[%s7574_s4 + $0x304] ss:$8 sps:$4 sm:$0xff]   ;;  %v6336_v5 = vld [vmem:[%s6957_s28] ss:$8 sps:$4 sm:$0xff]   ;;  %v6347_v9 = vld [vmem:[%s6957_s28 + $0x14] ss:$8 sps:$4 sm:$0xff]  }
  0x1f   : > { %v6339_v6 = vld [vmem:[%s7574_s4 + $0x100] ss:$8 sps:$4 sm:$0xff]   ;;  %v6353_v10 = vld [vmem:[%s7574_s4 + $0x114] ss:$8 sps:$4 sm:$0xff]   ;;  %v6351_v12 = vld [vmem:[%s7574_s4 + $0x110] ss:$8 sps:$4 sm:$0xff]  }
  0x20   : > { %980 = vmatpush1.bf16.msra.mxu1 %v6277_v26  ;;  %v6342_v7 = vld [vmem:[%s7574_s4 + $0x300] ss:$8 sps:$4 sm:$0xff]   ;;  %v6356_v11 = vld [vmem:[%s7574_s4 + $0x314] ss:$8 sps:$4 sm:$0xff]   ;;  %v6354_v13 = vld [vmem:[%s7574_s4 + $0x310] ss:$8 sps:$4 sm:$0xff]  }
  0x21   : > { %3075 = vmatpush1.bf16.msra.mxu0 %v6278_v27  ;;  %981 = vmatprep.subr.bf16.mxu1 %v6279_v28  ;;  %v6370_v14 = vld [vmem:[%s7574_s4 + $0x124] ss:$8 sps:$4 sm:$0xff]   ;;  %v6349_v16 = vld [vmem:[%s6942_s14 + $0x10] ss:$8 sps:$4 sm:$0xff]   ;;  %v6368_v20 = vld [vmem:[%s7574_s4 + $0x120] ss:$8 sps:$4 sm:$0xff]  }
  0x22   : > { %3076 = vmatprep.subr.bf16.mxu0 %v6281_v29  ;;  %v6374_v15 = vld [vmem:[%s7574_s4 + $0x324] ss:$8 sps:$4 sm:$0xff]   ;;  %v6350_v17 = vld [vmem:[%s6957_s28 + $0x10] ss:$8 sps:$4 sm:$0xff]   ;;  %v6372_v21 = vld [vmem:[%s7574_s4 + $0x320] ss:$8 sps:$4 sm:$0xff]  }
  0x23   : > { %v6357_v18 = vld [vmem:[%s6942_s14 + $0x24] ss:$8 sps:$4 sm:$0xff]   ;;  %v6383_v22 = vld [vmem:[%s7574_s4 + $0x134] ss:$8 sps:$4 sm:$0xff]   ;;  %v6381_v24 = vld [vmem:[%s7574_s4 + $0x130] ss:$8 sps:$4 sm:$0xff]  }
  0x24   : > { %982 = vmatpush1.bf16.msra.mxu1 %v6283_v30  ;;  %v6359_v19 = vld [vmem:[%s6957_s28 + $0x24] ss:$8 sps:$4 sm:$0xff]   ;;  %v6386_v23 = vld [vmem:[%s7574_s4 + $0x334] ss:$8 sps:$4 sm:$0xff]   ;;  %v6361_v25 = vld [vmem:[%s6942_s14 + $0x20] ss:$8 sps:$4 sm:$0xff]  }
  0x25   : > { %3077 = vmatpush1.bf16.msra.mxu0 %v6284_v31  ;;  %983 = vmatprep.subr.bf16.mxu1 %v6285_v32  ;;  %v6362_v26 = vld [vmem:[%s6957_s28 + $0x20] ss:$8 sps:$4 sm:$0xff]   ;;  %v6384_v27 = vld [vmem:[%s7574_s4 + $0x330] ss:$8 sps:$4 sm:$0xff]   ;;  %v6400_v28 = vld [vmem:[%s7574_s4 + $0x144] ss:$8 sps:$4 sm:$0xff]  }
  0x26   : > { %3078 = vmatprep.subr.bf16.mxu0 %v6287_v33  ;;  %v6404_v29 = vld [vmem:[%s7574_s4 + $0x344] ss:$8 sps:$4 sm:$0xff]   ;;  %v6363_v30 = vld [vmem:[%s6942_s14 + $0x34] ss:$8 sps:$4 sm:$0xff]   ;;  %v6398_v32 = vld [vmem:[%s7574_s4 + $0x140] ss:$8 sps:$4 sm:$0xff]  }
  0x27   : > { %v6365_v31 = vld [vmem:[%s6957_s28 + $0x34] ss:$8 sps:$4 sm:$0xff]   ;;  %v6402_v33 = vld [vmem:[%s7574_s4 + $0x340] ss:$8 sps:$4 sm:$0xff]  }
  0x28   : > { %984 = vmatpush1.bf16.msra.mxu1 %v6289_v34  ;;  %v6413_v34 = vld [vmem:[%s7574_s4 + $0x154] ss:$8 sps:$4 sm:$0xff]   ;;  %v6380_v51 = vld [vmem:[%s6957_s28 + $0x40] ss:$8 sps:$4 sm:$0xff]  }
  0x29   : > { %3079 = vmatpush1.bf16.msra.mxu0 %v6290_v35  ;;  %985 = vmatprep.subr.bf16.mxu1 %v6291_v36  ;;  %v6416_v35 = vld [vmem:[%s7574_s4 + $0x354] ss:$8 sps:$4 sm:$0xff]   ;;  %v6411_v36 = vld [vmem:[%s7574_s4 + $0x150] ss:$8 sps:$4 sm:$0xff]  }
  0x2a   : > { %3080 = vmatprep.subr.bf16.mxu0 %v6293_v37  ;;  %v6367_v37 = vld [vmem:[%s6942_s14 + $0x30] ss:$8 sps:$4 sm:$0xff]   ;;  %v6446_v49 = vld [vmem:[%s7574_s4 + $0x374] ss:$8 sps:$4 sm:$0xff]  }
  0x2c   : > { %986 = vmatpush1.bf16.msra.mxu1 %v6295_v38  ;;  %v6371_v38 = vld [vmem:[%s6957_s28 + $0x30] ss:$8 sps:$4 sm:$0xff]  }
  0x2d   : > { %3081 = vmatpush1.bf16.msra.mxu0 %v6296_v39  ;;  %987 = vmatprep.subr.bf16.mxu1 %v6297_v40  ;;  %v6414_v39 = vld [vmem:[%s7574_s4 + $0x350] ss:$8 sps:$4 sm:$0xff]   ;;  %v6375_v40 = vld [vmem:[%s6942_s14 + $0x44] ss:$8 sps:$4 sm:$0xff]  }
  0x2e   : > { %3082 = vmatprep.subr.bf16.mxu0 %v6299_v41  ;;  %v6430_v41 = vld [vmem:[%s7574_s4 + $0x164] ss:$8 sps:$4 sm:$0xff]  }
  0x30   : > { %988 = vmatpush1.bf16.msra.mxu1 %v6301_v42  ;;  %v6377_v42 = vld [vmem:[%s6957_s28 + $0x44] ss:$8 sps:$4 sm:$0xff]  }
  0x31   : > { %3083 = vmatpush1.bf16.msra.mxu0 %v6302_v43  ;;  %989 = vmatprep.subr.bf16.mxu1 %v6303_v44  ;;  %v6434_v43 = vld [vmem:[%s7574_s4 + $0x364] ss:$8 sps:$4 sm:$0xff]   ;;  %v6428_v44 = vld [vmem:[%s7574_s4 + $0x160] ss:$8 sps:$4 sm:$0xff]  }
  0x32   : > { %3084 = vmatprep.subr.bf16.mxu0 %v6305_v45  ;;  %v6432_v45 = vld [vmem:[%s7574_s4 + $0x360] ss:$8 sps:$4 sm:$0xff]  }
  0x34   : > { %990 = vmatpush1.bf16.msra.mxu1 %v6307_v46  ;;  %v6441_v46 = vld [vmem:[%s7574_s4 + $0x170] ss:$8 sps:$4 sm:$0xff]  }
  0x35   : > { %3085 = vmatpush1.bf16.msra.mxu0 %v6308_v47  ;;  %991 = vmatprep.subr.bf16.mxu1 %v6309_v48  ;;  %v6443_v47 = vld [vmem:[%s7574_s4 + $0x174] ss:$8 sps:$4 sm:$0xff]   ;;  %v6444_v48 = vld [vmem:[%s7574_s4 + $0x370] ss:$8 sps:$4 sm:$0xff]  }
  0x36   : > { %3086 = vmatprep.subr.bf16.mxu0 %v6311_v50  ;;  %v6379_v50 = vld [vmem:[%s6942_s14 + $0x40] ss:$8 sps:$4 sm:$0xff]  }
  0x38   : > { %992 = vmatpush1.bf16.msra.mxu1 %v6313_v52  ;;  %v6387_v52 = vld [vmem:[%s6942_s14 + $0x54] ss:$8 sps:$4 sm:$0xff]  }
  0x39   : > { %3087 = vmatpush1.bf16.msra.mxu0 %v6314_v53  ;;  %993 = vmatprep.subr.bf16.mxu1 %v6315_v54  ;;  %v6389_v53 = vld [vmem:[%s6957_s28 + $0x54] ss:$8 sps:$4 sm:$0xff]   ;;  %v6458_v54 = vld [vmem:[%s7574_s4 + $0x180] ss:$8 sps:$4 sm:$0xff]  }
  0x3a   : > { %3088 = vmatprep.subr.bf16.mxu0 %v6317_v55  ;;  %v6460_v55 = vld [vmem:[%s7574_s4 + $0x184] ss:$8 sps:$4 sm:$0xff]  }
  0x3c   : > { %994 = vmatpush1.bf16.msra.mxu1 %v6319_v56  ;;  %v6462_v56 = vld [vmem:[%s7574_s4 + $0x380] ss:$8 sps:$4 sm:$0xff]  }
  0x3d   : > { %3089 = vmatpush1.bf16.msra.mxu0 %v6320_v57  ;;  %995 = vmatprep.subr.bf16.mxu1 %v6321_v58  ;;  %v6464_v57 = vld [vmem:[%s7574_s4 + $0x384] ss:$8 sps:$4 sm:$0xff]   ;;  %v6391_v58 = vld [vmem:[%s6942_s14 + $0x50] ss:$8 sps:$4 sm:$0xff]  }
  0x3e   : > { %3090 = vmatprep.subr.bf16.mxu0 %v6323_v59  ;;  %v6392_v59 = vld [vmem:[%s6957_s28 + $0x50] ss:$8 sps:$4 sm:$0xff]  }
  0x40   : > { %996 = vmatpush1.bf16.msra.mxu1 %v6325_v60  ;;  %v6393_v60 = vld [vmem:[%s6942_s14 + $0x64] ss:$8 sps:$4 sm:$0xff]  }
  0x41   : > { %3091 = vmatpush1.bf16.msra.mxu0 %v6326_v61  ;;  %997 = vmatprep.subr.bf16.mxu1 %v6327_v62  ;;  %v6395_v61 = vld [vmem:[%s6957_s28 + $0x64] ss:$8 sps:$4 sm:$0xff]   ;;  %v6471_v62 = vld [vmem:[%s7574_s4 + $0x190] ss:$8 sps:$4 sm:$0xff]  }
  0x42   : > { %3092 = vmatprep.subr.bf16.mxu0 %v6329_v63  ;;  %v6473_v63 = vld [vmem:[%s7574_s4 + $0x194] ss:$8 sps:$4 sm:$0xff]  }
  0x44   : > { %998 = vmatpush1.bf16.msra.mxu1 %v6331_v0  ;;  %v6474_v0 = vld [vmem:[%s7574_s4 + $0x390] ss:$8 sps:$4 sm:$0xff]  }
  0x45   : > { %3093 = vmatpush1.bf16.msra.mxu0 %v6332_v1  ;;  %2020 = vmatprep.subr.bf16.mxu1 %v6341_v2  ;;  %v6476_v1 = vld [vmem:[%s7574_s4 + $0x394] ss:$8 sps:$4 sm:$0xff]   ;;  %v6397_v2 = vld [vmem:[%s6942_s14 + $0x60] ss:$8 sps:$4 sm:$0xff]  }
  0x46   : > { %4104 = vmatprep.subr.bf16.mxu0 %v6344_v3  ;;  %v6401_v3 = vld [vmem:[%s6957_s28 + $0x60] ss:$8 sps:$4 sm:$0xff]  }
  0x47   : > { %1000 = vmatmul.mubr.bf16.vlgmr.msra.gmra.mrb[0].mxu1 %v6333_v4  ;;  %v6405_v4 = vld [vmem:[%s6942_s14 + $0x74] ss:$8 sps:$4 sm:$0xff]  }
  0x48   : > { %3095 = vmatmul.mubr.bf16.vlgmr.msra.gmra.mrb[0].mxu0 %v6336_v5  ;;  %2021 = vmatpush1.bf16.msra.mxu1 %v6339_v6  ;;  %v6407_v5 = vld [vmem:[%s6957_s28 + $0x74] ss:$8 sps:$4 sm:$0xff]   ;;  %v6490_v6 = vld [vmem:[%s7574_s4 + $0x1a4] ss:$8 sps:$4 sm:$0xff]  }
  0x49   : > { %4105 = vmatpush1.bf16.msra.mxu0 %v6342_v7  ;;  %1009 = vmatprep.mubr.bf16.mxu1 %v6345_v8  ;;  %v6488_v7 = vld [vmem:[%s7574_s4 + $0x1a0] ss:$8 sps:$4 sm:$0xff]  }
  0x4a   : > { %3104 = vmatprep.mubr.bf16.mxu0 %v6347_v9  ;;  %2022 = vmatprep.subr.bf16.mxu1 %v6353_v10  ;;  %v6492_v8 = vld [vmem:[%s7574_s4 + $0x3a0] ss:$8 sps:$4 sm:$0xff]   ;;  %v6494_v9 = vld [vmem:[%s7574_s4 + $0x3a4] ss:$8 sps:$4 sm:$0xff]   ;;  %v6409_v10 = vld [vmem:[%s6942_s14 + $0x70] ss:$8 sps:$4 sm:$0xff]  }
  0x4b   : > { %4106 = vmatprep.subr.bf16.mxu0 %v6356_v11  ;;  %v6410_v11 = vld [vmem:[%s6957_s28 + $0x70] ss:$8 sps:$4 sm:$0xff]  }
  0x4c   : > { %2023 = vmatpush1.bf16.msra.mxu1 %v6351_v12  ;;  %v6417_v12 = vld [vmem:[%s6942_s14 + $0x84] ss:$8 sps:$4 sm:$0xff]  }
  0x4d   : > { %4107 = vmatpush1.bf16.msra.mxu0 %v6354_v13  ;;  %2024 = vmatprep.subr.bf16.mxu1 %v6370_v14  ;;  %v6501_v13 = vld [vmem:[%s7574_s4 + $0x1b0] ss:$8 sps:$4 sm:$0xff]   ;;  %v6503_v14 = vld [vmem:[%s7574_s4 + $0x1b4] ss:$8 sps:$4 sm:$0xff]  }
  0x4e   : > { %4108 = vmatprep.subr.bf16.mxu0 %v6374_v15  ;;  %v6504_v15 = vld [vmem:[%s7574_s4 + $0x3b0] ss:$8 sps:$4 sm:$0xff]  }
  0x4f   : > { %1010 = vmatmul.mubr.bf16.gmra.mrb[4].mxu1 %v6349_v16  ;;  %v6506_v16 = vld [vmem:[%s7574_s4 + $0x3b4] ss:$8 sps:$4 sm:$0xff]  }
  0x50   : > { %3105 = vmatmul.mubr.bf16.gmra.mrb[4].mxu0 %v6350_v17  ;;  %1019 = vmatprep.mubr.bf16.mxu1 %v6357_v18  ;;  %v6419_v17 = vld [vmem:[%s6957_s28 + $0x84] ss:$8 sps:$4 sm:$0xff]   ;;  %v6421_v18 = vld [vmem:[%s6942_s14 + $0x80] ss:$8 sps:$4 sm:$0xff]  }
  0x51   : > { %3114 = vmatprep.mubr.bf16.mxu0 %v6359_v19  ;;  %2025 = vmatpush1.bf16.msra.mxu1 %v6368_v20  ;;  %v6422_v19 = vld [vmem:[%s6957_s28 + $0x80] ss:$8 sps:$4 sm:$0xff]  }
  0x52   : > { %4109 = vmatpush1.bf16.msra.mxu0 %v6372_v21  ;;  %2026 = vmatprep.subr.bf16.mxu1 %v6383_v22  ;;  %v6518_v20 = vld [vmem:[%s7574_s4 + $0x1c0] ss:$8 sps:$4 sm:$0xff]   ;;  %v6423_v21 = vld [vmem:[%s6942_s14 + $0x94] ss:$8 sps:$4 sm:$0xff]   ;;  %v6520_v22 = vld [vmem:[%s7574_s4 + $0x1c4] ss:$8 sps:$4 sm:$0xff]  }
  0x53   : > { %4110 = vmatprep.subr.bf16.mxu0 %v6386_v23  ;;  %v6522_v23 = vld [vmem:[%s7574_s4 + $0x3c0] ss:$8 sps:$4 sm:$0xff]  }
  0x55   : > { %2027 = vmatpush1.bf16.msra.mxu1 %v6381_v24  ;;  %v6524_v24 = vld [vmem:[%s7574_s4 + $0x3c4] ss:$8 sps:$4 sm:$0xff]  }
  0x56   : > { %4111 = vmatpush1.bf16.msra.mxu0 %v6384_v27  ;;  %2028 = vmatprep.subr.bf16.mxu1 %v6400_v28  ;;  %v6533_v27 = vld [vmem:[%s7574_s4 + $0x1d4] ss:$8 sps:$4 sm:$0xff]   ;;  %v6534_v28 = vld [vmem:[%s7574_s4 + $0x3d0] ss:$8 sps:$4 sm:$0xff]  }
  0x57   : > { %4112 = vmatprep.subr.bf16.mxu0 %v6404_v29  ;;  %1020 = vmatmul.mubr.bf16.gmra.mrb[8].mxu1 %v6361_v25  ;;  %v6425_v25 = vld [vmem:[%s6957_s28 + $0x94] ss:$8 sps:$4 sm:$0xff]  }
  0x58   : > { %3115 = vmatmul.mubr.bf16.gmra.mrb[8].mxu0 %v6362_v26  ;;  %1029 = vmatprep.mubr.bf16.mxu1 %v6363_v30  ;;  %v6531_v26 = vld [vmem:[%s7574_s4 + $0x1d0] ss:$8 sps:$4 sm:$0xff]   ;;  %v6536_v29 = vld [vmem:[%s7574_s4 + $0x3d4] ss:$8 sps:$4 sm:$0xff]  }
  0x59   : > { %3124 = vmatprep.mubr.bf16.mxu0 %v6365_v31  ;;  %2029 = vmatpush1.bf16.msra.mxu1 %v6398_v32  ;;  %v6427_v30 = vld [vmem:[%s6942_s14 + $0x90] ss:$8 sps:$4 sm:$0xff]   ;;  %v6435_v32 = vld [vmem:[%s6942_s14 + $0xa4] ss:$8 sps:$4 sm:$0xff]  }
  0x5a   : > { %4113 = vmatpush1.bf16.msra.mxu0 %v6402_v33  ;;  %2030 = vmatprep.subr.bf16.mxu1 %v6413_v34  ;;  %v6431_v31 = vld [vmem:[%s6957_s28 + $0x90] ss:$8 sps:$4 sm:$0xff]   ;;  %v6437_v33 = vld [vmem:[%s6957_s28 + $0xa4] ss:$8 sps:$4 sm:$0xff]   ;;  %v6548_v34 = vld [vmem:[%s7574_s4 + $0x1e0] ss:$8 sps:$4 sm:$0xff]  }
  0x5b   : > { %4114 = vmatprep.subr.bf16.mxu0 %v6416_v35  ;;  %v6550_v35 = vld [vmem:[%s7574_s4 + $0x1e4] ss:$8 sps:$4 sm:$0xff]  }
  0x5d   : > { %2031 = vmatpush1.bf16.msra.mxu1 %v6411_v36  ;;  %v6552_v36 = vld [vmem:[%s7574_s4 + $0x3e0] ss:$8 sps:$4 sm:$0xff]  }
  0x5e   : > { %4115 = vmatpush1.bf16.msra.mxu0 %v6414_v39  ;;  %2032 = vmatprep.subr.bf16.mxu1 %v6430_v41  ;;  %v6440_v39 = vld [vmem:[%s6957_s28 + $0xa0] ss:$8 sps:$4 sm:$0xff]   ;;  %v6449_v41 = vld [vmem:[%s6957_s28 + $0xb4] ss:$8 sps:$4 sm:$0xff]  }
  0x5f   : > { %4116 = vmatprep.subr.bf16.mxu0 %v6434_v43  ;;  %1030 = vmatmul.mubr.bf16.gmra.mrb[12].mxu1 %v6367_v37  ;;  %v6554_v37 = vld [vmem:[%s7574_s4 + $0x3e4] ss:$8 sps:$4 sm:$0xff]   ;;  %v6563_v43 = vld [vmem:[%s7574_s4 + $0x1f4] ss:$8 sps:$4 sm:$0xff]  }
  0x60   : > { %3125 = vmatmul.mubr.bf16.gmra.mrb[12].mxu0 %v6371_v38  ;;  %1039 = vmatprep.mubr.bf16.mxu1 %v6375_v40  ;;  %v6439_v38 = vld [vmem:[%s6942_s14 + $0xa0] ss:$8 sps:$4 sm:$0xff]   ;;  %v6447_v40 = vld [vmem:[%s6942_s14 + $0xb4] ss:$8 sps:$4 sm:$0xff]  }
  0x61   : > { %3134 = vmatprep.mubr.bf16.mxu0 %v6377_v42  ;;  %2033 = vmatpush1.bf16.msra.mxu1 %v6428_v44  ;;  %v6561_v42 = vld [vmem:[%s7574_s4 + $0x1f0] ss:$8 sps:$4 sm:$0xff]  }
  0x62   : > { %4117 = vmatpush1.bf16.msra.mxu0 %v6432_v45  ;;  %2034 = vmatprep.subr.bf16.mxu1 %v6443_v47  ;;  %v6564_v44 = vld [vmem:[%s7574_s4 + $0x3f0] ss:$8 sps:$4 sm:$0xff]   ;;  %v6566_v45 = vld [vmem:[%s7574_s4 + $0x3f4] ss:$8 sps:$4 sm:$0xff]  }
  0x63   : > { %4118 = vmatprep.subr.bf16.mxu0 %v6446_v49  ;;  %v6452_v47 = vld [vmem:[%s6957_s28 + $0xb0] ss:$8 sps:$4 sm:$0xff]   ;;  %v6455_v49 = vld [vmem:[%s6957_s28 + $0xc4] ss:$8 sps:$4 sm:$0xff]  }
  0x65   : > { %2035 = vmatpush1.bf16.msra.mxu1 %v6441_v46  ;;  %v6451_v46 = vld [vmem:[%s6942_s14 + $0xb0] ss:$8 sps:$4 sm:$0xff]  }
  0x66   : > { %4119 = vmatpush1.bf16.msra.mxu0 %v6444_v48  ;;  %2036 = vmatprep.subr.bf16.mxu1 %v6460_v55  ;;  %v6453_v48 = vld [vmem:[%s6942_s14 + $0xc4] ss:$8 sps:$4 sm:$0xff]   ;;  %v6470_v55 = vld [vmem:[%s6957_s28 + $0xd0] ss:$8 sps:$4 sm:$0xff]  }
  0x67   : > { %1040 = vmatmul.mubr.bf16.gmra.mrb[16].mxu1 %v6379_v50  ;;  %4120 = vmatprep.subr.bf16.mxu0 %v6464_v57  ;;  %v6457_v50 = vld [vmem:[%s6942_s14 + $0xc0] ss:$8 sps:$4 sm:$0xff]   ;;  %v6479_v57 = vld [vmem:[%s6957_s28 + $0xe4] ss:$8 sps:$4 sm:$0xff]  }
  0x68   : > { %3135 = vmatmul.mubr.bf16.gmra.mrb[16].mxu0 %v6380_v51  ;;  %1049 = vmatprep.mubr.bf16.mxu1 %v6387_v52  ;;  %v6461_v51 = vld [vmem:[%s6957_s28 + $0xc0] ss:$8 sps:$4 sm:$0xff]   ;;  %v6465_v52 = vld [vmem:[%s6942_s14 + $0xd4] ss:$8 sps:$4 sm:$0xff]  }
  0x69   : > { %3144 = vmatprep.mubr.bf16.mxu0 %v6389_v53  ;;  %2037 = vmatpush1.bf16.msra.mxu1 %v6458_v54  ;;  %v6467_v53 = vld [vmem:[%s6957_s28 + $0xd4] ss:$8 sps:$4 sm:$0xff]   ;;  %v6469_v54 = vld [vmem:[%s6942_s14 + $0xd0] ss:$8 sps:$4 sm:$0xff]  }
  0x6a   : > { %4121 = vmatpush1.bf16.msra.mxu0 %v6462_v56  ;;  %2038 = vmatprep.subr.bf16.mxu1 %v6473_v63  ;;  %v6477_v56 = vld [vmem:[%s6942_s14 + $0xe4] ss:$8 sps:$4 sm:$0xff]   ;;  %v6491_v63 = vld [vmem:[%s6957_s28 + $0xf0] ss:$8 sps:$4 sm:$0xff]  }
  0x6b   : > { %4122 = vmatprep.subr.bf16.mxu0 %v6476_v1  ;;  %v6497_v1 = vld [vmem:[%s6957_s28 + $0x104] ss:$8 sps:$4 sm:$0xff]  }
  0x6d   : > { %2039 = vmatpush1.bf16.msra.mxu1 %v6471_v62  ;;  %v6487_v62 = vld [vmem:[%s6942_s14 + $0xf0] ss:$8 sps:$4 sm:$0xff]  }
  0x6e   : > { %4123 = vmatpush1.bf16.msra.mxu0 %v6474_v0  ;;  %2040 = vmatprep.subr.bf16.mxu1 %v6490_v6  ;;  %v6495_v0 = vld [vmem:[%s6942_s14 + $0x104] ss:$8 sps:$4 sm:$0xff]   ;;  %v6511_v6 = vld [vmem:[%s6942_s14 + $0x110] ss:$8 sps:$4 sm:$0xff]  }
  0x6f   : > { %1050 = vmatmul.mubr.bf16.gmra.mrb[20].mxu1 %v6391_v58  ;;  %4124 = vmatprep.subr.bf16.mxu0 %v6494_v9  ;;  %v6481_v58 = vld [vmem:[%s6942_s14 + $0xe0] ss:$8 sps:$4 sm:$0xff]   ;;  %v6515_v9 = vld [vmem:[%s6957_s28 + $0x124] ss:$8 sps:$4 sm:$0xff]  }
  0x70   : > { %3145 = vmatmul.mubr.bf16.gmra.mrb[20].mxu0 %v6392_v59  ;;  %1059 = vmatprep.mubr.bf16.mxu1 %v6393_v60  ;;  %v6482_v59 = vld [vmem:[%s6957_s28 + $0xe0] ss:$8 sps:$4 sm:$0xff]   ;;  %v6483_v60 = vld [vmem:[%s6942_s14 + $0xf4] ss:$8 sps:$4 sm:$0xff]  }
  0x71   : > { %3154 = vmatprep.mubr.bf16.mxu0 %v6395_v61  ;;  %2041 = vmatpush1.bf16.msra.mxu1 %v6488_v7  ;;  %v6485_v61 = vld [vmem:[%s6957_s28 + $0xf4] ss:$8 sps:$4 sm:$0xff]   ;;  %v6512_v7 = vld [vmem:[%s6957_s28 + $0x110] ss:$8 sps:$4 sm:$0xff]  }
  0x72   : > { %4125 = vmatpush1.bf16.msra.mxu0 %v6492_v8  ;;  %2042 = vmatprep.subr.bf16.mxu1 %v6503_v14  ;;  %v6513_v8 = vld [vmem:[%s6942_s14 + $0x124] ss:$8 sps:$4 sm:$0xff]   ;;  %v6529_v14 = vld [vmem:[%s6942_s14 + $0x130] ss:$8 sps:$4 sm:$0xff]  }
  0x73   : > { %4126 = vmatprep.subr.bf16.mxu0 %v6506_v16  ;;  %v6537_v16 = vld [vmem:[%s6942_s14 + $0x144] ss:$8 sps:$4 sm:$0xff]  }
  0x75   : > { %2043 = vmatpush1.bf16.msra.mxu1 %v6501_v13  ;;  %v6527_v13 = vld [vmem:[%s6957_s28 + $0x134] ss:$8 sps:$4 sm:$0xff]  }
  0x76   : > { %4127 = vmatpush1.bf16.msra.mxu0 %v6504_v15  ;;  %2044 = vmatprep.subr.bf16.mxu1 %v6520_v22  ;;  %v6530_v15 = vld [vmem:[%s6957_s28 + $0x130] ss:$8 sps:$4 sm:$0xff]  }
  0x77   : > { %1060 = vmatmul.mubr.bf16.gmra.mrb[24].mxu1 %v6397_v2  ;;  %4128 = vmatprep.subr.bf16.mxu0 %v6524_v24  ;;  %v6499_v2 = vld [vmem:[%s6942_s14 + $0x100] ss:$8 sps:$4 sm:$0xff]   ;;  %v6547_v22 = vld [vmem:[%s6942_s14 + $0x150] ss:$8 sps:$4 sm:$0xff]   ;;  %v6555_v24 = vld [vmem:[%s6942_s14 + $0x164] ss:$8 sps:$4 sm:$0xff]  }
  0x78   : > { %3155 = vmatmul.mubr.bf16.gmra.mrb[24].mxu0 %v6401_v3  ;;  %1069 = vmatprep.mubr.bf16.mxu1 %v6405_v4  ;;  %v6500_v3 = vld [vmem:[%s6957_s28 + $0x100] ss:$8 sps:$4 sm:$0xff]   ;;  %v6507_v4 = vld [vmem:[%s6942_s14 + $0x114] ss:$8 sps:$4 sm:$0xff]  }
  0x79   : > { %3164 = vmatprep.mubr.bf16.mxu0 %v6407_v5  ;;  %2045 = vmatpush1.bf16.msra.mxu1 %v6518_v20  ;;  %v6509_v5 = vld [vmem:[%s6957_s28 + $0x114] ss:$8 sps:$4 sm:$0xff]  }
  0x7a   : > { %4129 = vmatpush1.bf16.msra.mxu0 %v6522_v23  ;;  %2046 = vmatprep.subr.bf16.mxu1 %v6533_v27  ;;  %v6543_v20 = vld [vmem:[%s6942_s14 + $0x154] ss:$8 sps:$4 sm:$0xff]   ;;  %v6551_v23 = vld [vmem:[%s6957_s28 + $0x150] ss:$8 sps:$4 sm:$0xff]   ;;  %v6560_v27 = vld [vmem:[%s6957_s28 + $0x160] ss:$8 sps:$4 sm:$0xff]  }
  0x7b   : > { %4130 = vmatprep.subr.bf16.mxu0 %v6536_v29  ;;  %v6569_v29 = vld [vmem:[%s6957_s28 + $0x174] ss:$8 sps:$4 sm:$0xff]  }
  0x7d   : > { %2047 = vmatpush1.bf16.msra.mxu1 %v6531_v26  ;;  %v6559_v26 = vld [vmem:[%s6942_s14 + $0x160] ss:$8 sps:$4 sm:$0xff]  }
  0x7e   : > { %4131 = vmatpush1.bf16.msra.mxu0 %v6534_v28  ;;  %2048 = vmatprep.subr.bf16.mxu1 %v6550_v35  ;;  %v6567_v28 = vld [vmem:[%s6942_s14 + $0x174] ss:$8 sps:$4 sm:$0xff]   ;;  %v6576_v35 = vld [vmem:[%s7255_s18] ss:$8 sps:$4 sm:$0xff]  }
  0x7f   : > { %1070 = vmatmul.mubr.bf16.gmra.mrb[28].mxu1 %v6409_v10  ;;  %4132 = vmatprep.subr.bf16.mxu0 %v6554_v37  ;;  %v6517_v10 = vld [vmem:[%s6942_s14 + $0x120] ss:$8 sps:$4 sm:$0xff]   ;;  %v6581_v37 = vld [vmem:[%s7255_s18 + $0x14] ss:$8 sps:$4 sm:$0xff]  }
  0x80   : > { %3165 = vmatmul.mubr.bf16.gmra.mrb[28].mxu0 %v6410_v11  ;;  %1079 = vmatprep.mubr.bf16.mxu1 %v6417_v12  ;;  %v6521_v11 = vld [vmem:[%s6957_s28 + $0x120] ss:$8 sps:$4 sm:$0xff]   ;;  %v6525_v12 = vld [vmem:[%s6942_s14 + $0x134] ss:$8 sps:$4 sm:$0xff]  }
  0x81   : > { %3174 = vmatprep.mubr.bf16.mxu0 %v6419_v17  ;;  %2049 = vmatpush1.bf16.msra.mxu1 %v6548_v34  ;;  %v6539_v17 = vld [vmem:[%s6957_s28 + $0x144] ss:$8 sps:$4 sm:$0xff]   ;;  %v6573_v34 = vld [vmem:[%s7249_s15] ss:$8 sps:$4 sm:$0xff]  }
  0x82   : > { %4133 = vmatpush1.bf16.msra.mxu0 %v6552_v36  ;;  %2050 = vmatprep.subr.bf16.mxu1 %v6563_v43  ;;  %v6579_v36 = vld [vmem:[%s7249_s15 + $0x14] ss:$8 sps:$4 sm:$0xff]   ;;  %v6590_v43 = vld [vmem:[%s7255_s18 + $0x20] ss:$8 sps:$4 sm:$0xff]  }
  0x83   : > { %4134 = vmatprep.subr.bf16.mxu0 %v6566_v45  ;;  %v6593_v45 = vld [vmem:[%s7255_s18 + $0x34] ss:$8 sps:$4 sm:$0xff]  }
  0x85   : > { %2051 = vmatpush1.bf16.msra.mxu1 %v6561_v42  ;;  %v6589_v42 = vld [vmem:[%s7249_s15 + $0x20] ss:$8 sps:$4 sm:$0xff]  }
  0x86   : > { %4135 = vmatpush1.bf16.msra.mxu0 %v6564_v44  ;;  %v6591_v44 = vld [vmem:[%s7249_s15 + $0x34] ss:$8 sps:$4 sm:$0xff]  }
  0x87   : > { %1080 = vmatmul.mubr.bf16.gmra.mrb[32].mxu1 %v6421_v18  ;;  %v6541_v18 = vld [vmem:[%s6942_s14 + $0x140] ss:$8 sps:$4 sm:$0xff]  }
  0x88   : > { %3175 = vmatmul.mubr.bf16.gmra.mrb[32].mxu0 %v6422_v19  ;;  %1089 = vmatprep.mubr.bf16.mxu1 %v6423_v21  ;;  %v6542_v19 = vld [vmem:[%s6957_s28 + $0x140] ss:$8 sps:$4 sm:$0xff]   ;;  %v6545_v21 = vld [vmem:[%s6957_s28 + $0x154] ss:$8 sps:$4 sm:$0xff]  }
  0x89   : > { %3184 = vmatprep.mubr.bf16.mxu0 %v6425_v25  ;;  %v6557_v25 = vld [vmem:[%s6957_s28 + $0x164] ss:$8 sps:$4 sm:$0xff]  }
  0x8f   : > { %1090 = vmatmul.mubr.bf16.gmra.mrb[36].mxu1 %v6427_v30  ;;  %v6571_v30 = vld [vmem:[%s6942_s14 + $0x170] ss:$8 sps:$4 sm:$0xff]   ;;  %s5312_s14 = sshll.u32 %s7582_s21, 1 }
  0x90   : > { %3185 = vmatmul.mubr.bf16.gmra.mrb[36].mxu0 %v6431_v31  ;;  %1099 = vmatprep.mubr.bf16.mxu1 %v6435_v32  ;;  %v6572_v31 = vld [vmem:[%s6957_s28 + $0x170] ss:$8 sps:$4 sm:$0xff]   ;;  %v6575_v32 = vld [vmem:[%s7249_s15 + $0x4] ss:$8 sps:$4 sm:$0xff]   ;;  %s468_s20 = scalar_lea.vmem %s7575_s5, %s5312_s14 }
  0x91   : > { %3194 = vmatprep.mubr.bf16.mxu0 %v6437_v33  ;;  %v6578_v33 = vld [vmem:[%s7255_s18 + $0x4] ss:$8 sps:$4 sm:$0xff]  }
  0x97   : > { %1100 = vmatmul.mubr.bf16.gmra.mrb[40].mxu1 %v6439_v38  ;;  %v6583_v38 = vld [vmem:[%s7249_s15 + $0x10] ss:$8 sps:$4 sm:$0xff]  }
  0x98   : > { %3195 = vmatmul.mubr.bf16.gmra.mrb[40].mxu0 %v6440_v39  ;;  %1109 = vmatprep.mubr.bf16.mxu1 %v6447_v40  ;;  %v6584_v39 = vld [vmem:[%s7255_s18 + $0x10] ss:$8 sps:$4 sm:$0xff]   ;;  %v6585_v40 = vld [vmem:[%s7249_s15 + $0x24] ss:$8 sps:$4 sm:$0xff]  }
  0x99   : > { %3204 = vmatprep.mubr.bf16.mxu0 %v6449_v41  ;;  %v6587_v41 = vld [vmem:[%s7255_s18 + $0x24] ss:$8 sps:$4 sm:$0xff]  }
  0x9f   : > { %1110 = vmatmul.mubr.bf16.gmra.mrb[44].mxu1 %v6451_v46  ;;  %v6595_v46 = vld [vmem:[%s7249_s15 + $0x30] ss:$8 sps:$4 sm:$0xff]  }
  0xa0   : > { %3205 = vmatmul.mubr.bf16.gmra.mrb[44].mxu0 %v6452_v47  ;;  %1119 = vmatprep.mubr.bf16.mxu1 %v6453_v48  ;;  %v6596_v47 = vld [vmem:[%s7255_s18 + $0x30] ss:$8 sps:$4 sm:$0xff]   ;;  %v6597_v48 = vld [vmem:[%s7249_s15 + $0x44] ss:$8 sps:$4 sm:$0xff]  }
  0xa1   : > { %3214 = vmatprep.mubr.bf16.mxu0 %v6455_v49  ;;  %v6599_v49 = vld [vmem:[%s7255_s18 + $0x44] ss:$8 sps:$4 sm:$0xff]  }
  0xa7   : > { %1120 = vmatmul.mubr.bf16.gmra.mrb[48].mxu1 %v6457_v50  ;;  %v6601_v50 = vld [vmem:[%s7249_s15 + $0x40] ss:$8 sps:$4 sm:$0xff]  }
  0xa8   : > { %3215 = vmatmul.mubr.bf16.gmra.mrb[48].mxu0 %v6461_v51  ;;  %1129 = vmatprep.mubr.bf16.mxu1 %v6465_v52  ;;  %v6602_v51 = vld [vmem:[%s7255_s18 + $0x40] ss:$8 sps:$4 sm:$0xff]   ;;  %v6603_v52 = vld [vmem:[%s7249_s15 + $0x54] ss:$8 sps:$4 sm:$0xff]  }
  0xa9   : > { %3224 = vmatprep.mubr.bf16.mxu0 %v6467_v53  ;;  %v6605_v53 = vld [vmem:[%s7255_s18 + $0x54] ss:$8 sps:$4 sm:$0xff]  }
  0xaf   : > { %1130 = vmatmul.mubr.bf16.gmra.mrb[52].mxu1 %v6469_v54  ;;  %v6607_v54 = vld [vmem:[%s7249_s15 + $0x50] ss:$8 sps:$4 sm:$0xff]  }
  0xb0   : > { %3225 = vmatmul.mubr.bf16.gmra.mrb[52].mxu0 %v6470_v55  ;;  %1139 = vmatprep.mubr.bf16.mxu1 %v6477_v56  ;;  %v6608_v55 = vld [vmem:[%s7255_s18 + $0x50] ss:$8 sps:$4 sm:$0xff]   ;;  %v6609_v56 = vld [vmem:[%s7249_s15 + $0x64] ss:$8 sps:$4 sm:$0xff]  }
  0xb1   : > { %3234 = vmatprep.mubr.bf16.mxu0 %v6479_v57  ;;  %v6611_v57 = vld [vmem:[%s7255_s18 + $0x64] ss:$8 sps:$4 sm:$0xff]  }
  0xb7   : > { %1140 = vmatmul.mubr.bf16.gmra.mrb[56].mxu1 %v6481_v58  ;;  %v6613_v58 = vld [vmem:[%s7249_s15 + $0x60] ss:$8 sps:$4 sm:$0xff]  }
  0xb8   : > { %3235 = vmatmul.mubr.bf16.gmra.mrb[56].mxu0 %v6482_v59  ;;  %1149 = vmatprep.mubr.bf16.mxu1 %v6483_v60  ;;  %v6614_v59 = vld [vmem:[%s7255_s18 + $0x60] ss:$8 sps:$4 sm:$0xff]   ;;  %v6615_v60 = vld [vmem:[%s7249_s15 + $0x74] ss:$8 sps:$4 sm:$0xff]  }
  0xb9   : > { %3244 = vmatprep.mubr.bf16.mxu0 %v6485_v61  ;;  %v6617_v61 = vld [vmem:[%s7255_s18 + $0x74] ss:$8 sps:$4 sm:$0xff]  }
  0xbf   : > { %1150 = vmatmul.mubr.bf16.gmra.mrb[60].mxu1 %v6487_v62  ;;  %v6619_v62 = vld [vmem:[%s7249_s15 + $0x70] ss:$8 sps:$4 sm:$0xff]  }
  0xc0   : > { %3245 = vmatmul.mubr.bf16.gmra.mrb[60].mxu0 %v6491_v63  ;;  %1159 = vmatprep.mubr.bf16.mxu1 %v6495_v0  ;;  %v6620_v63 = vld [vmem:[%s7255_s18 + $0x70] ss:$8 sps:$4 sm:$0xff]   ;;  %v6621_v0 = vld [vmem:[%s7249_s15 + $0x84] ss:$8 sps:$4 sm:$0xff]  }
  0xc1   : > { %3254 = vmatprep.mubr.bf16.mxu0 %v6497_v1  ;;  %v6623_v1 = vld [vmem:[%s7255_s18 + $0x84] ss:$8 sps:$4 sm:$0xff]  }
  0xc7   : > { %1160 = vmatmul.mubr.bf16.gmra.mrb[64].mxu1 %v6499_v2  ;;  %v6625_v2 = vld [vmem:[%s7249_s15 + $0x80] ss:$8 sps:$4 sm:$0xff]  }
  0xc8   : > { %3255 = vmatmul.mubr.bf16.gmra.mrb[64].mxu0 %v6500_v3  ;;  %1169 = vmatprep.mubr.bf16.mxu1 %v6507_v4  ;;  %v6626_v3 = vld [vmem:[%s7255_s18 + $0x80] ss:$8 sps:$4 sm:$0xff]   ;;  %v6627_v4 = vld [vmem:[%s7249_s15 + $0x94] ss:$8 sps:$4 sm:$0xff]  }
  0xc9   : > { %3264 = vmatprep.mubr.bf16.mxu0 %v6509_v5  ;;  %v6629_v5 = vld [vmem:[%s7255_s18 + $0x94] ss:$8 sps:$4 sm:$0xff]  }
  0xcf   : > { %1170 = vmatmul.mubr.bf16.gmra.mrb[68].mxu1 %v6511_v6  ;;  %v6631_v6 = vld [vmem:[%s7249_s15 + $0x90] ss:$8 sps:$4 sm:$0xff]  }
  0xd0   : > { %3265 = vmatmul.mubr.bf16.gmra.mrb[68].mxu0 %v6512_v7  ;;  %1179 = vmatprep.mubr.bf16.mxu1 %v6513_v8  ;;  %v6632_v7 = vld [vmem:[%s7255_s18 + $0x90] ss:$8 sps:$4 sm:$0xff]   ;;  %v6633_v8 = vld [vmem:[%s7249_s15 + $0xa4] ss:$8 sps:$4 sm:$0xff]  }
  0xd1   : > { %3274 = vmatprep.mubr.bf16.mxu0 %v6515_v9  ;;  %v6635_v9 = vld [vmem:[%s7255_s18 + $0xa4] ss:$8 sps:$4 sm:$0xff]  }
  0xd7   : > { %1180 = vmatmul.mubr.bf16.gmra.mrb[72].mxu1 %v6517_v10  ;;  %v6637_v10 = vld [vmem:[%s7249_s15 + $0xa0] ss:$8 sps:$4 sm:$0xff]  }
  0xd8   : > { %3275 = vmatmul.mubr.bf16.gmra.mrb[72].mxu0 %v6521_v11  ;;  %1189 = vmatprep.mubr.bf16.mxu1 %v6525_v12  ;;  %v6638_v11 = vld [vmem:[%s7255_s18 + $0xa0] ss:$8 sps:$4 sm:$0xff]   ;;  %v6639_v12 = vld [vmem:[%s7249_s15 + $0xb4] ss:$8 sps:$4 sm:$0xff]  }
  0xd9   : > { %3284 = vmatprep.mubr.bf16.mxu0 %v6527_v13  ;;  %v6641_v13 = vld [vmem:[%s7255_s18 + $0xb4] ss:$8 sps:$4 sm:$0xff]  }
  0xdf   : > { %1190 = vmatmul.mubr.bf16.gmra.mrb[76].mxu1 %v6529_v14  ;;  %v6643_v14 = vld [vmem:[%s7249_s15 + $0xb0] ss:$8 sps:$4 sm:$0xff]  }
  0xe0   : > { %3285 = vmatmul.mubr.bf16.gmra.mrb[76].mxu0 %v6530_v15  ;;  %1199 = vmatprep.mubr.bf16.mxu1 %v6537_v16  ;;  %v6644_v15 = vld [vmem:[%s7255_s18 + $0xb0] ss:$8 sps:$4 sm:$0xff]   ;;  %v6645_v16 = vld [vmem:[%s7249_s15 + $0xc4] ss:$8 sps:$4 sm:$0xff]  }
  0xe1   : > { %3294 = vmatprep.mubr.bf16.mxu0 %v6539_v17  ;;  %v6647_v17 = vld [vmem:[%s7255_s18 + $0xc4] ss:$8 sps:$4 sm:$0xff]  }
  0xe7   : > { %1200 = vmatmul.mubr.bf16.gmra.mrb[80].mxu1 %v6541_v18  ;;  %v6649_v18 = vld [vmem:[%s7249_s15 + $0xc0] ss:$8 sps:$4 sm:$0xff]  }
  0xe8   : > { %3295 = vmatmul.mubr.bf16.gmra.mrb[80].mxu0 %v6542_v19  ;;  %1209 = vmatprep.mubr.bf16.mxu1 %v6543_v20  ;;  %v6650_v19 = vld [vmem:[%s7255_s18 + $0xc0] ss:$8 sps:$4 sm:$0xff]   ;;  %v6651_v20 = vld [vmem:[%s7249_s15 + $0xd4] ss:$8 sps:$4 sm:$0xff]  }
  0xe9   : > { %3304 = vmatprep.mubr.bf16.mxu0 %v6545_v21  ;;  %v6653_v21 = vld [vmem:[%s7255_s18 + $0xd4] ss:$8 sps:$4 sm:$0xff]  }
  0xef   : > { %1210 = vmatmul.mubr.bf16.gmra.mrb[84].mxu1 %v6547_v22  ;;  %v6655_v22 = vld [vmem:[%s7249_s15 + $0xd0] ss:$8 sps:$4 sm:$0xff]  }
  0xf0   : > { %3305 = vmatmul.mubr.bf16.gmra.mrb[84].mxu0 %v6551_v23  ;;  %1219 = vmatprep.mubr.bf16.mxu1 %v6555_v24  ;;  %v6656_v23 = vld [vmem:[%s7255_s18 + $0xd0] ss:$8 sps:$4 sm:$0xff]   ;;  %v6657_v24 = vld [vmem:[%s7249_s15 + $0xe4] ss:$8 sps:$4 sm:$0xff]  }
  0xf1   : > { %3314 = vmatprep.mubr.bf16.mxu0 %v6557_v25  ;;  %v6659_v25 = vld [vmem:[%s7255_s18 + $0xe4] ss:$8 sps:$4 sm:$0xff]  }
  0xf7   : > { %1220 = vmatmul.mubr.bf16.gmra.mrb[88].mxu1 %v6559_v26  ;;  %v6661_v26 = vld [vmem:[%s7249_s15 + $0xe0] ss:$8 sps:$4 sm:$0xff]  }
  0xf8   : > { %3315 = vmatmul.mubr.bf16.gmra.mrb[88].mxu0 %v6560_v27  ;;  %1229 = vmatprep.mubr.bf16.mxu1 %v6567_v28  ;;  %v6662_v27 = vld [vmem:[%s7255_s18 + $0xe0] ss:$8 sps:$4 sm:$0xff]   ;;  %v6663_v28 = vld [vmem:[%s7249_s15 + $0xf4] ss:$8 sps:$4 sm:$0xff]  }
  0xf9   : > { %3324 = vmatprep.mubr.bf16.mxu0 %v6569_v29  ;;  %v6665_v29 = vld [vmem:[%s7255_s18 + $0xf4] ss:$8 sps:$4 sm:$0xff]  }
  0xff   : > { %1230 = vmatmul.mubr.bf16.gmra.mrb[92].mxu1 %v6571_v30  ;;  %v6667_v30 = vld [vmem:[%s7249_s15 + $0xf0] ss:$8 sps:$4 sm:$0xff]  }
 0x100   : > { %3325 = vmatmul.mubr.bf16.gmra.mrb[92].mxu0 %v6572_v31  ;;  %2052 = vmatprep.mubr.bf16.mxu1 %v6575_v32  ;;  %v6668_v31 = vld [vmem:[%s7255_s18 + $0xf0] ss:$8 sps:$4 sm:$0xff]   ;;  %v6669_v32 = vld [vmem:[%s7249_s15 + $0x104] ss:$8 sps:$4 sm:$0xff]  }
 0x101   : > { %4136 = vmatprep.mubr.bf16.mxu0 %v6578_v33  ;;  %v6671_v33 = vld [vmem:[%s7255_s18 + $0x104] ss:$8 sps:$4 sm:$0xff]  }
 0x107   : > { %2053 = vmatmul.mubr.bf16.vlgmr.msra.gmra.mrb[0].mxu1 %v6573_v34  ;;  %v6673_v34 = vld [vmem:[%s7249_s15 + $0x100] ss:$8 sps:$4 sm:$0xff]  }
 0x108   : > { %4137 = vmatmul.mubr.bf16.vlgmr.msra.gmra.mrb[0].mxu0 %v6576_v35  ;;  %2062 = vmatprep.mubr.bf16.mxu1 %v6579_v36  ;;  %v6674_v35 = vld [vmem:[%s7255_s18 + $0x100] ss:$8 sps:$4 sm:$0xff]   ;;  %v6675_v36 = vld [vmem:[%s7249_s15 + $0x114] ss:$8 sps:$4 sm:$0xff]  }
 0x109   : > { %4146 = vmatprep.mubr.bf16.mxu0 %v6581_v37  ;;  %v6677_v37 = vld [vmem:[%s7255_s18 + $0x114] ss:$8 sps:$4 sm:$0xff]  }
 0x10f   : > { %2063 = vmatmul.mubr.bf16.gmra.mrb[4].mxu1 %v6583_v38  ;;  %v6679_v38 = vld [vmem:[%s7249_s15 + $0x110] ss:$8 sps:$4 sm:$0xff]  }
 0x110   : > { %4147 = vmatmul.mubr.bf16.gmra.mrb[4].mxu0 %v6584_v39  ;;  %2072 = vmatprep.mubr.bf16.mxu1 %v6585_v40  ;;  %v6680_v39 = vld [vmem:[%s7255_s18 + $0x110] ss:$8 sps:$4 sm:$0xff]   ;;  %v6681_v40 = vld [vmem:[%s7249_s15 + $0x124] ss:$8 sps:$4 sm:$0xff]  }
 0x111   : > { %4156 = vmatprep.mubr.bf16.mxu0 %v6587_v41  ;;  %v6683_v41 = vld [vmem:[%s7255_s18 + $0x124] ss:$8 sps:$4 sm:$0xff]  }
 0x117   : > { %2073 = vmatmul.mubr.bf16.gmra.mrb[8].mxu1 %v6589_v42  ;;  %v6685_v42 = vld [vmem:[%s7249_s15 + $0x120] ss:$8 sps:$4 sm:$0xff]  }
 0x118   : > { %4157 = vmatmul.mubr.bf16.gmra.mrb[8].mxu0 %v6590_v43  ;;  %2082 = vmatprep.mubr.bf16.mxu1 %v6591_v44  ;;  %v6686_v43 = vld [vmem:[%s7255_s18 + $0x120] ss:$8 sps:$4 sm:$0xff]   ;;  %v6687_v44 = vld [vmem:[%s7249_s15 + $0x134] ss:$8 sps:$4 sm:$0xff]  }
 0x119   : > { %4166 = vmatprep.mubr.bf16.mxu0 %v6593_v45  ;;  %v6689_v45 = vld [vmem:[%s7255_s18 + $0x134] ss:$8 sps:$4 sm:$0xff]  }
 0x11f   : > { %2083 = vmatmul.mubr.bf16.gmra.mrb[12].mxu1 %v6595_v46  ;;  %v6691_v46 = vld [vmem:[%s7249_s15 + $0x130] ss:$8 sps:$4 sm:$0xff]  }
 0x120   : > { %4167 = vmatmul.mubr.bf16.gmra.mrb[12].mxu0 %v6596_v47  ;;  %2092 = vmatprep.mubr.bf16.mxu1 %v6597_v48  ;;  %v6692_v47 = vld [vmem:[%s7255_s18 + $0x130] ss:$8 sps:$4 sm:$0xff]   ;;  %v6693_v48 = vld [vmem:[%s7249_s15 + $0x144] ss:$8 sps:$4 sm:$0xff]  }
 0x121   : > { %4176 = vmatprep.mubr.bf16.mxu0 %v6599_v49  ;;  %v6695_v49 = vld [vmem:[%s7255_s18 + $0x144] ss:$8 sps:$4 sm:$0xff]  }
 0x127   : > { %2093 = vmatmul.mubr.bf16.gmra.mrb[16].mxu1 %v6601_v50  ;;  %v6697_v50 = vld [vmem:[%s7249_s15 + $0x140] ss:$8 sps:$4 sm:$0xff]  }
 0x128   : > { %4177 = vmatmul.mubr.bf16.gmra.mrb[16].mxu0 %v6602_v51  ;;  %2102 = vmatprep.mubr.bf16.mxu1 %v6603_v52  ;;  %v6698_v51 = vld [vmem:[%s7255_s18 + $0x140] ss:$8 sps:$4 sm:$0xff]   ;;  %v6699_v52 = vld [vmem:[%s7249_s15 + $0x154] ss:$8 sps:$4 sm:$0xff]  }
 0x129   : > { %4186 = vmatprep.mubr.bf16.mxu0 %v6605_v53  ;;  %v6701_v53 = vld [vmem:[%s7255_s18 + $0x154] ss:$8 sps:$4 sm:$0xff]  }
 0x12f   : > { %2103 = vmatmul.mubr.bf16.gmra.mrb[20].mxu1 %v6607_v54  ;;  %v6703_v54 = vld [vmem:[%s7249_s15 + $0x150] ss:$8 sps:$4 sm:$0xff]  }
 0x130   : > { %4187 = vmatmul.mubr.bf16.gmra.mrb[20].mxu0 %v6608_v55  ;;  %2112 = vmatprep.mubr.bf16.mxu1 %v6609_v56  ;;  %v6704_v55 = vld [vmem:[%s7255_s18 + $0x150] ss:$8 sps:$4 sm:$0xff]   ;;  %v6705_v56 = vld [vmem:[%s7249_s15 + $0x164] ss:$8 sps:$4 sm:$0xff]  }
 0x131   : > { %4196 = vmatprep.mubr.bf16.mxu0 %v6611_v57  ;;  %v6707_v57 = vld [vmem:[%s7255_s18 + $0x164] ss:$8 sps:$4 sm:$0xff]  }
 0x137   : > { %2113 = vmatmul.mubr.bf16.gmra.mrb[24].mxu1 %v6613_v58  ;;  %v6709_v58 = vld [vmem:[%s7249_s15 + $0x160] ss:$8 sps:$4 sm:$0xff]  }
 0x138   : > { %4197 = vmatmul.mubr.bf16.gmra.mrb[24].mxu0 %v6614_v59  ;;  %2122 = vmatprep.mubr.bf16.mxu1 %v6615_v60  ;;  %v6710_v59 = vld [vmem:[%s7255_s18 + $0x160] ss:$8 sps:$4 sm:$0xff]   ;;  %v6711_v60 = vld [vmem:[%s7249_s15 + $0x174] ss:$8 sps:$4 sm:$0xff]  }
 0x139   : > { %4206 = vmatprep.mubr.bf16.mxu0 %v6617_v61  ;;  %v6713_v61 = vld [vmem:[%s7255_s18 + $0x174] ss:$8 sps:$4 sm:$0xff]  }
 0x13f   : > { %2123 = vmatmul.mubr.bf16.gmra.mrb[28].mxu1 %v6619_v62  ;;  %v6715_v62 = vld [vmem:[%s7249_s15 + $0x170] ss:$8 sps:$4 sm:$0xff]  }
 0x140   : > { %4207 = vmatmul.mubr.bf16.gmra.mrb[28].mxu0 %v6620_v63  ;;  %2132 = vmatprep.mubr.bf16.mxu1 %v6621_v0  ;;  %v6716_v63 = vld [vmem:[%s7255_s18 + $0x170] ss:$8 sps:$4 sm:$0xff]   ;;  %v1241_v0 = vlaneseq }
 0x141   : > { %4216 = vmatprep.mubr.bf16.mxu0 %v6623_v1 }
 0x142   : > { %v1242_v1 = vshrl.u32 %v1241_v0, 7 }
 0x147   : > { %2133 = vmatmul.mubr.bf16.gmra.mrb[32].mxu1 %v6625_v2  ;;  %v1243_v2 = vsub.s32 0, %v1242_v1 }
 0x148   : > { %4217 = vmatmul.mubr.bf16.gmra.mrb[32].mxu0 %v6626_v3  ;;  %2142 = vmatprep.mubr.bf16.mxu1 %v6627_v4  ;;  %v486_v3 = vld [vmem:[%s468_s20] sm:$0x3]  ;;  %v1247_v4 = vsub.s32 1, %v1242_v1 }
 0x149   : > { %4226 = vmatprep.mubr.bf16.mxu0 %v6629_v5  ;;  %v7407_v5 = vrot.slane %v486_v3, %v1243_v2 }
 0x14f   : > { %2143 = vmatmul.mubr.bf16.gmra.mrb[36].mxu1 %v6631_v6  ;;  %v7409_v6 = vrot.slane %v486_v3, %v1247_v4 }
 0x150   : > { %4227 = vmatmul.mubr.bf16.gmra.mrb[36].mxu0 %v6632_v7  ;;  %2152 = vmatprep.mubr.bf16.mxu1 %v6633_v8 }
 0x151   : > { %4236 = vmatprep.mubr.bf16.mxu0 %v6635_v9 }
 0x157   : > { %2153 = vmatmul.mubr.bf16.gmra.mrb[40].mxu1 %v6637_v10 }
 0x158   : > { %4237 = vmatmul.mubr.bf16.gmra.mrb[40].mxu0 %v6638_v11  ;;  %2162 = vmatprep.mubr.bf16.mxu1 %v6639_v12 }
 0x159   : > { %4246 = vmatprep.mubr.bf16.mxu0 %v6641_v13 }
 0x15f   : > { %2163 = vmatmul.mubr.bf16.gmra.mrb[44].mxu1 %v6643_v14 }
 0x160   : > { %4247 = vmatmul.mubr.bf16.gmra.mrb[44].mxu0 %v6644_v15  ;;  %2172 = vmatprep.mubr.bf16.mxu1 %v6645_v16 }
 0x161   : > { %4256 = vmatprep.mubr.bf16.mxu0 %v6647_v17 }
 0x167   : > { %2173 = vmatmul.mubr.bf16.gmra.mrb[48].mxu1 %v6649_v18 }
 0x168   : > { %4257 = vmatmul.mubr.bf16.gmra.mrb[48].mxu0 %v6650_v19  ;;  %2182 = vmatprep.mubr.bf16.mxu1 %v6651_v20 }
 0x169   : > { %4266 = vmatprep.mubr.bf16.mxu0 %v6653_v21 }
 0x16f   : > { %2183 = vmatmul.mubr.bf16.gmra.mrb[52].mxu1 %v6655_v22 }
 0x170   : > { %4267 = vmatmul.mubr.bf16.gmra.mrb[52].mxu0 %v6656_v23  ;;  %2192 = vmatprep.mubr.bf16.mxu1 %v6657_v24 }
 0x171   : > { %4276 = vmatprep.mubr.bf16.mxu0 %v6659_v25 }
 0x177   : > { %2193 = vmatmul.mubr.bf16.gmra.mrb[56].mxu1 %v6661_v26 }
 0x178   : > { %4277 = vmatmul.mubr.bf16.gmra.mrb[56].mxu0 %v6662_v27  ;;  %2202 = vmatprep.mubr.bf16.mxu1 %v6663_v28 }
 0x179   : > { %4286 = vmatprep.mubr.bf16.mxu0 %v6665_v29 }
 0x17f   : > { %2203 = vmatmul.mubr.bf16.gmra.mrb[60].mxu1 %v6667_v30 }
 0x180   : > { %4287 = vmatmul.mubr.bf16.gmra.mrb[60].mxu0 %v6668_v31  ;;  %2212 = vmatprep.mubr.bf16.mxu1 %v6669_v32 }
 0x181   : > { %4296 = vmatprep.mubr.bf16.mxu0 %v6671_v33 }
 0x187   : > { %2213 = vmatmul.mubr.bf16.gmra.mrb[64].mxu1 %v6673_v34 }
 0x188   : > { %4297 = vmatmul.mubr.bf16.gmra.mrb[64].mxu0 %v6674_v35  ;;  %2222 = vmatprep.mubr.bf16.mxu1 %v6675_v36 }
 0x189   : > { %4306 = vmatprep.mubr.bf16.mxu0 %v6677_v37 }
 0x18f   : > { %2223 = vmatmul.mubr.bf16.gmra.mrb[68].mxu1 %v6679_v38 }
 0x190   : > { %4307 = vmatmul.mubr.bf16.gmra.mrb[68].mxu0 %v6680_v39  ;;  %2232 = vmatprep.mubr.bf16.mxu1 %v6681_v40 }
 0x191   : > { %4316 = vmatprep.mubr.bf16.mxu0 %v6683_v41 }
 0x197   : > { %2233 = vmatmul.mubr.bf16.gmra.mrb[72].mxu1 %v6685_v42 }
 0x198   : > { %4317 = vmatmul.mubr.bf16.gmra.mrb[72].mxu0 %v6686_v43  ;;  %2242 = vmatprep.mubr.bf16.mxu1 %v6687_v44 }
 0x199   : > { %4326 = vmatprep.mubr.bf16.mxu0 %v6689_v45 }
 0x19f   : > { %2243 = vmatmul.mubr.bf16.gmra.mrb[76].mxu1 %v6691_v46 }
 0x1a0   : > { %4327 = vmatmul.mubr.bf16.gmra.mrb[76].mxu0 %v6692_v47  ;;  %2252 = vmatprep.mubr.bf16.mxu1 %v6693_v48 }
 0x1a1   : > { %4336 = vmatprep.mubr.bf16.mxu0 %v6695_v49 }
 0x1a7   : > { %2253 = vmatmul.mubr.bf16.gmra.mrb[80].mxu1 %v6697_v50 }
 0x1a8   : > { %4337 = vmatmul.mubr.bf16.gmra.mrb[80].mxu0 %v6698_v51  ;;  %2262 = vmatprep.mubr.bf16.mxu1 %v6699_v52 }
 0x1a9   : > { %4346 = vmatprep.mubr.bf16.mxu0 %v6701_v53 }
 0x1af   : > { %2263 = vmatmul.mubr.bf16.gmra.mrb[84].mxu1 %v6703_v54 }
 0x1b0   : > { %4347 = vmatmul.mubr.bf16.gmra.mrb[84].mxu0 %v6704_v55  ;;  %2272 = vmatprep.mubr.bf16.mxu1 %v6705_v56 }
 0x1b1   : > { %4356 = vmatprep.mubr.bf16.mxu0 %v6707_v57 }
 0x1b7   : > { %2273 = vmatmul.mubr.bf16.gmra.mrb[88].mxu1 %v6709_v58 }
 0x1b8   : > { %4357 = vmatmul.mubr.bf16.gmra.mrb[88].mxu0 %v6710_v59  ;;  %2282 = vmatprep.mubr.bf16.mxu1 %v6711_v60 }
 0x1b9   : > { %4366 = vmatprep.mubr.bf16.mxu0 %v6713_v61 }
 0x1bf   : > { %2283 = vmatmul.mubr.bf16.gmra.mrb[92].mxu1 %v6715_v62 }
 0x1c0   : > { %4367 = vmatmul.mubr.bf16.gmra.mrb[92].mxu0 %v6716_v63 }
 0x1da   : > { %v2054_v7 = vpop.f32.mrb[0].mxu1 }
 0x1db   : > { %v4138_v8 = vpop.f32.mrb[0].mxu0  ;;  %v5828_v9 = vadd.f32 %v2054_v7, %v7407_v5  ;;  %v2056_v10 = vpop.f32.mrb[1].mxu1 }
 0x1dc   : > { %v4140_v11 = vpop.f32.mrb[1].mxu0  ;;  %v5830_v12 = vadd.f32 %v2056_v10, %v7409_v6  ;;  %v2058_v13 = vpop.f32.mrb[2].mxu1 }
 0x1dd   : > { %v4142_v14 = vpop.f32.mrb[2].mxu0  ;;  %v5829_v15 = vadd.f32 %v5828_v9, %v4138_v8  ;;  %v5832_v16 = vadd.f32 %v2058_v13, %v7407_v5  ;;  %v2060_v17 = vpop.f32.mrb[3].mxu1 }
 0x1de   : > { %v4144_v18 = vpop.f32.mrb[3].mxu0  ;;  %v5831_v19 = vadd.f32 %v5830_v12, %v4140_v11  ;;  %v5834_v20 = vadd.f32 %v2060_v17, %v7409_v6 }
 0x1df   : > { %v4665_v21 = vmax.f32 %v5829_v15, 0.0  ;;  %v5833_v22 = vadd.f32 %v5832_v16, %v4142_v14 }
 0x1e0   : > { %v4666_v23 = vmax.f32 %v5831_v19, 0.0  ;;  %v5835_v24 = vadd.f32 %v5834_v20, %v4144_v18 }
 0x1e1   : > { %v4667_v25 = vmax.f32 %v5833_v22, 0.0 }
 0x1e2   : > { %v5780_v26 = vpack.c.bf16 %v4666_v23, %v4665_v21  ;;  %v4668_v27 = vmax.f32 %v5835_v24, 0.0  ;;  %v2064_v28 = vpop.f32.mrb[4].mxu1 }
 0x1e3   : > { %v4148_v29 = vpop.f32.mrb[4].mxu0  ;;  %v5836_v30 = vadd.f32 %v2064_v28, %v7407_v5  ;;  %v2066_v31 = vpop.f32.mrb[5].mxu1 }
 0x1e4   : > { %v4150_v32 = vpop.f32.mrb[5].mxu0  ;;  %5049 = vst [vmem:[%s7419_s26] sm:$0xff] %v5780_v26  ;;  %v5781_v33 = vpack.c.bf16 %v4668_v27, %v4667_v25  ;;  %v5838_v34 = vadd.f32 %v2066_v31, %v7409_v6  ;;  %v2068_v35 = vpop.f32.mrb[6].mxu1 }
 0x1e5   : > { %v4152_v36 = vpop.f32.mrb[6].mxu0  ;;  %v5837_v37 = vadd.f32 %v5836_v30, %v4148_v29  ;;  %v5840_v38 = vadd.f32 %v2068_v35, %v7407_v5  ;;  %v2070_v39 = vpop.f32.mrb[7].mxu1 }
 0x1e6   : > { %v4154_v40 = vpop.f32.mrb[7].mxu0  ;;  %5050 = vst [vmem:[%s7419_s26 + $0x8] sm:$0xff] %v5781_v33  ;;  %v5839_v41 = vadd.f32 %v5838_v34, %v4150_v32  ;;  %v5842_v42 = vadd.f32 %v2070_v39, %v7409_v6 }
 0x1e7   : > { %v4669_v43 = vmax.f32 %v5837_v37, 0.0  ;;  %v5841_v44 = vadd.f32 %v5840_v38, %v4152_v36 }
 0x1e8   : > { %v4670_v45 = vmax.f32 %v5839_v41, 0.0  ;;  %v5843_v46 = vadd.f32 %v5842_v42, %v4154_v40 }
 0x1e9   : > { %v4671_v47 = vmax.f32 %v5841_v44, 0.0 }
 0x1ea   : > { %v5782_v48 = vpack.c.bf16 %v4670_v45, %v4669_v43  ;;  %v4672_v49 = vmax.f32 %v5843_v46, 0.0  ;;  %v2074_v50 = vpop.f32.mrb[8].mxu1 }
 0x1eb   : > { %v4158_v51 = vpop.f32.mrb[8].mxu0  ;;  %v5844_v52 = vadd.f32 %v2074_v50, %v7407_v5  ;;  %v2076_v53 = vpop.f32.mrb[9].mxu1 }
 0x1ec   : > { %v4160_v54 = vpop.f32.mrb[9].mxu0  ;;  %5051 = vst [vmem:[%s7419_s26 + $0x10] sm:$0xff] %v5782_v48  ;;  %v5783_v55 = vpack.c.bf16 %v4672_v49, %v4671_v47  ;;  %v5846_v56 = vadd.f32 %v2076_v53, %v7409_v6  ;;  %v2078_v57 = vpop.f32.mrb[10].mxu1 }
 0x1ed   : > { %v4162_v58 = vpop.f32.mrb[10].mxu0  ;;  %v5845_v59 = vadd.f32 %v5844_v52, %v4158_v51  ;;  %v5848_v60 = vadd.f32 %v2078_v57, %v7407_v5  ;;  %v2080_v61 = vpop.f32.mrb[11].mxu1 }
 0x1ee   : > { %v4164_v62 = vpop.f32.mrb[11].mxu0  ;;  %5052 = vst [vmem:[%s7419_s26 + $0x18] sm:$0xff] %v5783_v55  ;;  %v5847_v63 = vadd.f32 %v5846_v56, %v4160_v54  ;;  %v5850_v0 = vadd.f32 %v2080_v61, %v7409_v6 }
 0x1ef   : > { %v4673_v1 = vmax.f32 %v5845_v59, 0.0  ;;  %v5849_v2 = vadd.f32 %v5848_v60, %v4162_v58 }
 0x1f0   : > { %v4674_v3 = vmax.f32 %v5847_v63, 0.0  ;;  %v5851_v4 = vadd.f32 %v5850_v0, %v4164_v62 }
 0x1f1   : > { %v4675_v7 = vmax.f32 %v5849_v2, 0.0 }
 0x1f2   : > { %v5784_v8 = vpack.c.bf16 %v4674_v3, %v4673_v1  ;;  %v4676_v9 = vmax.f32 %v5851_v4, 0.0  ;;  %v2084_v10 = vpop.f32.mrb[12].mxu1 }
 0x1f3   : > { %v4168_v11 = vpop.f32.mrb[12].mxu0  ;;  %v5852_v12 = vadd.f32 %v2084_v10, %v7407_v5  ;;  %v2086_v13 = vpop.f32.mrb[13].mxu1 }
 0x1f4   : > { %v4170_v14 = vpop.f32.mrb[13].mxu0  ;;  %5053 = vst [vmem:[%s7419_s26 + $0x20] sm:$0xff] %v5784_v8  ;;  %v5785_v15 = vpack.c.bf16 %v4676_v9, %v4675_v7  ;;  %v5854_v16 = vadd.f32 %v2086_v13, %v7409_v6  ;;  %v2088_v17 = vpop.f32.mrb[14].mxu1 }
 0x1f5   : > { %v4172_v18 = vpop.f32.mrb[14].mxu0  ;;  %v5853_v19 = vadd.f32 %v5852_v12, %v4168_v11  ;;  %v5856_v20 = vadd.f32 %v2088_v17, %v7407_v5  ;;  %v2090_v21 = vpop.f32.mrb[15].mxu1 }
 0x1f6   : > { %v4174_v22 = vpop.f32.mrb[15].mxu0  ;;  %5054 = vst [vmem:[%s7419_s26 + $0x28] sm:$0xff] %v5785_v15  ;;  %v5855_v23 = vadd.f32 %v5854_v16, %v4170_v14  ;;  %v5858_v24 = vadd.f32 %v2090_v21, %v7409_v6 }
 0x1f7   : > { %v4677_v25 = vmax.f32 %v5853_v19, 0.0  ;;  %v5857_v26 = vadd.f32 %v5856_v20, %v4172_v18 }
 0x1f8   : > { %v4678_v27 = vmax.f32 %v5855_v23, 0.0  ;;  %v5859_v28 = vadd.f32 %v5858_v24, %v4174_v22 }
 0x1f9   : > { %v4679_v29 = vmax.f32 %v5857_v26, 0.0 }
 0x1fa   : > { %v5786_v30 = vpack.c.bf16 %v4678_v27, %v4677_v25  ;;  %v4680_v31 = vmax.f32 %v5859_v28, 0.0  ;;  %v2094_v32 = vpop.f32.mrb[16].mxu1 }
 0x1fb   : > { %v4178_v33 = vpop.f32.mrb[16].mxu0  ;;  %v5860_v34 = vadd.f32 %v2094_v32, %v7407_v5  ;;  %v2096_v35 = vpop.f32.mrb[17].mxu1 }
 0x1fc   : > { %v4180_v36 = vpop.f32.mrb[17].mxu0  ;;  %5055 = vst [vmem:[%s7419_s26 + $0x30] sm:$0xff] %v5786_v30  ;;  %v5787_v37 = vpack.c.bf16 %v4680_v31, %v4679_v29  ;;  %v5862_v38 = vadd.f32 %v2096_v35, %v7409_v6  ;;  %v2098_v39 = vpop.f32.mrb[18].mxu1 }
 0x1fd   : > { %v4182_v40 = vpop.f32.mrb[18].mxu0  ;;  %v5861_v41 = vadd.f32 %v5860_v34, %v4178_v33  ;;  %v5864_v42 = vadd.f32 %v2098_v39, %v7407_v5  ;;  %v2100_v43 = vpop.f32.mrb[19].mxu1 }
 0x1fe   : > { %v4184_v44 = vpop.f32.mrb[19].mxu0  ;;  %5056 = vst [vmem:[%s7419_s26 + $0x38] sm:$0xff] %v5787_v37  ;;  %v5863_v45 = vadd.f32 %v5862_v38, %v4180_v36  ;;  %v5866_v46 = vadd.f32 %v2100_v43, %v7409_v6 }
 0x1ff   : > { %v4681_v47 = vmax.f32 %v5861_v41, 0.0  ;;  %v5865_v48 = vadd.f32 %v5864_v42, %v4182_v40 }
 0x200   : > { %v4682_v49 = vmax.f32 %v5863_v45, 0.0  ;;  %v5867_v50 = vadd.f32 %v5866_v46, %v4184_v44 }
 0x201   : > { %v4683_v51 = vmax.f32 %v5865_v48, 0.0 }
 0x202   : > { %v5788_v52 = vpack.c.bf16 %v4682_v49, %v4681_v47  ;;  %v4684_v53 = vmax.f32 %v5867_v50, 0.0  ;;  %v2104_v54 = vpop.f32.mrb[20].mxu1 }
 0x203   : > { %v4188_v55 = vpop.f32.mrb[20].mxu0  ;;  %v5868_v56 = vadd.f32 %v2104_v54, %v7407_v5  ;;  %v2106_v57 = vpop.f32.mrb[21].mxu1 }
 0x204   : > { %v4190_v58 = vpop.f32.mrb[21].mxu0  ;;  %5057 = vst [vmem:[%s7419_s26 + $0x40] sm:$0xff] %v5788_v52  ;;  %v5789_v59 = vpack.c.bf16 %v4684_v53, %v4683_v51  ;;  %v5870_v60 = vadd.f32 %v2106_v57, %v7409_v6  ;;  %v2108_v61 = vpop.f32.mrb[22].mxu1 }
 0x205   : > { %v4192_v62 = vpop.f32.mrb[22].mxu0  ;;  %v5869_v63 = vadd.f32 %v5868_v56, %v4188_v55  ;;  %v5872_v0 = vadd.f32 %v2108_v61, %v7407_v5  ;;  %v2110_v1 = vpop.f32.mrb[23].mxu1 }
 0x206   : > { %v4194_v2 = vpop.f32.mrb[23].mxu0  ;;  %5058 = vst [vmem:[%s7419_s26 + $0x48] sm:$0xff] %v5789_v59  ;;  %v5871_v3 = vadd.f32 %v5870_v60, %v4190_v58  ;;  %v5874_v4 = vadd.f32 %v2110_v1, %v7409_v6 }
 0x207   : > { %v4685_v7 = vmax.f32 %v5869_v63, 0.0  ;;  %v5873_v8 = vadd.f32 %v5872_v0, %v4192_v62 }
 0x208   : > { %v4686_v9 = vmax.f32 %v5871_v3, 0.0  ;;  %v5875_v10 = vadd.f32 %v5874_v4, %v4194_v2 }
 0x209   : > { %v4687_v11 = vmax.f32 %v5873_v8, 0.0 }
 0x20a   : > { %v5790_v12 = vpack.c.bf16 %v4686_v9, %v4685_v7  ;;  %v4688_v13 = vmax.f32 %v5875_v10, 0.0  ;;  %v2114_v14 = vpop.f32.mrb[24].mxu1 }
 0x20b   : > { %v4198_v15 = vpop.f32.mrb[24].mxu0  ;;  %v5876_v16 = vadd.f32 %v2114_v14, %v7407_v5  ;;  %v2116_v17 = vpop.f32.mrb[25].mxu1 }
 0x20c   : > { %v4200_v18 = vpop.f32.mrb[25].mxu0  ;;  %5059 = vst [vmem:[%s7419_s26 + $0x50] sm:$0xff] %v5790_v12  ;;  %v5791_v19 = vpack.c.bf16 %v4688_v13, %v4687_v11  ;;  %v5878_v20 = vadd.f32 %v2116_v17, %v7409_v6  ;;  %v2118_v21 = vpop.f32.mrb[26].mxu1 }
 0x20d   : > { %v4202_v22 = vpop.f32.mrb[26].mxu0  ;;  %v5877_v23 = vadd.f32 %v5876_v16, %v4198_v15  ;;  %v5880_v24 = vadd.f32 %v2118_v21, %v7407_v5  ;;  %v2120_v25 = vpop.f32.mrb[27].mxu1 }
 0x20e   : > { %v4204_v26 = vpop.f32.mrb[27].mxu0  ;;  %5060 = vst [vmem:[%s7419_s26 + $0x58] sm:$0xff] %v5791_v19  ;;  %v5879_v27 = vadd.f32 %v5878_v20, %v4200_v18  ;;  %v5882_v28 = vadd.f32 %v2120_v25, %v7409_v6 }
 0x20f   : > { %v4689_v29 = vmax.f32 %v5877_v23, 0.0  ;;  %v5881_v30 = vadd.f32 %v5880_v24, %v4202_v22 }
 0x210   : > { %v4690_v31 = vmax.f32 %v5879_v27, 0.0  ;;  %v5883_v32 = vadd.f32 %v5882_v28, %v4204_v26 }
 0x211   : > { %v4691_v33 = vmax.f32 %v5881_v30, 0.0 }
 0x212   : > { %v5792_v34 = vpack.c.bf16 %v4690_v31, %v4689_v29  ;;  %v4692_v35 = vmax.f32 %v5883_v32, 0.0  ;;  %v2124_v36 = vpop.f32.mrb[28].mxu1 }
 0x213   : > { %v4208_v37 = vpop.f32.mrb[28].mxu0  ;;  %v5884_v38 = vadd.f32 %v2124_v36, %v7407_v5  ;;  %v2126_v39 = vpop.f32.mrb[29].mxu1 }
 0x214   : > { %v4210_v40 = vpop.f32.mrb[29].mxu0  ;;  %5061 = vst [vmem:[%s7419_s26 + $0x60] sm:$0xff] %v5792_v34  ;;  %v5793_v41 = vpack.c.bf16 %v4692_v35, %v4691_v33  ;;  %v5886_v42 = vadd.f32 %v2126_v39, %v7409_v6  ;;  %v2128_v43 = vpop.f32.mrb[30].mxu1 }
 0x215   : > { %v4212_v44 = vpop.f32.mrb[30].mxu0  ;;  %v5885_v45 = vadd.f32 %v5884_v38, %v4208_v37  ;;  %v5888_v46 = vadd.f32 %v2128_v43, %v7407_v5  ;;  %v2130_v47 = vpop.f32.mrb[31].mxu1 }
 0x216   : > { %v4214_v48 = vpop.f32.mrb[31].mxu0  ;;  %5062 = vst [vmem:[%s7419_s26 + $0x68] sm:$0xff] %v5793_v41  ;;  %v5887_v49 = vadd.f32 %v5886_v42, %v4210_v40  ;;  %v5890_v50 = vadd.f32 %v2130_v47, %v7409_v6 }
 0x217   : > { %v4693_v51 = vmax.f32 %v5885_v45, 0.0  ;;  %v5889_v52 = vadd.f32 %v5888_v46, %v4212_v44 }
 0x218   : > { %v4694_v53 = vmax.f32 %v5887_v49, 0.0  ;;  %v5891_v54 = vadd.f32 %v5890_v50, %v4214_v48 }
 0x219   : > { %v4695_v55 = vmax.f32 %v5889_v52, 0.0 }
 0x21a   : > { %v5794_v56 = vpack.c.bf16 %v4694_v53, %v4693_v51  ;;  %v4696_v57 = vmax.f32 %v5891_v54, 0.0  ;;  %v2134_v58 = vpop.f32.mrb[32].mxu1 }
 0x21b   : > { %v4218_v59 = vpop.f32.mrb[32].mxu0  ;;  %v5892_v60 = vadd.f32 %v2134_v58, %v7407_v5  ;;  %v2136_v61 = vpop.f32.mrb[33].mxu1 }
 0x21c   : > { %v4220_v62 = vpop.f32.mrb[33].mxu0  ;;  %5063 = vst [vmem:[%s7419_s26 + $0x70] sm:$0xff] %v5794_v56  ;;  %v5795_v63 = vpack.c.bf16 %v4696_v57, %v4695_v55  ;;  %v5894_v0 = vadd.f32 %v2136_v61, %v7409_v6  ;;  %v2138_v1 = vpop.f32.mrb[34].mxu1 }
 0x21d   : > { %v4222_v2 = vpop.f32.mrb[34].mxu0  ;;  %v5893_v3 = vadd.f32 %v5892_v60, %v4218_v59  ;;  %v5896_v4 = vadd.f32 %v2138_v1, %v7407_v5  ;;  %v2140_v7 = vpop.f32.mrb[35].mxu1 }
 0x21e   : > { %v4224_v8 = vpop.f32.mrb[35].mxu0  ;;  %5064 = vst [vmem:[%s7419_s26 + $0x78] sm:$0xff] %v5795_v63  ;;  %v5895_v9 = vadd.f32 %v5894_v0, %v4220_v62  ;;  %v5898_v10 = vadd.f32 %v2140_v7, %v7409_v6 }
 0x21f   : > { %v4697_v11 = vmax.f32 %v5893_v3, 0.0  ;;  %v5897_v12 = vadd.f32 %v5896_v4, %v4222_v2 }
 0x220   : > { %v4698_v13 = vmax.f32 %v5895_v9, 0.0  ;;  %v5899_v14 = vadd.f32 %v5898_v10, %v4224_v8 }
 0x221   : > { %v4699_v15 = vmax.f32 %v5897_v12, 0.0 }
 0x222   : > { %v5796_v16 = vpack.c.bf16 %v4698_v13, %v4697_v11  ;;  %v4700_v17 = vmax.f32 %v5899_v14, 0.0  ;;  %v2144_v18 = vpop.f32.mrb[36].mxu1 }
 0x223   : > { %v4228_v19 = vpop.f32.mrb[36].mxu0  ;;  %v5900_v20 = vadd.f32 %v2144_v18, %v7407_v5  ;;  %v2146_v21 = vpop.f32.mrb[37].mxu1 }
 0x224   : > { %v4230_v22 = vpop.f32.mrb[37].mxu0  ;;  %5065 = vst [vmem:[%s7419_s26 + $0x80] sm:$0xff] %v5796_v16  ;;  %v5797_v23 = vpack.c.bf16 %v4700_v17, %v4699_v15  ;;  %v5902_v24 = vadd.f32 %v2146_v21, %v7409_v6  ;;  %v2148_v25 = vpop.f32.mrb[38].mxu1 }
 0x225   : > { %v4232_v26 = vpop.f32.mrb[38].mxu0  ;;  %v5901_v27 = vadd.f32 %v5900_v20, %v4228_v19  ;;  %v5904_v28 = vadd.f32 %v2148_v25, %v7407_v5  ;;  %v2150_v29 = vpop.f32.mrb[39].mxu1 }
 0x226   : > { %v4234_v30 = vpop.f32.mrb[39].mxu0  ;;  %5066 = vst [vmem:[%s7419_s26 + $0x88] sm:$0xff] %v5797_v23  ;;  %v5903_v31 = vadd.f32 %v5902_v24, %v4230_v22  ;;  %v5906_v32 = vadd.f32 %v2150_v29, %v7409_v6 }
 0x227   : > { %v4701_v33 = vmax.f32 %v5901_v27, 0.0  ;;  %v5905_v34 = vadd.f32 %v5904_v28, %v4232_v26 }
 0x228   : > { %v4702_v35 = vmax.f32 %v5903_v31, 0.0  ;;  %v5907_v36 = vadd.f32 %v5906_v32, %v4234_v30 }
 0x229   : > { %v4703_v37 = vmax.f32 %v5905_v34, 0.0 }
 0x22a   : > { %v5798_v38 = vpack.c.bf16 %v4702_v35, %v4701_v33  ;;  %v4704_v39 = vmax.f32 %v5907_v36, 0.0  ;;  %v2154_v40 = vpop.f32.mrb[40].mxu1 }
 0x22b   : > { %v4238_v41 = vpop.f32.mrb[40].mxu0  ;;  %v5908_v42 = vadd.f32 %v2154_v40, %v7407_v5  ;;  %v2156_v43 = vpop.f32.mrb[41].mxu1 }
 0x22c   : > { %v4240_v44 = vpop.f32.mrb[41].mxu0  ;;  %5067 = vst [vmem:[%s7419_s26 + $0x90] sm:$0xff] %v5798_v38  ;;  %v5799_v45 = vpack.c.bf16 %v4704_v39, %v4703_v37  ;;  %v5910_v46 = vadd.f32 %v2156_v43, %v7409_v6  ;;  %v2158_v47 = vpop.f32.mrb[42].mxu1 }
 0x22d   : > { %v4242_v48 = vpop.f32.mrb[42].mxu0  ;;  %v5909_v49 = vadd.f32 %v5908_v42, %v4238_v41  ;;  %v5912_v50 = vadd.f32 %v2158_v47, %v7407_v5  ;;  %v2160_v51 = vpop.f32.mrb[43].mxu1 }
 0x22e   : > { %v4244_v52 = vpop.f32.mrb[43].mxu0  ;;  %5068 = vst [vmem:[%s7419_s26 + $0x98] sm:$0xff] %v5799_v45  ;;  %v5911_v53 = vadd.f32 %v5910_v46, %v4240_v44  ;;  %v5914_v54 = vadd.f32 %v2160_v51, %v7409_v6 }
 0x22f   : > { %v4705_v55 = vmax.f32 %v5909_v49, 0.0  ;;  %v5913_v56 = vadd.f32 %v5912_v50, %v4242_v48 }
 0x230   : > { %v4706_v57 = vmax.f32 %v5911_v53, 0.0  ;;  %v5915_v58 = vadd.f32 %v5914_v54, %v4244_v52 }
 0x231   : > { %v4707_v59 = vmax.f32 %v5913_v56, 0.0 }
 0x232   : > { %v5800_v60 = vpack.c.bf16 %v4706_v57, %v4705_v55  ;;  %v4708_v61 = vmax.f32 %v5915_v58, 0.0  ;;  %v2164_v62 = vpop.f32.mrb[44].mxu1 }
 0x233   : > { %v4248_v63 = vpop.f32.mrb[44].mxu0  ;;  %v5916_v0 = vadd.f32 %v2164_v62, %v7407_v5  ;;  %v2166_v1 = vpop.f32.mrb[45].mxu1 }
 0x234   : > { %v4250_v2 = vpop.f32.mrb[45].mxu0  ;;  %5069 = vst [vmem:[%s7419_s26 + $0xa0] sm:$0xff] %v5800_v60  ;;  %v5801_v3 = vpack.c.bf16 %v4708_v61, %v4707_v59  ;;  %v5918_v4 = vadd.f32 %v2166_v1, %v7409_v6  ;;  %v2168_v7 = vpop.f32.mrb[46].mxu1 }
 0x235   : > { %v4252_v8 = vpop.f32.mrb[46].mxu0  ;;  %v5917_v9 = vadd.f32 %v5916_v0, %v4248_v63  ;;  %v5920_v10 = vadd.f32 %v2168_v7, %v7407_v5  ;;  %v2170_v11 = vpop.f32.mrb[47].mxu1 }
 0x236   : > { %v4254_v12 = vpop.f32.mrb[47].mxu0  ;;  %5070 = vst [vmem:[%s7419_s26 + $0xa8] sm:$0xff] %v5801_v3  ;;  %v5919_v13 = vadd.f32 %v5918_v4, %v4250_v2  ;;  %v5922_v14 = vadd.f32 %v2170_v11, %v7409_v6 }
 0x237   : > { %v4709_v15 = vmax.f32 %v5917_v9, 0.0  ;;  %v5921_v16 = vadd.f32 %v5920_v10, %v4252_v8 }
 0x238   : > { %v4710_v17 = vmax.f32 %v5919_v13, 0.0  ;;  %v5923_v18 = vadd.f32 %v5922_v14, %v4254_v12 }
 0x239   : > { %v4711_v19 = vmax.f32 %v5921_v16, 0.0 }
 0x23a   : > { %v5802_v20 = vpack.c.bf16 %v4710_v17, %v4709_v15  ;;  %v4712_v21 = vmax.f32 %v5923_v18, 0.0  ;;  %v2174_v22 = vpop.f32.mrb[48].mxu1 }
 0x23b   : > { %v4258_v23 = vpop.f32.mrb[48].mxu0  ;;  %v5924_v24 = vadd.f32 %v2174_v22, %v7407_v5  ;;  %v2176_v25 = vpop.f32.mrb[49].mxu1 }
 0x23c   : > { %v4260_v26 = vpop.f32.mrb[49].mxu0  ;;  %5071 = vst [vmem:[%s7419_s26 + $0xb0] sm:$0xff] %v5802_v20  ;;  %v5803_v27 = vpack.c.bf16 %v4712_v21, %v4711_v19  ;;  %v5926_v28 = vadd.f32 %v2176_v25, %v7409_v6  ;;  %v2178_v29 = vpop.f32.mrb[50].mxu1 }
 0x23d   : > { %v4262_v30 = vpop.f32.mrb[50].mxu0  ;;  %v5925_v31 = vadd.f32 %v5924_v24, %v4258_v23  ;;  %v5928_v32 = vadd.f32 %v2178_v29, %v7407_v5  ;;  %v2180_v33 = vpop.f32.mrb[51].mxu1 }
 0x23e   : > { %v4264_v34 = vpop.f32.mrb[51].mxu0  ;;  %5072 = vst [vmem:[%s7419_s26 + $0xb8] sm:$0xff] %v5803_v27  ;;  %v5927_v35 = vadd.f32 %v5926_v28, %v4260_v26  ;;  %v5930_v36 = vadd.f32 %v2180_v33, %v7409_v6 }
 0x23f   : > { %v4713_v37 = vmax.f32 %v5925_v31, 0.0  ;;  %v5929_v38 = vadd.f32 %v5928_v32, %v4262_v30 }
 0x240   : > { %v4714_v39 = vmax.f32 %v5927_v35, 0.0  ;;  %v5931_v40 = vadd.f32 %v5930_v36, %v4264_v34 }
 0x241   : > { %v4715_v41 = vmax.f32 %v5929_v38, 0.0 }
 0x242   : > { %v5804_v42 = vpack.c.bf16 %v4714_v39, %v4713_v37  ;;  %v4716_v43 = vmax.f32 %v5931_v40, 0.0  ;;  %v2184_v44 = vpop.f32.mrb[52].mxu1 }
 0x243   : > { %v4268_v45 = vpop.f32.mrb[52].mxu0  ;;  %v5932_v46 = vadd.f32 %v2184_v44, %v7407_v5  ;;  %v2186_v47 = vpop.f32.mrb[53].mxu1 }
 0x244   : > { %v4270_v48 = vpop.f32.mrb[53].mxu0  ;;  %5073 = vst [vmem:[%s7419_s26 + $0xc0] sm:$0xff] %v5804_v42  ;;  %v5805_v49 = vpack.c.bf16 %v4716_v43, %v4715_v41  ;;  %v5934_v50 = vadd.f32 %v2186_v47, %v7409_v6  ;;  %v2188_v51 = vpop.f32.mrb[54].mxu1 }
 0x245   : > { %v4272_v52 = vpop.f32.mrb[54].mxu0  ;;  %v5933_v53 = vadd.f32 %v5932_v46, %v4268_v45  ;;  %v5936_v54 = vadd.f32 %v2188_v51, %v7407_v5  ;;  %v2190_v55 = vpop.f32.mrb[55].mxu1 }
 0x246   : > { %v4274_v56 = vpop.f32.mrb[55].mxu0  ;;  %5074 = vst [vmem:[%s7419_s26 + $0xc8] sm:$0xff] %v5805_v49  ;;  %v5935_v57 = vadd.f32 %v5934_v50, %v4270_v48  ;;  %v5938_v58 = vadd.f32 %v2190_v55, %v7409_v6 }
 0x247   : > { %v4717_v59 = vmax.f32 %v5933_v53, 0.0  ;;  %v5937_v60 = vadd.f32 %v5936_v54, %v4272_v52 }
 0x248   : > { %v4718_v61 = vmax.f32 %v5935_v57, 0.0  ;;  %v5939_v62 = vadd.f32 %v5938_v58, %v4274_v56 }
 0x249   : > { %v4719_v63 = vmax.f32 %v5937_v60, 0.0 }
 0x24a   : > { %v5806_v0 = vpack.c.bf16 %v4718_v61, %v4717_v59  ;;  %v4720_v1 = vmax.f32 %v5939_v62, 0.0  ;;  %v2194_v2 = vpop.f32.mrb[56].mxu1 }
 0x24b   : > { %v4278_v3 = vpop.f32.mrb[56].mxu0  ;;  %v5940_v4 = vadd.f32 %v2194_v2, %v7407_v5  ;;  %v2196_v7 = vpop.f32.mrb[57].mxu1 }
 0x24c   : > { %v4280_v8 = vpop.f32.mrb[57].mxu0  ;;  %5075 = vst [vmem:[%s7419_s26 + $0xd0] sm:$0xff] %v5806_v0  ;;  %v5807_v9 = vpack.c.bf16 %v4720_v1, %v4719_v63  ;;  %v5942_v10 = vadd.f32 %v2196_v7, %v7409_v6  ;;  %v2198_v11 = vpop.f32.mrb[58].mxu1 }
 0x24d   : > { %v4282_v12 = vpop.f32.mrb[58].mxu0  ;;  %v5941_v13 = vadd.f32 %v5940_v4, %v4278_v3  ;;  %v5944_v14 = vadd.f32 %v2198_v11, %v7407_v5  ;;  %v2200_v15 = vpop.f32.mrb[59].mxu1 }
 0x24e   : > { %v4284_v16 = vpop.f32.mrb[59].mxu0  ;;  %5076 = vst [vmem:[%s7419_s26 + $0xd8] sm:$0xff] %v5807_v9  ;;  %v5943_v17 = vadd.f32 %v5942_v10, %v4280_v8  ;;  %v5946_v18 = vadd.f32 %v2200_v15, %v7409_v6 }
 0x24f   : > { %v4721_v19 = vmax.f32 %v5941_v13, 0.0  ;;  %v5945_v20 = vadd.f32 %v5944_v14, %v4282_v12 }
 0x250   : > { %v4722_v21 = vmax.f32 %v5943_v17, 0.0  ;;  %v5947_v22 = vadd.f32 %v5946_v18, %v4284_v16 }
 0x251   : > { %v4723_v23 = vmax.f32 %v5945_v20, 0.0 }
 0x252   : > { %v5808_v24 = vpack.c.bf16 %v4722_v21, %v4721_v19  ;;  %v4724_v25 = vmax.f32 %v5947_v22, 0.0  ;;  %v2204_v26 = vpop.f32.mrb[60].mxu1 }
 0x253   : > { %v4288_v27 = vpop.f32.mrb[60].mxu0  ;;  %v5948_v28 = vadd.f32 %v2204_v26, %v7407_v5  ;;  %v2206_v29 = vpop.f32.mrb[61].mxu1 }
 0x254   : > { %v4290_v30 = vpop.f32.mrb[61].mxu0  ;;  %5077 = vst [vmem:[%s7419_s26 + $0xe0] sm:$0xff] %v5808_v24  ;;  %v5809_v31 = vpack.c.bf16 %v4724_v25, %v4723_v23  ;;  %v5950_v32 = vadd.f32 %v2206_v29, %v7409_v6  ;;  %v2208_v33 = vpop.f32.mrb[62].mxu1 }
 0x255   : > { %v4292_v34 = vpop.f32.mrb[62].mxu0  ;;  %v5949_v35 = vadd.f32 %v5948_v28, %v4288_v27  ;;  %v5952_v36 = vadd.f32 %v2208_v33, %v7407_v5  ;;  %v2210_v37 = vpop.f32.mrb[63].mxu1 }
 0x256   : > { %v4294_v38 = vpop.f32.mrb[63].mxu0  ;;  %5078 = vst [vmem:[%s7419_s26 + $0xe8] sm:$0xff] %v5809_v31  ;;  %v5951_v39 = vadd.f32 %v5950_v32, %v4290_v30  ;;  %v5954_v40 = vadd.f32 %v2210_v37, %v7409_v6 }
 0x257   : > { %v4725_v41 = vmax.f32 %v5949_v35, 0.0  ;;  %v5953_v42 = vadd.f32 %v5952_v36, %v4292_v34 }
 0x258   : > { %v4726_v43 = vmax.f32 %v5951_v39, 0.0  ;;  %v5955_v44 = vadd.f32 %v5954_v40, %v4294_v38 }
 0x259   : > { %v4727_v45 = vmax.f32 %v5953_v42, 0.0 }
 0x25a   : > { %v5810_v46 = vpack.c.bf16 %v4726_v43, %v4725_v41  ;;  %v4728_v47 = vmax.f32 %v5955_v44, 0.0  ;;  %v2214_v48 = vpop.f32.mrb[64].mxu1 }
 0x25b   : > { %v4298_v49 = vpop.f32.mrb[64].mxu0  ;;  %v5956_v50 = vadd.f32 %v2214_v48, %v7407_v5  ;;  %v2216_v51 = vpop.f32.mrb[65].mxu1 }
 0x25c   : > { %v4300_v52 = vpop.f32.mrb[65].mxu0  ;;  %5079 = vst [vmem:[%s7419_s26 + $0xf0] sm:$0xff] %v5810_v46  ;;  %v5811_v53 = vpack.c.bf16 %v4728_v47, %v4727_v45  ;;  %v5958_v54 = vadd.f32 %v2216_v51, %v7409_v6  ;;  %v2218_v55 = vpop.f32.mrb[66].mxu1 }
 0x25d   : > { %v4302_v56 = vpop.f32.mrb[66].mxu0  ;;  %v5957_v57 = vadd.f32 %v5956_v50, %v4298_v49  ;;  %v5960_v58 = vadd.f32 %v2218_v55, %v7407_v5  ;;  %v2220_v59 = vpop.f32.mrb[67].mxu1 }
 0x25e   : > { %v4304_v60 = vpop.f32.mrb[67].mxu0  ;;  %5080 = vst [vmem:[%s7419_s26 + $0xf8] sm:$0xff] %v5811_v53  ;;  %v5959_v61 = vadd.f32 %v5958_v54, %v4300_v52  ;;  %v5962_v62 = vadd.f32 %v2220_v59, %v7409_v6 }
 0x25f   : > { %v4729_v63 = vmax.f32 %v5957_v57, 0.0  ;;  %v5961_v0 = vadd.f32 %v5960_v58, %v4302_v56 }
 0x260   : > { %v4730_v1 = vmax.f32 %v5959_v61, 0.0  ;;  %v5963_v2 = vadd.f32 %v5962_v62, %v4304_v60 }
 0x261   : > { %v4731_v3 = vmax.f32 %v5961_v0, 0.0 }
 0x262   : > { %v5812_v4 = vpack.c.bf16 %v4730_v1, %v4729_v63  ;;  %v4732_v7 = vmax.f32 %v5963_v2, 0.0  ;;  %v2224_v8 = vpop.f32.mrb[68].mxu1 }
 0x263   : > { %v4308_v9 = vpop.f32.mrb[68].mxu0  ;;  %v5964_v10 = vadd.f32 %v2224_v8, %v7407_v5  ;;  %v2226_v11 = vpop.f32.mrb[69].mxu1 }
 0x264   : > { %v4310_v12 = vpop.f32.mrb[69].mxu0  ;;  %5081 = vst [vmem:[%s7419_s26 + $0x100] sm:$0xff] %v5812_v4  ;;  %v5813_v13 = vpack.c.bf16 %v4732_v7, %v4731_v3  ;;  %v5966_v14 = vadd.f32 %v2226_v11, %v7409_v6  ;;  %v2228_v15 = vpop.f32.mrb[70].mxu1 }
 0x265   : > { %v4312_v16 = vpop.f32.mrb[70].mxu0  ;;  %v5965_v17 = vadd.f32 %v5964_v10, %v4308_v9  ;;  %v5968_v18 = vadd.f32 %v2228_v15, %v7407_v5  ;;  %v2230_v19 = vpop.f32.mrb[71].mxu1 }
 0x266   : > { %v4314_v20 = vpop.f32.mrb[71].mxu0  ;;  %5082 = vst [vmem:[%s7419_s26 + $0x108] sm:$0xff] %v5813_v13  ;;  %v5967_v21 = vadd.f32 %v5966_v14, %v4310_v12  ;;  %v5970_v22 = vadd.f32 %v2230_v19, %v7409_v6 }
 0x267   : > { %v4733_v23 = vmax.f32 %v5965_v17, 0.0  ;;  %v5969_v24 = vadd.f32 %v5968_v18, %v4312_v16 }
 0x268   : > { %v4734_v25 = vmax.f32 %v5967_v21, 0.0  ;;  %v5971_v26 = vadd.f32 %v5970_v22, %v4314_v20 }
 0x269   : > { %v4735_v27 = vmax.f32 %v5969_v24, 0.0 }
 0x26a   : > { %v5814_v28 = vpack.c.bf16 %v4734_v25, %v4733_v23  ;;  %v4736_v29 = vmax.f32 %v5971_v26, 0.0  ;;  %v2234_v30 = vpop.f32.mrb[72].mxu1 }
 0x26b   : > { %v4318_v31 = vpop.f32.mrb[72].mxu0  ;;  %v5972_v32 = vadd.f32 %v2234_v30, %v7407_v5  ;;  %v2236_v33 = vpop.f32.mrb[73].mxu1 }
 0x26c   : > { %v4320_v34 = vpop.f32.mrb[73].mxu0  ;;  %5083 = vst [vmem:[%s7419_s26 + $0x110] sm:$0xff] %v5814_v28  ;;  %v5815_v35 = vpack.c.bf16 %v4736_v29, %v4735_v27  ;;  %v5974_v36 = vadd.f32 %v2236_v33, %v7409_v6  ;;  %v2238_v37 = vpop.f32.mrb[74].mxu1 }
 0x26d   : > { %v4322_v38 = vpop.f32.mrb[74].mxu0  ;;  %v5973_v39 = vadd.f32 %v5972_v32, %v4318_v31  ;;  %v5976_v40 = vadd.f32 %v2238_v37, %v7407_v5  ;;  %v2240_v41 = vpop.f32.mrb[75].mxu1 }
 0x26e   : > { %v4324_v42 = vpop.f32.mrb[75].mxu0  ;;  %5084 = vst [vmem:[%s7419_s26 + $0x118] sm:$0xff] %v5815_v35  ;;  %v5975_v43 = vadd.f32 %v5974_v36, %v4320_v34  ;;  %v5978_v44 = vadd.f32 %v2240_v41, %v7409_v6 }
 0x26f   : > { %v4737_v45 = vmax.f32 %v5973_v39, 0.0  ;;  %v5977_v46 = vadd.f32 %v5976_v40, %v4322_v38 }
 0x270   : > { %v4738_v47 = vmax.f32 %v5975_v43, 0.0  ;;  %v5979_v48 = vadd.f32 %v5978_v44, %v4324_v42 }
 0x271   : > { %v4739_v49 = vmax.f32 %v5977_v46, 0.0 }
 0x272   : > { %v5816_v50 = vpack.c.bf16 %v4738_v47, %v4737_v45  ;;  %v4740_v51 = vmax.f32 %v5979_v48, 0.0  ;;  %v2244_v52 = vpop.f32.mrb[76].mxu1 }
 0x273   : > { %v4328_v53 = vpop.f32.mrb[76].mxu0  ;;  %v5980_v54 = vadd.f32 %v2244_v52, %v7407_v5  ;;  %v2246_v55 = vpop.f32.mrb[77].mxu1 }
 0x274   : > { %v4330_v56 = vpop.f32.mrb[77].mxu0  ;;  %5085 = vst [vmem:[%s7419_s26 + $0x120] sm:$0xff] %v5816_v50  ;;  %v5817_v57 = vpack.c.bf16 %v4740_v51, %v4739_v49  ;;  %v5982_v58 = vadd.f32 %v2246_v55, %v7409_v6  ;;  %v2248_v59 = vpop.f32.mrb[78].mxu1 }
 0x275   : > { %v4332_v60 = vpop.f32.mrb[78].mxu0  ;;  %v5981_v61 = vadd.f32 %v5980_v54, %v4328_v53  ;;  %v5984_v62 = vadd.f32 %v2248_v59, %v7407_v5  ;;  %v2250_v63 = vpop.f32.mrb[79].mxu1 }
 0x276   : > { %v4334_v0 = vpop.f32.mrb[79].mxu0  ;;  %5086 = vst [vmem:[%s7419_s26 + $0x128] sm:$0xff] %v5817_v57  ;;  %v5983_v1 = vadd.f32 %v5982_v58, %v4330_v56  ;;  %v5986_v2 = vadd.f32 %v2250_v63, %v7409_v6 }
 0x277   : > { %v4741_v3 = vmax.f32 %v5981_v61, 0.0  ;;  %v5985_v4 = vadd.f32 %v5984_v62, %v4332_v60 }
 0x278   : > { %v4742_v7 = vmax.f32 %v5983_v1, 0.0  ;;  %v5987_v8 = vadd.f32 %v5986_v2, %v4334_v0 }
 0x279   : > { %v4743_v9 = vmax.f32 %v5985_v4, 0.0 }
 0x27a   : > { %v5818_v10 = vpack.c.bf16 %v4742_v7, %v4741_v3  ;;  %v4744_v11 = vmax.f32 %v5987_v8, 0.0  ;;  %v2254_v12 = vpop.f32.mrb[80].mxu1 }
 0x27b   : > { %v4338_v13 = vpop.f32.mrb[80].mxu0  ;;  %v5988_v14 = vadd.f32 %v2254_v12, %v7407_v5  ;;  %v2256_v15 = vpop.f32.mrb[81].mxu1 }
 0x27c   : > { %v4340_v16 = vpop.f32.mrb[81].mxu0  ;;  %5087 = vst [vmem:[%s7419_s26 + $0x130] sm:$0xff] %v5818_v10  ;;  %v5819_v17 = vpack.c.bf16 %v4744_v11, %v4743_v9  ;;  %v5990_v18 = vadd.f32 %v2256_v15, %v7409_v6  ;;  %v2258_v19 = vpop.f32.mrb[82].mxu1 }
 0x27d   : > { %v4342_v20 = vpop.f32.mrb[82].mxu0  ;;  %v5989_v21 = vadd.f32 %v5988_v14, %v4338_v13  ;;  %v5992_v22 = vadd.f32 %v2258_v19, %v7407_v5  ;;  %v2260_v23 = vpop.f32.mrb[83].mxu1 }
 0x27e   : > { %v4344_v24 = vpop.f32.mrb[83].mxu0  ;;  %5088 = vst [vmem:[%s7419_s26 + $0x138] sm:$0xff] %v5819_v17  ;;  %v5991_v25 = vadd.f32 %v5990_v18, %v4340_v16  ;;  %v5994_v26 = vadd.f32 %v2260_v23, %v7409_v6 }
 0x27f   : > { %v4745_v27 = vmax.f32 %v5989_v21, 0.0  ;;  %v5993_v28 = vadd.f32 %v5992_v22, %v4342_v20 }
 0x280   : > { %v4746_v29 = vmax.f32 %v5991_v25, 0.0  ;;  %v5995_v30 = vadd.f32 %v5994_v26, %v4344_v24 }
 0x281   : > { %v4747_v31 = vmax.f32 %v5993_v28, 0.0 }
 0x282   : > { %v5820_v32 = vpack.c.bf16 %v4746_v29, %v4745_v27  ;;  %v4748_v33 = vmax.f32 %v5995_v30, 0.0  ;;  %v2264_v34 = vpop.f32.mrb[84].mxu1 }
 0x283   : > { %v4348_v35 = vpop.f32.mrb[84].mxu0  ;;  %v5996_v36 = vadd.f32 %v2264_v34, %v7407_v5  ;;  %v2266_v37 = vpop.f32.mrb[85].mxu1 }
 0x284   : > { %v4350_v38 = vpop.f32.mrb[85].mxu0  ;;  %5089 = vst [vmem:[%s7419_s26 + $0x140] sm:$0xff] %v5820_v32  ;;  %v5821_v39 = vpack.c.bf16 %v4748_v33, %v4747_v31  ;;  %v5998_v40 = vadd.f32 %v2266_v37, %v7409_v6  ;;  %v2268_v41 = vpop.f32.mrb[86].mxu1 }
 0x285   : > { %v4352_v42 = vpop.f32.mrb[86].mxu0  ;;  %v5997_v43 = vadd.f32 %v5996_v36, %v4348_v35  ;;  %v6000_v44 = vadd.f32 %v2268_v41, %v7407_v5  ;;  %v2270_v45 = vpop.f32.mrb[87].mxu1 }
 0x286   : > { %v4354_v46 = vpop.f32.mrb[87].mxu0  ;;  %5090 = vst [vmem:[%s7419_s26 + $0x148] sm:$0xff] %v5821_v39  ;;  %v5999_v47 = vadd.f32 %v5998_v40, %v4350_v38  ;;  %v6002_v48 = vadd.f32 %v2270_v45, %v7409_v6 }
 0x287   : > { %v4749_v49 = vmax.f32 %v5997_v43, 0.0  ;;  %v6001_v50 = vadd.f32 %v6000_v44, %v4352_v42 }
 0x288   : > { %v4750_v51 = vmax.f32 %v5999_v47, 0.0  ;;  %v6003_v52 = vadd.f32 %v6002_v48, %v4354_v46 }
 0x289   : > { %v4751_v53 = vmax.f32 %v6001_v50, 0.0 }
 0x28a   : > { %v5822_v54 = vpack.c.bf16 %v4750_v51, %v4749_v49  ;;  %v4752_v55 = vmax.f32 %v6003_v52, 0.0  ;;  %v2274_v56 = vpop.f32.mrb[88].mxu1 }
 0x28b   : > { %v4358_v57 = vpop.f32.mrb[88].mxu0  ;;  %v6004_v58 = vadd.f32 %v2274_v56, %v7407_v5  ;;  %v2276_v59 = vpop.f32.mrb[89].mxu1 }
 0x28c   : > { %v4360_v60 = vpop.f32.mrb[89].mxu0  ;;  %5091 = vst [vmem:[%s7419_s26 + $0x150] sm:$0xff] %v5822_v54  ;;  %v5823_v61 = vpack.c.bf16 %v4752_v55, %v4751_v53  ;;  %v6006_v62 = vadd.f32 %v2276_v59, %v7409_v6  ;;  %v2278_v63 = vpop.f32.mrb[90].mxu1 }
 0x28d   : > { %v4362_v0 = vpop.f32.mrb[90].mxu0  ;;  %v6005_v1 = vadd.f32 %v6004_v58, %v4358_v57  ;;  %v6008_v2 = vadd.f32 %v2278_v63, %v7407_v5  ;;  %v2280_v3 = vpop.f32.mrb[91].mxu1 }
 0x28e   : > { %v4364_v4 = vpop.f32.mrb[91].mxu0  ;;  %5092 = vst [vmem:[%s7419_s26 + $0x158] sm:$0xff] %v5823_v61  ;;  %v6007_v7 = vadd.f32 %v6006_v62, %v4360_v60  ;;  %v6010_v8 = vadd.f32 %v2280_v3, %v7409_v6 }
 0x28f   : > { %v4753_v9 = vmax.f32 %v6005_v1, 0.0  ;;  %v6009_v10 = vadd.f32 %v6008_v2, %v4362_v0 }
 0x290   : > { %v4754_v11 = vmax.f32 %v6007_v7, 0.0  ;;  %v6011_v12 = vadd.f32 %v6010_v8, %v4364_v4 }
 0x291   : > { %v4755_v13 = vmax.f32 %v6009_v10, 0.0 }
 0x292   : > { %v5824_v14 = vpack.c.bf16 %v4754_v11, %v4753_v9  ;;  %v4756_v15 = vmax.f32 %v6011_v12, 0.0  ;;  %v2284_v16 = vpop.f32.mrb[92].mxu1 }
 0x293   : > { %v4368_v17 = vpop.f32.mrb[92].mxu0  ;;  %v6012_v18 = vadd.f32 %v2284_v16, %v7407_v5  ;;  %v2286_v19 = vpop.f32.mrb[93].mxu1 }
 0x294   : > { %v4370_v20 = vpop.f32.mrb[93].mxu0  ;;  %5093 = vst [vmem:[%s7419_s26 + $0x160] sm:$0xff] %v5824_v14  ;;  %v5825_v21 = vpack.c.bf16 %v4756_v15, %v4755_v13  ;;  %v6014_v22 = vadd.f32 %v2286_v19, %v7409_v6  ;;  %v2288_v23 = vpop.f32.mrb[94].mxu1 }
 0x295   : > { %v4372_v24 = vpop.f32.mrb[94].mxu0  ;;  %v6013_v25 = vadd.f32 %v6012_v18, %v4368_v17  ;;  %v6016_v26 = vadd.f32 %v2288_v23, %v7407_v5  ;;  %v2290_v27 = vpop.f32.mrb[95].mxu1 }
 0x296   : > { %v4374_v28 = vpop.f32.mrb[95].mxu0  ;;  %5094 = vst [vmem:[%s7419_s26 + $0x168] sm:$0xff] %v5825_v21  ;;  %v6015_v29 = vadd.f32 %v6014_v22, %v4370_v20  ;;  %v6018_v30 = vadd.f32 %v2290_v27, %v7409_v6 }
 0x297   : > { %v4757_v31 = vmax.f32 %v6013_v25, 0.0  ;;  %v6017_v32 = vadd.f32 %v6016_v26, %v4372_v24 }
 0x298   : > { %v4758_v33 = vmax.f32 %v6015_v29, 0.0  ;;  %v6019_v34 = vadd.f32 %v6018_v30, %v4374_v28 }
 0x299   : > { %v4759_v35 = vmax.f32 %v6017_v32, 0.0 }
 0x29a   : > { %v5826_v36 = vpack.c.bf16 %v4758_v33, %v4757_v31  ;;  %v4760_v37 = vmax.f32 %v6019_v34, 0.0 }
 0x29c   : > { %5095 = vst [vmem:[%s7419_s26 + $0x170] sm:$0xff] %v5826_v36  ;;  %v5827_v38 = vpack.c.bf16 %v4760_v37, %v4759_v35 }
 0x29e   : > { %5096 = vst [vmem:[%s7419_s26 + $0x178] sm:$0xff] %v5827_v38 }
 0x29f PF: > { %s16_s23 = sadd.s32 1, %s6739_s23   ;;  %s7577_s21 = smov %s6735_s22 }
 0x2a0   : > { %p13_p5 = scmp.ge.s32.totalorder %s16_s23, 4   ;;  %s7578_s22 = smov %s7580_s24 }
 0x2a2   :  { %15 = sbr.rel (!%p13_p5) target bundleno = 2 (0x2), region = 92 }

// kernel: aspp_modulated_deformable_c3d.5
= control target key start
LH: loop header
LB: loop body
LE: loop exit
PB: predicated region body
PF: predicated region fallthrough
CT: control target
= control target key end

     0   :  { %s1525_s12 = smov 0   ;;  %s1527_s13 = smov 0   ;;  %s1880_s0 = inlined_call_operand.vmem [shape: bf16[768,108], index: 0, kind: input, shape index: {}]   ;;  %s1881_s1 = inlined_call_operand.vmem [shape: bf16[108,8], index: 1, kind: input, shape index: {}]   ;;  %s1882_s2 = inlined_call_operand.vmem [shape: f32[1,8], index: 2, kind: input, shape index: {}]   ;;  %s1883_s3 = inlined_call_operand.vmem [shape: f32[768,8], index: 3, kind: output, shape index: {}]  }
   0x1   :  { %s1529_s14 = smov 0  }
   0x2 LB: > { %s32_s15 = sadd.s32 1, %s1498_s13  ;;  %p1254_p0 = scmp.ge.s32.totalorder %s1502_s14, 1  ;;  %s1502_s14 = sphi %s1529_s14, %s13_s14   ;;  %s1498_s13 = sphi %s1527_s13, %s1885_s13   ;;  %s1494_s12 = sphi %s1525_s12, %s1884_s12  }
   0x3   : > { %p34_p1 = scmp.ge.s32.totalorder %s32_s15, 2  ;;  %p188_p2 = scmp.lt.s32.totalorder %s1502_s14, 3 }
   0x5   : > { %s1887_s15 = smov (%p34_p1, %s32_s15), 0  ;;  %p189_p3 = pnand %p1254_p0, %p188_p2 }
   0x6   : > { %v1449_v0 = vld [vmem:[%s1881_s1] sm:$0xff] (!%p189_p3)   ;;  %v1450_v1 = vld [vmem:[%s1881_s1 + $0x8] sm:$0xff] (!%p189_p3)   ;;  %s229_s20 = smul.u32 (!%p189_p3), 48, %s1494_s12  ;;  %v1451_v2 = vld [vmem:[%s1881_s1 + $0x10] sm:$0xff] (!%p189_p3)   ;;  %vm264_vm0 = vcmask (!%p189_p3), 64512   ;;  %v1504_v4 = vmov (!%p189_p3), 0.0  }
   0x7   : > { %192 = sbr.rel (%p189_p3) target bundleno = 306 (0x132), region = 32  ;;  %1346 = vmatprep.subr.bf16.mxu0 (!%p189_p3), %v1449_v0  ;;  %1408 = vmatprep.subr.bf16.mxu1 (!%p189_p3), %v1449_v0  ;;  %v1452_v3 = vld [vmem:[%s1881_s1 + $0x18] sm:$0xff] (!%p189_p3)   ;;  %267 = vst.msk [vmem:[#allocation2 + $0x10] sm:$0xff] (!%p189_p3), %vm264_vm0, %v1504_v4  ;;  %265 = vst.msk [vmem:[#allocation2] sm:$0xff] (!%p189_p3), %vm264_vm0, %v1504_v4  ;;  %vm584_vm1 = vcmask (!%p189_p3), 883712   ;;  %v1453_v7 = vld [vmem:[%s1881_s1 + $0x20] sm:$0xff] (!%p189_p3)  }
   0x8   : > { %1347 = vmatpush3.bf16.msra.mxu0 (!%p189_p3), %v1449_v0  ;;  %1415 = vmatpush3.bf16.msra.mxu1 (!%p189_p3), %v1449_v0  ;;  %p230_p4 = scmp.lt.s32.totalorder (!%p189_p3), %s229_s20, 95  ;;  %266 = vst.msk [vmem:[#allocation2 + $0x8] sm:$0xff] (!%p189_p3), %vm264_vm0, %v1504_v4  ;;  %268 = vst.msk [vmem:[#allocation2 + $0x18] sm:$0xff] (!%p189_p3), %vm264_vm0, %v1504_v4  ;;  %v1454_v8 = vld [vmem:[%s1881_s1 + $0x28] sm:$0xff] (!%p189_p3)   ;;  %v1455_v9 = vld [vmem:[%s1881_s1 + $0x30] sm:$0x3f] (!%p189_p3)  }
   0x9   : > { %1348 = vmatprep.subr.bf16.mxu0 (!%p189_p3), %v1450_v1  ;;  %1409 = vmatprep.subr.bf16.mxu1 (!%p189_p3), %v1450_v1  ;;  %269 = vst.msk [vmem:[#allocation2 + $0x20] sm:$0xff] (!%p189_p3), %vm264_vm0, %v1504_v4  ;;  %270 = vst.msk [vmem:[#allocation2 + $0x28] sm:$0xff] (!%p189_p3), %vm264_vm0, %v1504_v4  ;;  %vm657_vm2 = vcmask (!%p189_p3), 1045504   ;;  %v1680_v61 = vld [vmem:[%s1882_s2] ss:$0 sm:$0xff] (!%p189_p3) }
   0xa   : > { %271 = vst.msk [vmem:[#allocation2 + $0x30] sm:$0xff] (!%p189_p3), %vm264_vm0, %v1504_v4  ;;  %272 = vst.msk [vmem:[#allocation2 + $0x38] sm:$0xff] (!%p189_p3), %vm264_vm0, %v1504_v4  ;;  %v659_v10 = vsel (!%p189_p3), %vm657_vm2, %v1455_v9, 0 }
   0xb   : > { %273 = vst.msk [vmem:[#allocation2 + $0x40] sm:$0xff] (!%p189_p3), %vm264_vm0, %v1504_v4  ;;  %274 = vst.msk [vmem:[#allocation2 + $0x48] sm:$0xff] (!%p189_p3), %vm264_vm0, %v1504_v4 }
   0xc   : > { %1349 = vmatpush3.bf16.msra.mxu0 (!%p189_p3), %v1450_v1  ;;  %1416 = vmatpush3.bf16.msra.mxu1 (!%p189_p3), %v1450_v1  ;;  %275 = vst.msk [vmem:[#allocation2 + $0x50] sm:$0xff] (!%p189_p3), %vm264_vm0, %v1504_v4  ;;  %276 = vst.msk [vmem:[#allocation2 + $0x58] sm:$0xff] (!%p189_p3), %vm264_vm0, %v1504_v4 }
   0xd   : > { %1350 = vmatprep.subr.bf16.mxu0 (!%p189_p3), %v1451_v2  ;;  %1410 = vmatprep.subr.bf16.mxu1 (!%p189_p3), %v1451_v2  ;;  %277 = vst.msk [vmem:[#allocation2 + $0x60] sm:$0xff] (!%p189_p3), %vm264_vm0, %v1504_v4  ;;  %278 = vst.msk [vmem:[#allocation2 + $0x68] sm:$0xff] (!%p189_p3), %vm264_vm0, %v1504_v4 }
   0xe   : > { %s1889_s20 = smov (!%p230_p4, %s229_s20), 95  ;;  %279 = vst.msk [vmem:[#allocation2 + $0x70] sm:$0xff] %vm264_vm0, %v1504_v4  ;;  %280 = vst.msk [vmem:[#allocation2 + $0x78] sm:$0xff] %vm264_vm0, %v1504_v4  ;;  %v315_v33 = vld [vmem:[#allocation2 + $0x10] sm:$0xff]  ;;  %v313_v35 = vld [vmem:[#allocation2] sm:$0xff] }
   0xf   : > { %s1255_s23 = sshll.u32 %s1889_s20, 2  ;;  %281 = vst.msk [vmem:[#allocation2 + $0x80] sm:$0xff] %vm264_vm0, %v1504_v4  ;;  %282 = vst.msk [vmem:[#allocation2 + $0x88] sm:$0xff] %vm264_vm0, %v1504_v4  ;;  %v316_v39 = vld [vmem:[#allocation2 + $0x18] sm:$0xff]  ;;  %v314_v45 = vld [vmem:[#allocation2 + $0x8] sm:$0xff]  ;;  %s1256_s8 = sshll.u32 %s1889_s20, 3 }
  0x10   : > { %s1561_s28 = scalar_lea.vmem %s1880_s0, %s1255_s23  ;;  %283 = vst.msk [vmem:[#allocation2 + $0x90] sm:$0xff] %vm264_vm0, %v1504_v4  ;;  %284 = vst.msk [vmem:[#allocation2 + $0x98] sm:$0xff] %vm264_vm0, %v1504_v4  ;;  %1351 = vmatpush3.bf16.msra.mxu0 %v1451_v2  ;;  %1417 = vmatpush3.bf16.msra.mxu1 %v1451_v2  ;;  %v317_v59 = vld [vmem:[#allocation2 + $0x20] sm:$0xff]  ;;  %s1685_s16 = scalar_lea.vmem %s1883_s3, %s1256_s8 }
  0x11   : > { %285 = vst.msk [vmem:[#allocation2 + $0xa0] sm:$0xff] %vm264_vm0, %v1504_v4  ;;  %286 = vst.msk [vmem:[#allocation2 + $0xa8] sm:$0xff] %vm264_vm0, %v1504_v4  ;;  %v1456_v5 = vld [vmem:[%s1561_s28] sm:$0xff]   ;;  %1352 = vmatprep.subr.bf16.mxu0 %v1452_v3  ;;  %1411 = vmatprep.subr.bf16.mxu1 %v1452_v3  ;;  %v1458_v11 = vld [vmem:[%s1561_s28 + $0x8] sm:$0xff]  }
  0x12   : > { %287 = vst.msk [vmem:[#allocation2 + $0xb0] sm:$0xff] %vm264_vm0, %v1504_v4  ;;  %288 = vst.msk [vmem:[#allocation2 + $0xb8] sm:$0xff] %vm264_vm0, %v1504_v4  ;;  %v1457_v6 = vld [vmem:[%s1561_s28 + $0x60] sm:$0xff]   ;;  %1360 = vmatprep.mubr.msk.bf16.mxu0 %vm584_vm1, %v1456_v5  ;;  %v1459_v12 = vld [vmem:[%s1561_s28 + $0x68] sm:$0xff]  }
  0x13   : > { %289 = vst.msk [vmem:[#allocation2 + $0xc0] sm:$0xff] %vm264_vm0, %v1504_v4  ;;  %290 = vst.msk [vmem:[#allocation2 + $0xc8] sm:$0xff] %vm264_vm0, %v1504_v4  ;;  %1384 = vmatprep.mubr.msk.bf16.mxu1 %vm584_vm1, %v1457_v6  ;;  %v1460_v13 = vld [vmem:[%s1561_s28 + $0x10] sm:$0xff]   ;;  %v1462_v15 = vld [vmem:[%s1561_s28 + $0x18] sm:$0xff]  }
  0x14   : > { %291 = vst.msk [vmem:[#allocation2 + $0xd0] sm:$0xff] %vm264_vm0, %v1504_v4  ;;  %292 = vst.msk [vmem:[#allocation2 + $0xd8] sm:$0xff] %vm264_vm0, %v1504_v4  ;;  %1353 = vmatpush3.bf16.msra.mxu0 %v1452_v3  ;;  %1418 = vmatpush3.bf16.msra.mxu1 %v1452_v3  ;;  %v1461_v14 = vld [vmem:[%s1561_s28 + $0x70] sm:$0xff]   ;;  %v1463_v16 = vld [vmem:[%s1561_s28 + $0x78] sm:$0xff]  }
  0x15   : > { %293 = vst.msk [vmem:[#allocation2 + $0xe0] sm:$0xff] %vm264_vm0, %v1504_v4  ;;  %294 = vst.msk [vmem:[#allocation2 + $0xe8] sm:$0xff] %vm264_vm0, %v1504_v4  ;;  %1354 = vmatprep.subr.bf16.mxu0 %v1453_v7  ;;  %1412 = vmatprep.subr.bf16.mxu1 %v1453_v7  ;;  %v1464_v17 = vld [vmem:[%s1561_s28 + $0x20] sm:$0xff]   ;;  %v1466_v19 = vld [vmem:[%s1561_s28 + $0x28] sm:$0xff]  }
  0x16   : > { %295 = vst.msk [vmem:[#allocation2 + $0xf0] sm:$0xff] %vm264_vm0, %v1504_v4  ;;  %296 = vst.msk [vmem:[#allocation2 + $0xf8] sm:$0xff] %vm264_vm0, %v1504_v4  ;;  %v1465_v18 = vld [vmem:[%s1561_s28 + $0x80] sm:$0xff]   ;;  %v1467_v20 = vld [vmem:[%s1561_s28 + $0x88] sm:$0xff]  }
  0x17   : > { %297 = vst.msk [vmem:[#allocation2 + $0x100] sm:$0xff] %vm264_vm0, %v1504_v4  ;;  %298 = vst.msk [vmem:[#allocation2 + $0x108] sm:$0xff] %vm264_vm0, %v1504_v4  ;;  %v1468_v21 = vld [vmem:[%s1561_s28 + $0x30] sm:$0xff]   ;;  %v1470_v23 = vld [vmem:[%s1561_s28 + $0x38] sm:$0xff]  }
  0x18   : > { %299 = vst.msk [vmem:[#allocation2 + $0x110] sm:$0xff] %vm264_vm0, %v1504_v4  ;;  %300 = vst.msk [vmem:[#allocation2 + $0x118] sm:$0xff] %vm264_vm0, %v1504_v4  ;;  %1355 = vmatpush3.bf16.msra.mxu0 %v1453_v7  ;;  %1419 = vmatpush3.bf16.msra.mxu1 %v1453_v7  ;;  %v1469_v22 = vld [vmem:[%s1561_s28 + $0x90] sm:$0xff]   ;;  %v1471_v24 = vld [vmem:[%s1561_s28 + $0x98] sm:$0xff]  }
  0x19   : > { %301 = vst.msk [vmem:[#allocation2 + $0x120] sm:$0xff] %vm264_vm0, %v1504_v4  ;;  %302 = vst.msk [vmem:[#allocation2 + $0x128] sm:$0xff] %vm264_vm0, %v1504_v4  ;;  %1356 = vmatprep.subr.bf16.mxu0 %v1454_v8  ;;  %1413 = vmatprep.subr.bf16.mxu1 %v1454_v8  ;;  %v1472_v25 = vld [vmem:[%s1561_s28 + $0x40] sm:$0xff]   ;;  %v1474_v27 = vld [vmem:[%s1561_s28 + $0x48] sm:$0xff]  }
  0x1a   : > { %303 = vst.msk [vmem:[#allocation2 + $0x130] sm:$0xff] %vm264_vm0, %v1504_v4  ;;  %304 = vst.msk [vmem:[#allocation2 + $0x138] sm:$0xff] %vm264_vm0, %v1504_v4  ;;  %v1473_v26 = vld [vmem:[%s1561_s28 + $0xa0] sm:$0xff]   ;;  %v1475_v28 = vld [vmem:[%s1561_s28 + $0xa8] sm:$0xff]  }
  0x1b   : > { %305 = vst.msk [vmem:[#allocation2 + $0x140] sm:$0xff] %vm264_vm0, %v1504_v4  ;;  %306 = vst.msk [vmem:[#allocation2 + $0x148] sm:$0xff] %vm264_vm0, %v1504_v4  ;;  %v1476_v29 = vld [vmem:[%s1561_s28 + $0x50] sm:$0xff]   ;;  %v1478_v31 = vld [vmem:[%s1561_s28 + $0x58] sm:$0xff]  }
  0x1c   : > { %307 = vst.msk [vmem:[#allocation2 + $0x150] sm:$0xff] %vm264_vm0, %v1504_v4  ;;  %308 = vst.msk [vmem:[#allocation2 + $0x158] sm:$0xff] %vm264_vm0, %v1504_v4  ;;  %1357 = vmatpush3.bf16.msra.mxu0 %v1454_v8  ;;  %1420 = vmatpush3.bf16.msra.mxu1 %v1454_v8  ;;  %v1477_v30 = vld [vmem:[%s1561_s28 + $0xb0] sm:$0xff]   ;;  %v1479_v32 = vld [vmem:[%s1561_s28 + $0xb8] sm:$0xff]  }
  0x1d   : > { %309 = vst.msk [vmem:[#allocation2 + $0x160] sm:$0xff] %vm264_vm0, %v1504_v4  ;;  %310 = vst.msk [vmem:[#allocation2 + $0x168] sm:$0xff] %vm264_vm0, %v1504_v4  ;;  %1422 = vmatprep.subr.msk.bf16.mxu0 %vm657_vm2, %v1455_v9  ;;  %1423 = vmatprep.subr.msk.bf16.mxu1 %vm657_vm2, %v1455_v9  ;;  %v339_v34 = vld [vmem:[#allocation2 + $0xd0] sm:$0xff]  ;;  %v337_v36 = vld [vmem:[#allocation2 + $0xc0] sm:$0xff] }
  0x1e   : > { %311 = vst.msk [vmem:[#allocation2 + $0x170] sm:$0xff] %vm264_vm0, %v1504_v4  ;;  %312 = vst.msk [vmem:[#allocation2 + $0x178] sm:$0xff] %vm264_vm0, %v1504_v4  ;;  %v340_v40 = vld [vmem:[#allocation2 + $0xd8] sm:$0xff]  ;;  %v338_v46 = vld [vmem:[#allocation2 + $0xc8] sm:$0xff] }
  0x1f   : > { %v319_v57 = vld [vmem:[#allocation2 + $0x30] sm:$0xff]  ;;  %v341_v60 = vld [vmem:[#allocation2 + $0xe0] sm:$0xff]  ;;  %v320_v0 = vld [vmem:[#allocation2 + $0x38] sm:$0xff] }
  0x20   : > { %1359 = vmatpush3.bf16.msra.mxu0 %v659_v10  ;;  %1421 = vmatpush3.bf16.msra.mxu1 %v659_v10  ;;  %v343_v58 = vld [vmem:[#allocation2 + $0xf0] sm:$0xff]  ;;  %v344_v1 = vld [vmem:[#allocation2 + $0xf8] sm:$0xff]  ;;  %v318_v6 = vld [vmem:[#allocation2 + $0x28] sm:$0xff] }
  0x21   : > { %v342_v7 = vld [vmem:[#allocation2 + $0xe8] sm:$0xff] }
  0x23   : > { %1361 = vmatmul.mubr.msk.bf16.vlgmr.msra.gmra.mrb[0].mxu0 %vm584_vm1, %v1458_v11  ;;  %1385 = vmatmul.mubr.msk.bf16.vlgmr.msra.gmra.mrb[0].mxu1 %vm584_vm1, %v1459_v12 }
  0x24   : > { %1364 = vmatprep.mubr.msk.bf16.mxu0 %vm584_vm1, %v1460_v13  ;;  %1388 = vmatprep.mubr.msk.bf16.mxu1 %vm584_vm1, %v1461_v14 }
  0x2b   : > { %1365 = vmatmul.mubr.msk.bf16.gmra.mrb[4].mxu0 %vm584_vm1, %v1462_v15  ;;  %1389 = vmatmul.mubr.msk.bf16.gmra.mrb[4].mxu1 %vm584_vm1, %v1463_v16 }
  0x2c   : > { %1368 = vmatprep.mubr.msk.bf16.mxu0 %vm584_vm1, %v1464_v17  ;;  %1392 = vmatprep.mubr.msk.bf16.mxu1 %vm584_vm1, %v1465_v18 }
  0x33   : > { %1369 = vmatmul.mubr.msk.bf16.gmra.mrb[8].mxu0 %vm584_vm1, %v1466_v19  ;;  %1393 = vmatmul.mubr.msk.bf16.gmra.mrb[8].mxu1 %vm584_vm1, %v1467_v20 }
  0x34   : > { %1372 = vmatprep.mubr.msk.bf16.mxu0 %vm584_vm1, %v1468_v21  ;;  %1396 = vmatprep.mubr.msk.bf16.mxu1 %vm584_vm1, %v1469_v22 }
  0x3b   : > { %1373 = vmatmul.mubr.msk.bf16.gmra.mrb[12].mxu0 %vm584_vm1, %v1470_v23  ;;  %1397 = vmatmul.mubr.msk.bf16.gmra.mrb[12].mxu1 %vm584_vm1, %v1471_v24 }
  0x3c   : > { %1376 = vmatprep.mubr.msk.bf16.mxu0 %vm584_vm1, %v1472_v25  ;;  %1400 = vmatprep.mubr.msk.bf16.mxu1 %vm584_vm1, %v1473_v26 }
  0x43   : > { %1377 = vmatmul.mubr.msk.bf16.gmra.mrb[16].mxu0 %vm584_vm1, %v1474_v27  ;;  %1401 = vmatmul.mubr.msk.bf16.gmra.mrb[16].mxu1 %vm584_vm1, %v1475_v28 }
  0x44   : > { %1380 = vmatprep.mubr.msk.bf16.mxu0 %vm584_vm1, %v1476_v29  ;;  %1404 = vmatprep.mubr.msk.bf16.mxu1 %vm584_vm1, %v1477_v30 }
  0x4b   : > { %1381 = vmatmul.mubr.msk.bf16.gmra.mrb[20].mxu0 %vm584_vm1, %v1478_v31  ;;  %1405 = vmatmul.mubr.msk.bf16.gmra.mrb[20].mxu1 %vm584_vm1, %v1479_v32 }
  0xf6   : > { %v1362_v37 = vpop.f32.mrb[0].mxu0  ;;  %v1386_v38 = vpop.f32.mrb[0].mxu1 }
  0xf7   : > { %v888_v41 = vadd.f32 %v1362_v37, %v315_v33  ;;  %v912_v42 = vadd.f32 %v1386_v38, %v339_v34  ;;  %v695_v43 = vpop.f32.mrb[1].mxu0  ;;  %v791_v44 = vpop.f32.mrb[1].mxu1  ;;  %v323_v34 = vld [vmem:[#allocation2 + $0x50] sm:$0xff]  ;;  %v345_v37 = vld [vmem:[#allocation2 + $0x100] sm:$0xff] }
  0xf8   : > { %v886_v47 = vadd.f32 %v695_v43, %v313_v35  ;;  %v910_v48 = vadd.f32 %v791_v44, %v337_v36  ;;  %v1363_v49 = vpop.f32.mrb[2].mxu0  ;;  %v1387_v50 = vpop.f32.mrb[2].mxu1  ;;  %v347_v35 = vld [vmem:[#allocation2 + $0x110] sm:$0xff]  ;;  %v321_v36 = vld [vmem:[#allocation2 + $0x40] sm:$0xff] }
  0xf9   : > { %937 = vst.msk [vmem:[#allocation2 + $0x10] sm:$0xff] %vm264_vm0, %v888_v41  ;;  %961 = vst.msk [vmem:[#allocation2 + $0xd0] sm:$0xff] %vm264_vm0, %v912_v42  ;;  %v889_v51 = vadd.f32 %v1363_v49, %v316_v39  ;;  %v913_v52 = vadd.f32 %v1387_v50, %v340_v40  ;;  %v698_v53 = vpop.f32.mrb[3].mxu0  ;;  %v794_v54 = vpop.f32.mrb[3].mxu1  ;;  %v324_v40 = vld [vmem:[#allocation2 + $0x58] sm:$0xff] }
  0xfa   : > { %935 = vst.msk [vmem:[#allocation2] sm:$0xff] %vm264_vm0, %v886_v47  ;;  %959 = vst.msk [vmem:[#allocation2 + $0xc0] sm:$0xff] %vm264_vm0, %v910_v48  ;;  %v887_v55 = vadd.f32 %v698_v53, %v314_v45  ;;  %v911_v56 = vadd.f32 %v794_v54, %v338_v46  ;;  %v348_v41 = vld [vmem:[#allocation2 + $0x118] sm:$0xff]  ;;  %v322_v46 = vld [vmem:[#allocation2 + $0x48] sm:$0xff] }
  0xfb   : > { %938 = vst.msk [vmem:[#allocation2 + $0x18] sm:$0xff] %vm264_vm0, %v889_v51  ;;  %962 = vst.msk [vmem:[#allocation2 + $0xd8] sm:$0xff] %vm264_vm0, %v913_v52  ;;  %v346_v47 = vld [vmem:[#allocation2 + $0x108] sm:$0xff] }
  0xfc   : > { %936 = vst.msk [vmem:[#allocation2 + $0x8] sm:$0xff] %vm264_vm0, %v887_v55  ;;  %960 = vst.msk [vmem:[#allocation2 + $0xc8] sm:$0xff] %vm264_vm0, %v911_v56 }
  0xfe   : > { %v1366_v62 = vpop.f32.mrb[4].mxu0  ;;  %v1390_v63 = vpop.f32.mrb[4].mxu1 }
  0xff   : > { %v892_v2 = vadd.f32 %v1366_v62, %v319_v57  ;;  %v916_v3 = vadd.f32 %v1390_v63, %v343_v58  ;;  %v711_v4 = vpop.f32.mrb[5].mxu0  ;;  %v807_v5 = vpop.f32.mrb[5].mxu1 }
 0x100   : > { %v988_v8 = vld [vmem:[#allocation2 + $0x10] sm:$0xff]  ;;  %v890_v10 = vadd.f32 %v711_v4, %v317_v59  ;;  %v914_v11 = vadd.f32 %v807_v5, %v341_v60  ;;  %v1367_v12 = vpop.f32.mrb[6].mxu0  ;;  %v1391_v13 = vpop.f32.mrb[6].mxu1 }
 0x101   : > { %v1012_v9 = vld [vmem:[#allocation2 + $0xd0] sm:$0xff]  ;;  %v1043_v14 = vadd.f32 %v1680_v61, %v988_v8  ;;  %v986_v16 = vld [vmem:[#allocation2] sm:$0xff]  ;;  %941 = vst.msk [vmem:[#allocation2 + $0x30] sm:$0xff] %vm264_vm0, %v892_v2  ;;  %965 = vst.msk [vmem:[#allocation2 + $0xf0] sm:$0xff] %vm264_vm0, %v916_v3  ;;  %v893_v18 = vadd.f32 %v1367_v12, %v320_v0  ;;  %v917_v19 = vadd.f32 %v1391_v13, %v344_v1  ;;  %v714_v20 = vpop.f32.mrb[7].mxu0  ;;  %v810_v21 = vpop.f32.mrb[7].mxu1 }
 0x102   : > { %v1067_v15 = vadd.f32 %v1680_v61, %v1012_v9  ;;  %v1010_v17 = vld [vmem:[#allocation2 + $0xc0] sm:$0xff]  ;;  %v1041_v22 = vadd.f32 %v1680_v61, %v986_v16  ;;  %v989_v24 = vld [vmem:[#allocation2 + $0x18] sm:$0xff]  ;;  %939 = vst.msk [vmem:[#allocation2 + $0x20] sm:$0xff] %vm264_vm0, %v890_v10  ;;  %963 = vst.msk [vmem:[#allocation2 + $0xe0] sm:$0xff] %vm264_vm0, %v914_v11  ;;  %v891_v26 = vadd.f32 %v714_v20, %v318_v6 }
 0x103   : > { %v1065_v23 = vadd.f32 %v1680_v61, %v1010_v17  ;;  %v1013_v25 = vld [vmem:[#allocation2 + $0xd8] sm:$0xff]  ;;  %v915_v27 = vadd.f32 %v810_v21, %v342_v7  ;;  %1091 = vst.msk [vmem:[%s1685_s16 + $0x10] sm:$0xff] %vm264_vm0, %v1043_v14  ;;  %v1044_v28 = vadd.f32 %v1680_v61, %v989_v24  ;;  %v987_v30 = vld [vmem:[#allocation2 + $0x8] sm:$0xff]  ;;  %942 = vst.msk [vmem:[#allocation2 + $0x38] sm:$0xff] %vm264_vm0, %v893_v18 }
 0x104   : > { %1115 = vst.msk [vmem:[%s1685_s16 + $0xd0] sm:$0xff] %vm264_vm0, %v1067_v15  ;;  %v1068_v29 = vadd.f32 %v1680_v61, %v1013_v25  ;;  %v1011_v31 = vld [vmem:[#allocation2 + $0xc8] sm:$0xff]  ;;  %966 = vst.msk [vmem:[#allocation2 + $0xf8] sm:$0xff] %vm264_vm0, %v917_v19  ;;  %v1042_v32 = vadd.f32 %v1680_v61, %v987_v30  ;;  %v327_v11 = vld [vmem:[#allocation2 + $0x70] sm:$0xff] }
 0x105   : > { %1089 = vst.msk [vmem:[%s1685_s16] sm:$0xff] %vm264_vm0, %v1041_v22  ;;  %1113 = vst.msk [vmem:[%s1685_s16 + $0xc0] sm:$0xff] %vm264_vm0, %v1065_v23  ;;  %v1066_v33 = vadd.f32 %v1680_v61, %v1011_v31  ;;  %v351_v12 = vld [vmem:[#allocation2 + $0x130] sm:$0xff]  ;;  %v325_v13 = vld [vmem:[#allocation2 + $0x60] sm:$0xff] }
 0x106   : > { %940 = vst.msk [vmem:[#allocation2 + $0x28] sm:$0xff] %vm264_vm0, %v891_v26  ;;  %964 = vst.msk [vmem:[#allocation2 + $0xe8] sm:$0xff] %vm264_vm0, %v915_v27  ;;  %v1370_v38 = vpop.f32.mrb[8].mxu0  ;;  %v1394_v39 = vpop.f32.mrb[8].mxu1  ;;  %v349_v14 = vld [vmem:[#allocation2 + $0x120] sm:$0xff]  ;;  %v328_v17 = vld [vmem:[#allocation2 + $0x78] sm:$0xff] }
 0x107   : > { %1092 = vst.msk [vmem:[%s1685_s16 + $0x18] sm:$0xff] %vm264_vm0, %v1044_v28  ;;  %1116 = vst.msk [vmem:[%s1685_s16 + $0xd8] sm:$0xff] %vm264_vm0, %v1068_v29  ;;  %v896_v42 = vadd.f32 %v1370_v38, %v323_v34  ;;  %v920_v43 = vadd.f32 %v1394_v39, %v347_v35  ;;  %v727_v44 = vpop.f32.mrb[9].mxu0  ;;  %v823_v45 = vpop.f32.mrb[9].mxu1  ;;  %v352_v18 = vld [vmem:[#allocation2 + $0x138] sm:$0xff]  ;;  %v326_v23 = vld [vmem:[#allocation2 + $0x68] sm:$0xff] }
 0x108   : > { %1090 = vst.msk [vmem:[%s1685_s16 + $0x8] sm:$0xff] %vm264_vm0, %v1042_v32  ;;  %1114 = vst.msk [vmem:[%s1685_s16 + $0xc8] sm:$0xff] %vm264_vm0, %v1066_v33  ;;  %v992_v48 = vld [vmem:[#allocation2 + $0x30] sm:$0xff]  ;;  %v894_v50 = vadd.f32 %v727_v44, %v321_v36  ;;  %v918_v51 = vadd.f32 %v823_v45, %v345_v37  ;;  %v1371_v52 = vpop.f32.mrb[10].mxu0  ;;  %v1395_v53 = vpop.f32.mrb[10].mxu1  ;;  %v350_v24 = vld [vmem:[#allocation2 + $0x128] sm:$0xff] }
 0x109   : > { %v1016_v49 = vld [vmem:[#allocation2 + $0xf0] sm:$0xff]  ;;  %v1047_v54 = vadd.f32 %v1680_v61, %v992_v48  ;;  %v990_v56 = vld [vmem:[#allocation2 + $0x20] sm:$0xff]  ;;  %945 = vst.msk [vmem:[#allocation2 + $0x50] sm:$0xff] %vm264_vm0, %v896_v42  ;;  %969 = vst.msk [vmem:[#allocation2 + $0x110] sm:$0xff] %vm264_vm0, %v920_v43  ;;  %v897_v58 = vadd.f32 %v1371_v52, %v324_v40  ;;  %v921_v59 = vadd.f32 %v1395_v53, %v348_v41  ;;  %v730_v60 = vpop.f32.mrb[11].mxu0  ;;  %v826_v62 = vpop.f32.mrb[11].mxu1 }
 0x10a   : > { %v1071_v55 = vadd.f32 %v1680_v61, %v1016_v49  ;;  %v1014_v57 = vld [vmem:[#allocation2 + $0xe0] sm:$0xff]  ;;  %v1045_v63 = vadd.f32 %v1680_v61, %v990_v56  ;;  %v993_v1 = vld [vmem:[#allocation2 + $0x38] sm:$0xff]  ;;  %943 = vst.msk [vmem:[#allocation2 + $0x40] sm:$0xff] %vm264_vm0, %v894_v50  ;;  %967 = vst.msk [vmem:[#allocation2 + $0x100] sm:$0xff] %vm264_vm0, %v918_v51  ;;  %v895_v3 = vadd.f32 %v730_v60, %v322_v46 }
 0x10b   : > { %v1069_v0 = vadd.f32 %v1680_v61, %v1014_v57  ;;  %v1017_v2 = vld [vmem:[#allocation2 + $0xf8] sm:$0xff]  ;;  %v919_v4 = vadd.f32 %v826_v62, %v346_v47  ;;  %1095 = vst.msk [vmem:[%s1685_s16 + $0x30] sm:$0xff] %vm264_vm0, %v1047_v54  ;;  %v1048_v5 = vadd.f32 %v1680_v61, %v993_v1  ;;  %946 = vst.msk [vmem:[#allocation2 + $0x58] sm:$0xff] %vm264_vm0, %v897_v58  ;;  %v331_v51 = vld [vmem:[#allocation2 + $0x90] sm:$0xff] }
 0x10c   : > { %1119 = vst.msk [vmem:[%s1685_s16 + $0xf0] sm:$0xff] %vm264_vm0, %v1071_v55  ;;  %v1072_v6 = vadd.f32 %v1680_v61, %v1017_v2  ;;  %970 = vst.msk [vmem:[#allocation2 + $0x118] sm:$0xff] %vm264_vm0, %v921_v59  ;;  %v355_v52 = vld [vmem:[#allocation2 + $0x150] sm:$0xff]  ;;  %v329_v53 = vld [vmem:[#allocation2 + $0x80] sm:$0xff] }
 0x10d   : > { %v991_v7 = vld [vmem:[#allocation2 + $0x28] sm:$0xff]  ;;  %1093 = vst.msk [vmem:[%s1685_s16 + $0x20] sm:$0xff] %vm264_vm0, %v1045_v63  ;;  %1117 = vst.msk [vmem:[%s1685_s16 + $0xe0] sm:$0xff] %vm264_vm0, %v1069_v0  ;;  %v353_v54 = vld [vmem:[#allocation2 + $0x140] sm:$0xff] }
 0x10e   : > { %v1015_v8 = vld [vmem:[#allocation2 + $0xe8] sm:$0xff]  ;;  %v1046_v9 = vadd.f32 %v1680_v61, %v991_v7  ;;  %944 = vst.msk [vmem:[#allocation2 + $0x48] sm:$0xff] %vm264_vm0, %v895_v3  ;;  %968 = vst.msk [vmem:[#allocation2 + $0x108] sm:$0xff] %vm264_vm0, %v919_v4  ;;  %v1374_v15 = vpop.f32.mrb[12].mxu0  ;;  %v1398_v16 = vpop.f32.mrb[12].mxu1  ;;  %v332_v57 = vld [vmem:[#allocation2 + $0x98] sm:$0xff] }
 0x10f   : > { %v1070_v10 = vadd.f32 %v1680_v61, %v1015_v8  ;;  %1096 = vst.msk [vmem:[%s1685_s16 + $0x38] sm:$0xff] %vm264_vm0, %v1048_v5  ;;  %1120 = vst.msk [vmem:[%s1685_s16 + $0xf8] sm:$0xff] %vm264_vm0, %v1072_v6  ;;  %v900_v19 = vadd.f32 %v1374_v15, %v327_v11  ;;  %v924_v20 = vadd.f32 %v1398_v16, %v351_v12  ;;  %v743_v21 = vpop.f32.mrb[13].mxu0  ;;  %v839_v22 = vpop.f32.mrb[13].mxu1  ;;  %v356_v58 = vld [vmem:[#allocation2 + $0x158] sm:$0xff]  ;;  %v330_v0 = vld [vmem:[#allocation2 + $0x88] sm:$0xff] }
 0x110   : > { %1094 = vst.msk [vmem:[%s1685_s16 + $0x28] sm:$0xff] %vm264_vm0, %v1046_v9  ;;  %v996_v25 = vld [vmem:[#allocation2 + $0x50] sm:$0xff]  ;;  %v898_v27 = vadd.f32 %v743_v21, %v325_v13  ;;  %v922_v28 = vadd.f32 %v839_v22, %v349_v14  ;;  %v1375_v29 = vpop.f32.mrb[14].mxu0  ;;  %v1399_v30 = vpop.f32.mrb[14].mxu1  ;;  %v354_v1 = vld [vmem:[#allocation2 + $0x148] sm:$0xff] }
 0x111   : > { %1118 = vst.msk [vmem:[%s1685_s16 + $0xe8] sm:$0xff] %vm264_vm0, %v1070_v10  ;;  %v1020_v26 = vld [vmem:[#allocation2 + $0x110] sm:$0xff]  ;;  %v1051_v31 = vadd.f32 %v1680_v61, %v996_v25  ;;  %v994_v33 = vld [vmem:[#allocation2 + $0x40] sm:$0xff]  ;;  %949 = vst.msk [vmem:[#allocation2 + $0x70] sm:$0xff] %vm264_vm0, %v900_v19  ;;  %v901_v35 = vadd.f32 %v1375_v29, %v328_v17  ;;  %v925_v36 = vadd.f32 %v1399_v30, %v352_v18  ;;  %v746_v37 = vpop.f32.mrb[15].mxu0  ;;  %v842_v38 = vpop.f32.mrb[15].mxu1 }
 0x112   : > { %v1075_v32 = vadd.f32 %v1680_v61, %v1020_v26  ;;  %v1018_v34 = vld [vmem:[#allocation2 + $0x100] sm:$0xff]  ;;  %973 = vst.msk [vmem:[#allocation2 + $0x130] sm:$0xff] %vm264_vm0, %v924_v20  ;;  %v1049_v39 = vadd.f32 %v1680_v61, %v994_v33  ;;  %v997_v41 = vld [vmem:[#allocation2 + $0x58] sm:$0xff]  ;;  %947 = vst.msk [vmem:[#allocation2 + $0x60] sm:$0xff] %vm264_vm0, %v898_v27  ;;  %v899_v43 = vadd.f32 %v746_v37, %v326_v23 }
 0x113   : > { %v1073_v40 = vadd.f32 %v1680_v61, %v1018_v34  ;;  %v1021_v42 = vld [vmem:[#allocation2 + $0x118] sm:$0xff]  ;;  %971 = vst.msk [vmem:[#allocation2 + $0x120] sm:$0xff] %vm264_vm0, %v922_v28  ;;  %v923_v44 = vadd.f32 %v842_v38, %v350_v24  ;;  %1099 = vst.msk [vmem:[%s1685_s16 + $0x50] sm:$0xff] %vm264_vm0, %v1051_v31  ;;  %v1052_v45 = vadd.f32 %v1680_v61, %v997_v41  ;;  %v335_v28 = vld [vmem:[#allocation2 + $0xb0] sm:$0xff] }
 0x114   : > { %1123 = vst.msk [vmem:[%s1685_s16 + $0x110] sm:$0xff] %vm264_vm0, %v1075_v32  ;;  %v1076_v46 = vadd.f32 %v1680_v61, %v1021_v42  ;;  %950 = vst.msk [vmem:[#allocation2 + $0x78] sm:$0xff] %vm264_vm0, %v901_v35  ;;  %v359_v29 = vld [vmem:[#allocation2 + $0x170] sm:$0xff]  ;;  %v333_v30 = vld [vmem:[#allocation2 + $0xa0] sm:$0xff] }
 0x115   : > { %v995_v47 = vld [vmem:[#allocation2 + $0x48] sm:$0xff]  ;;  %974 = vst.msk [vmem:[#allocation2 + $0x138] sm:$0xff] %vm264_vm0, %v925_v36  ;;  %1097 = vst.msk [vmem:[%s1685_s16 + $0x40] sm:$0xff] %vm264_vm0, %v1049_v39  ;;  %v357_v31 = vld [vmem:[#allocation2 + $0x160] sm:$0xff] }
 0x116   : > { %v1019_v48 = vld [vmem:[#allocation2 + $0x108] sm:$0xff]  ;;  %1121 = vst.msk [vmem:[%s1685_s16 + $0x100] sm:$0xff] %vm264_vm0, %v1073_v40  ;;  %v1050_v49 = vadd.f32 %v1680_v61, %v995_v47  ;;  %948 = vst.msk [vmem:[#allocation2 + $0x68] sm:$0xff] %vm264_vm0, %v899_v43  ;;  %v1378_v55 = vpop.f32.mrb[16].mxu0  ;;  %v1402_v56 = vpop.f32.mrb[16].mxu1  ;;  %v336_v34 = vld [vmem:[#allocation2 + $0xb8] sm:$0xff] }
 0x117   : > { %v1074_v50 = vadd.f32 %v1680_v61, %v1019_v48  ;;  %972 = vst.msk [vmem:[#allocation2 + $0x128] sm:$0xff] %vm264_vm0, %v923_v44  ;;  %1100 = vst.msk [vmem:[%s1685_s16 + $0x58] sm:$0xff] %vm264_vm0, %v1052_v45  ;;  %v904_v59 = vadd.f32 %v1378_v55, %v331_v51  ;;  %v928_v60 = vadd.f32 %v1402_v56, %v355_v52  ;;  %v759_v62 = vpop.f32.mrb[17].mxu0  ;;  %v855_v63 = vpop.f32.mrb[17].mxu1  ;;  %v360_v35 = vld [vmem:[#allocation2 + $0x178] sm:$0xff]  ;;  %v334_v40 = vld [vmem:[#allocation2 + $0xa8] sm:$0xff] }
 0x118   : > { %1124 = vst.msk [vmem:[%s1685_s16 + $0x118] sm:$0xff] %vm264_vm0, %v1076_v46  ;;  %1098 = vst.msk [vmem:[%s1685_s16 + $0x48] sm:$0xff] %vm264_vm0, %v1050_v49  ;;  %v1000_v2 = vld [vmem:[#allocation2 + $0x70] sm:$0xff]  ;;  %v902_v4 = vadd.f32 %v759_v62, %v329_v53  ;;  %v926_v5 = vadd.f32 %v855_v63, %v353_v54  ;;  %v1379_v6 = vpop.f32.mrb[18].mxu0  ;;  %v1403_v7 = vpop.f32.mrb[18].mxu1  ;;  %v358_v41 = vld [vmem:[#allocation2 + $0x168] sm:$0xff] }
 0x119   : > { %1122 = vst.msk [vmem:[%s1685_s16 + $0x108] sm:$0xff] %vm264_vm0, %v1074_v50  ;;  %v1024_v3 = vld [vmem:[#allocation2 + $0x130] sm:$0xff]  ;;  %v1055_v8 = vadd.f32 %v1680_v61, %v1000_v2  ;;  %v998_v10 = vld [vmem:[#allocation2 + $0x60] sm:$0xff]  ;;  %953 = vst.msk [vmem:[#allocation2 + $0x90] sm:$0xff] %vm264_vm0, %v904_v59  ;;  %v905_v12 = vadd.f32 %v1379_v6, %v332_v57  ;;  %v929_v13 = vadd.f32 %v1403_v7, %v356_v58  ;;  %v762_v14 = vpop.f32.mrb[19].mxu0  ;;  %v858_v15 = vpop.f32.mrb[19].mxu1 }
 0x11a   : > { %v1079_v9 = vadd.f32 %v1680_v61, %v1024_v3  ;;  %v1022_v11 = vld [vmem:[#allocation2 + $0x120] sm:$0xff]  ;;  %977 = vst.msk [vmem:[#allocation2 + $0x150] sm:$0xff] %vm264_vm0, %v928_v60  ;;  %v1053_v16 = vadd.f32 %v1680_v61, %v998_v10  ;;  %951 = vst.msk [vmem:[#allocation2 + $0x80] sm:$0xff] %vm264_vm0, %v902_v4  ;;  %v903_v20 = vadd.f32 %v762_v14, %v330_v0 }
 0x11b   : > { %v1077_v17 = vadd.f32 %v1680_v61, %v1022_v11  ;;  %v1001_v18 = vld [vmem:[#allocation2 + $0x78] sm:$0xff]  ;;  %975 = vst.msk [vmem:[#allocation2 + $0x140] sm:$0xff] %vm264_vm0, %v926_v5  ;;  %v927_v21 = vadd.f32 %v858_v15, %v354_v1  ;;  %1103 = vst.msk [vmem:[%s1685_s16 + $0x70] sm:$0xff] %vm264_vm0, %v1055_v8 }
 0x11c   : > { %v1025_v19 = vld [vmem:[#allocation2 + $0x138] sm:$0xff]  ;;  %1127 = vst.msk [vmem:[%s1685_s16 + $0x130] sm:$0xff] %vm264_vm0, %v1079_v9  ;;  %v1056_v22 = vadd.f32 %v1680_v61, %v1001_v18  ;;  %954 = vst.msk [vmem:[#allocation2 + $0x98] sm:$0xff] %vm264_vm0, %v905_v12 }
 0x11d   : > { %v1080_v23 = vadd.f32 %v1680_v61, %v1025_v19  ;;  %v999_v24 = vld [vmem:[#allocation2 + $0x68] sm:$0xff]  ;;  %978 = vst.msk [vmem:[#allocation2 + $0x158] sm:$0xff] %vm264_vm0, %v929_v13  ;;  %1101 = vst.msk [vmem:[%s1685_s16 + $0x60] sm:$0xff] %vm264_vm0, %v1053_v16 }
 0x11e   : > { %v1023_v25 = vld [vmem:[#allocation2 + $0x128] sm:$0xff]  ;;  %1125 = vst.msk [vmem:[%s1685_s16 + $0x120] sm:$0xff] %vm264_vm0, %v1077_v17  ;;  %v1054_v26 = vadd.f32 %v1680_v61, %v999_v24  ;;  %952 = vst.msk [vmem:[#allocation2 + $0x88] sm:$0xff] %vm264_vm0, %v903_v20  ;;  %v1382_v32 = vpop.f32.mrb[20].mxu0  ;;  %v1406_v33 = vpop.f32.mrb[20].mxu1 }
 0x11f   : > { %v1078_v27 = vadd.f32 %v1680_v61, %v1023_v25  ;;  %976 = vst.msk [vmem:[#allocation2 + $0x148] sm:$0xff] %vm264_vm0, %v927_v21  ;;  %1104 = vst.msk [vmem:[%s1685_s16 + $0x78] sm:$0xff] %vm264_vm0, %v1056_v22  ;;  %v908_v36 = vadd.f32 %v1382_v32, %v335_v28  ;;  %v932_v37 = vadd.f32 %v1406_v33, %v359_v29  ;;  %v775_v38 = vpop.f32.mrb[21].mxu0  ;;  %v871_v39 = vpop.f32.mrb[21].mxu1 }
 0x120   : > { %1128 = vst.msk [vmem:[%s1685_s16 + $0x138] sm:$0xff] %vm264_vm0, %v1080_v23  ;;  %1102 = vst.msk [vmem:[%s1685_s16 + $0x68] sm:$0xff] %vm264_vm0, %v1054_v26  ;;  %v1004_v42 = vld [vmem:[#allocation2 + $0x90] sm:$0xff]  ;;  %v906_v44 = vadd.f32 %v775_v38, %v333_v30  ;;  %v930_v45 = vadd.f32 %v871_v39, %v357_v31  ;;  %v1383_v46 = vpop.f32.mrb[22].mxu0  ;;  %v1407_v47 = vpop.f32.mrb[22].mxu1 }
 0x121   : > { %1126 = vst.msk [vmem:[%s1685_s16 + $0x128] sm:$0xff] %vm264_vm0, %v1078_v27  ;;  %v1028_v43 = vld [vmem:[#allocation2 + $0x150] sm:$0xff]  ;;  %v1059_v48 = vadd.f32 %v1680_v61, %v1004_v42  ;;  %v1002_v50 = vld [vmem:[#allocation2 + $0x80] sm:$0xff]  ;;  %957 = vst.msk [vmem:[#allocation2 + $0xb0] sm:$0xff] %vm264_vm0, %v908_v36  ;;  %v909_v52 = vadd.f32 %v1383_v46, %v336_v34  ;;  %v933_v53 = vadd.f32 %v1407_v47, %v360_v35  ;;  %v778_v54 = vpop.f32.mrb[23].mxu0  ;;  %v874_v55 = vpop.f32.mrb[23].mxu1 }
 0x122   : > { %v1083_v49 = vadd.f32 %v1680_v61, %v1028_v43  ;;  %v1026_v51 = vld [vmem:[#allocation2 + $0x140] sm:$0xff]  ;;  %981 = vst.msk [vmem:[#allocation2 + $0x170] sm:$0xff] %vm264_vm0, %v932_v37  ;;  %v1057_v56 = vadd.f32 %v1680_v61, %v1002_v50  ;;  %955 = vst.msk [vmem:[#allocation2 + $0xa0] sm:$0xff] %vm264_vm0, %v906_v44  ;;  %v907_v60 = vadd.f32 %v778_v54, %v334_v40 }
 0x123   : > { %v1081_v57 = vadd.f32 %v1680_v61, %v1026_v51  ;;  %v1005_v58 = vld [vmem:[#allocation2 + $0x98] sm:$0xff]  ;;  %979 = vst.msk [vmem:[#allocation2 + $0x160] sm:$0xff] %vm264_vm0, %v930_v45  ;;  %v931_v62 = vadd.f32 %v874_v55, %v358_v41  ;;  %1107 = vst.msk [vmem:[%s1685_s16 + $0x90] sm:$0xff] %vm264_vm0, %v1059_v48 }
 0x124   : > { %v1029_v59 = vld [vmem:[#allocation2 + $0x158] sm:$0xff]  ;;  %1131 = vst.msk [vmem:[%s1685_s16 + $0x150] sm:$0xff] %vm264_vm0, %v1083_v49  ;;  %v1060_v63 = vadd.f32 %v1680_v61, %v1005_v58  ;;  %958 = vst.msk [vmem:[#allocation2 + $0xb8] sm:$0xff] %vm264_vm0, %v909_v52 }
 0x125   : > { %v1084_v0 = vadd.f32 %v1680_v61, %v1029_v59  ;;  %v1003_v1 = vld [vmem:[#allocation2 + $0x88] sm:$0xff]  ;;  %982 = vst.msk [vmem:[#allocation2 + $0x178] sm:$0xff] %vm264_vm0, %v933_v53  ;;  %1105 = vst.msk [vmem:[%s1685_s16 + $0x80] sm:$0xff] %vm264_vm0, %v1057_v56 }
 0x126   : > { %v1027_v2 = vld [vmem:[#allocation2 + $0x148] sm:$0xff]  ;;  %1129 = vst.msk [vmem:[%s1685_s16 + $0x140] sm:$0xff] %vm264_vm0, %v1081_v57  ;;  %v1058_v3 = vadd.f32 %v1680_v61, %v1003_v1  ;;  %956 = vst.msk [vmem:[#allocation2 + $0xa8] sm:$0xff] %vm264_vm0, %v907_v60 }
 0x127   : > { %v1082_v4 = vadd.f32 %v1680_v61, %v1027_v2  ;;  %980 = vst.msk [vmem:[#allocation2 + $0x168] sm:$0xff] %vm264_vm0, %v931_v62  ;;  %1108 = vst.msk [vmem:[%s1685_s16 + $0x98] sm:$0xff] %vm264_vm0, %v1060_v63 }
 0x128   : > { %1132 = vst.msk [vmem:[%s1685_s16 + $0x158] sm:$0xff] %vm264_vm0, %v1084_v0  ;;  %1106 = vst.msk [vmem:[%s1685_s16 + $0x88] sm:$0xff] %vm264_vm0, %v1058_v3  ;;  %v1008_v5 = vld [vmem:[#allocation2 + $0xb0] sm:$0xff] }
 0x129   : > { %1130 = vst.msk [vmem:[%s1685_s16 + $0x148] sm:$0xff] %vm264_vm0, %v1082_v4  ;;  %v1032_v6 = vld [vmem:[#allocation2 + $0x170] sm:$0xff]  ;;  %v1063_v7 = vadd.f32 %v1680_v61, %v1008_v5  ;;  %v1006_v9 = vld [vmem:[#allocation2 + $0xa0] sm:$0xff] }
 0x12a   : > { %v1087_v8 = vadd.f32 %v1680_v61, %v1032_v6  ;;  %v1030_v10 = vld [vmem:[#allocation2 + $0x160] sm:$0xff]  ;;  %v1061_v11 = vadd.f32 %v1680_v61, %v1006_v9 }
 0x12b   : > { %v1085_v12 = vadd.f32 %v1680_v61, %v1030_v10  ;;  %v1009_v13 = vld [vmem:[#allocation2 + $0xb8] sm:$0xff]  ;;  %1111 = vst.msk [vmem:[%s1685_s16 + $0xb0] sm:$0xff] %vm264_vm0, %v1063_v7 }
 0x12c   : > { %v1033_v14 = vld [vmem:[#allocation2 + $0x178] sm:$0xff]  ;;  %1135 = vst.msk [vmem:[%s1685_s16 + $0x170] sm:$0xff] %vm264_vm0, %v1087_v8  ;;  %v1064_v15 = vadd.f32 %v1680_v61, %v1009_v13  ;;  %1109 = vst.msk [vmem:[%s1685_s16 + $0xa0] sm:$0xff] %vm264_vm0, %v1061_v11 }
 0x12d   : > { %v1088_v16 = vadd.f32 %v1680_v61, %v1033_v14  ;;  %v1007_v17 = vld [vmem:[#allocation2 + $0xa8] sm:$0xff]  ;;  %1133 = vst.msk [vmem:[%s1685_s16 + $0x160] sm:$0xff] %vm264_vm0, %v1085_v12 }
 0x12e   : > { %v1031_v18 = vld [vmem:[#allocation2 + $0x168] sm:$0xff]  ;;  %v1062_v19 = vadd.f32 %v1680_v61, %v1007_v17  ;;  %1112 = vst.msk [vmem:[%s1685_s16 + $0xb8] sm:$0xff] %vm264_vm0, %v1064_v15 }
 0x12f   : > { %v1086_v20 = vadd.f32 %v1680_v61, %v1031_v18  ;;  %1136 = vst.msk [vmem:[%s1685_s16 + $0x178] sm:$0xff] %vm264_vm0, %v1088_v16 }
 0x130   : > { %1110 = vst.msk [vmem:[%s1685_s16 + $0xa8] sm:$0xff] %vm264_vm0, %v1062_v19 }
 0x131   : > { %1134 = vst.msk [vmem:[%s1685_s16 + $0x168] sm:$0xff] %vm264_vm0, %v1086_v20 }
 0x132 PF: > { %s13_s14 = sadd.s32 1, %s1502_s14   ;;  %s1884_s12 = smov %s1498_s13 }
 0x133   : > { %p10_p5 = scmp.ge.s32.totalorder %s13_s14, 4   ;;  %s1885_s13 = smov %s1887_s15 }
 0x135   :  { %12 = sbr.rel (!%p10_p5) target bundleno = 2 (0x2), region = 76 }

</bundles_post_ra>
